<compile_context>
chip_gen: v6e
topology: v6e:2x2x1
jax: 0.10.0
libtpu: 0.0.40
codegen_flags: <defaults>
</compile_context>

<pallas_src>
import jax
import jax.numpy as jnp
from jax.experimental import pallas as pl
from jax.experimental.pallas import tpu as pltpu

EPS = 1e-5        # nn.LayerNorm default eps
SLOPE = 0.01      # nn.LeakyReLU default negative_slope
NEG = -1e30       # bias for padded class lanes (ignored by log-softmax)


# ------------------------------ fused kernel --------------------------------

def _lenet5_kernel(x_ref,
                   cw1_ref, cb1_ref, g1_ref, be1_ref,
                   cw2_ref, cb2_ref, g2_ref, be2_ref,
                   fw1_ref, fb1_ref, fw2_ref, fb2_ref, fw3_ref, fb3_ref,
                   o_ref):
    """Whole LeNet-5 forward for one batch tile.

    Activation layout: [H, BT, 256] -- H leading, batch tile in the sublanes,
    (parity, channel, width/2) folded lane-dense into the minor axis:
        lane = (w % 2) * 128 + c * (W/2) + w // 2   (unused lanes stay exactly 0).
    """
    f32 = jnp.float32
    bf16 = jnp.bfloat16
    bt = x_ref.shape[1]

    # ---- Conv1: 1->6, k=5, 28->24.  ONE K=140 MXU dot (kernel rows pre-concatenated). ----
    lhs1 = x_ref[...].reshape(24 * bt, 140).astype(bf16)
    y1 = jnp.dot(lhs1, cw1_ref[...], preferred_element_type=f32)      # [24*BT, 256]
    y1 = y1.reshape(24, bt, 256) + cb1_ref[...]
    # TODO(synk): Dropout2d(p=0.5) treated as identity (PyTorch eval-mode semantics).

    # ---- LayerNorm([6,24,24]) per sample, two-pass.  Pad lanes are exactly 0 and get
    #      zero gamma/beta; their (0-mean)^2 contribution is removed in closed form. ----
    n1 = 6.0 * 24.0 * 24.0
    pad1 = 24.0 * 256.0 - n1
    s1 = jnp.sum(jnp.sum(y1, axis=2, keepdims=True), axis=0, keepdims=True)    # [1,BT,1]
    m1 = s1 / n1
    d1 = y1 - m1
    sdd1 = jnp.sum(jnp.sum(d1 * d1, axis=2, keepdims=True), axis=0, keepdims=True)
    v1 = jnp.maximum((sdd1 - pad1 * m1 * m1) / n1, 0.0)
    y1 = d1 * jax.lax.rsqrt(v1 + EPS) * g1_ref[...] + be1_ref[...]    # affine [24,1,256]
    y1 = jnp.where(y1 > 0, y1, SLOPE * y1)                            # LeakyReLU

    # ---- MaxPool 2x2: 24x24 -> 12x12.  H: leading-dim reshape + max.
    #      W: max of the even/odd parity halves (128-lane aligned -> pure VPU). ----
    y1r = y1.reshape(12, 2, bt, 256)
    y1h = jnp.maximum(y1r[:, 0], y1r[:, 1])                           # [12, BT, 256]
    p1 = jnp.maximum(y1h[..., :128], y1h[..., 128:])                  # [12, BT, 128], lane=c*12+w

    # ---- Conv2: 6->16, k=5, 12->8.  5 banded K=128 MXU dots, f32 accumulation. ----
    acc = None
    for ki in range(5):
        lhs2 = p1[ki:ki + 8].reshape(8 * bt, 128).astype(bf16)
        t = jnp.dot(lhs2, cw2_ref[ki], preferred_element_type=f32)    # [8*BT, 256]
        acc = t if acc is None else acc + t
    y2 = acc.reshape(8, bt, 256) + cb2_ref[...]
    # TODO(synk): Dropout2d(p=0.5) treated as identity (PyTorch eval-mode semantics).

    # ---- LayerNorm([16,8,8]) per sample, two-pass with pad correction. ----
    n2 = 16.0 * 8.0 * 8.0
    pad2 = 8.0 * 256.0 - n2
    s2 = jnp.sum(jnp.sum(y2, axis=2, keepdims=True), axis=0, keepdims=True)
    m2 = s2 / n2
    d2 = y2 - m2
    sdd2 = jnp.sum(jnp.sum(d2 * d2, axis=2, keepdims=True), axis=0, keepdims=True)
    v2 = jnp.maximum((sdd2 - pad2 * m2 * m2) / n2, 0.0)
    y2 = d2 * jax.lax.rsqrt(v2 + EPS) * g2_ref[...] + be2_ref[...]
    y2 = jnp.where(y2 > 0, y2, SLOPE * y2)

    # ---- MaxPool 2x2: 8x8 -> 4x4. ----
    y2r = y2.reshape(4, 2, bt, 256)
    y2h = jnp.maximum(y2r[:, 0], y2r[:, 1])                           # [4, BT, 256]
    p2 = jnp.maximum(y2h[..., :128], y2h[..., 128:])                  # [4, BT, 128], lane=c*4+w

    # ---- FC head (NCHW flatten folded into fc1's permuted/padded weights; K=128 dots). ----
    h = fb1_ref[...]                                                  # [1, 128]
    for hq in range(4):
        h = h + jnp.dot(p2[hq].astype(bf16), fw1_ref[hq], preferred_element_type=f32)
    h = jnp.where(h > 0, h, SLOPE * h)
    h = jnp.dot(h.astype(bf16), fw2_ref[...], preferred_element_type=f32) + fb2_ref[...]
    h = jnp.where(h > 0, h, SLOPE * h)
    logits = jnp.dot(h.astype(bf16), fw3_ref[...], preferred_element_type=f32) + fb3_ref[...]

    # ---- LogSoftmax over the padded-to-128 class lanes (pads carry -1e30 bias -> exp 0). ----
    mx = jnp.max(logits, axis=-1, keepdims=True)
    z = logits - mx
    lse = jnp.log(jnp.sum(jnp.exp(z), axis=-1, keepdims=True))
    o_ref[...] = (z - lse).astype(o_ref.dtype)


# ------------------------------ parameters ----------------------------------

def init_params(key):
    ks = jax.random.split(key, 12)
    p = {}
    p["conv1_w"] = jax.random.normal(ks[0], (6, 1, 5, 5), jnp.float32) * 0.2
    p["conv1_b"] = jax.random.normal(ks[1], (6,), jnp.float32) * 0.05
    p["ln1_g"] = 1.0 + 0.1 * jax.random.normal(ks[2], (6, 24, 24), jnp.float32)
    p["ln1_b"] = 0.1 * jax.random.normal(ks[3], (6, 24, 24), jnp.float32)
    p["conv2_w"] = jax.random.normal(ks[4], (16, 6, 5, 5), jnp.float32) * 0.1
    p["conv2_b"] = jax.random.normal(ks[5], (16,), jnp.float32) * 0.05
    p["ln2_g"] = 1.0 + 0.1 * jax.random.normal(ks[6], (16, 8, 8), jnp.float32)
    p["ln2_b"] = 0.1 * jax.random.normal(ks[7], (16, 8, 8), jnp.float32)
    # PyTorch nn.Linear layout: weight [out, in] (kaiming-ish scale).
    p["fc1_w"] = jax.random.normal(ks[8], (120, 256), jnp.float32) * (2.0 / 256) ** 0.5
    p["fc1_b"] = 0.05 * jax.random.normal(ks[9], (120,), jnp.float32)
    p["fc2_w"] = jax.random.normal(ks[10], (84, 120), jnp.float32) * (2.0 / 120) ** 0.5
    p["fc2_b"] = jnp.zeros((84,), jnp.float32)
    p["fc3_w"] = jax.random.normal(ks[11], (10, 84), jnp.float32) * (2.0 / 84) ** 0.5
    p["fc3_b"] = jnp.zeros((10,), jnp.float32)
    return p


def prepare_params(p):
    """One-time repack of PyTorch-layout parameters into the kernel's layouts
    (hoisted out of the forward pass: no per-step transposes / pads / folds remain)."""
    f32, bf16 = jnp.float32, jnp.bfloat16

    # Conv1 output lane layout: lane1(c, w) = (w % 2) * 128 + c * 12 + w // 2.
    c1 = jnp.arange(6)[:, None]
    w1i = jnp.arange(24)[None, :]
    lane1 = (w1i % 2) * 128 + c1 * 12 + w1i // 2                       # [6, 24]

    # Conv1 banded weight, K concatenated over the 5 kernel rows -> [140, 256].
    wc1 = p["conv1_w"].astype(f32)[:, 0]                               # [6, 5, 5] (c, ki, kj)
    wi = jnp.arange(28)[:, None]
    wo = jnp.arange(24)[None, :]
    kj = wi - wo
    valid = ((kj >= 0) & (kj < 5)).astype(f32)
    band1 = wc1[:, :, jnp.clip(kj, 0, 4)] * valid[None, None]          # [6,5,28,24]
    cw1 = jnp.zeros((5, 28, 256), f32)
    cw1 = cw1.at[:, :, lane1].set(jnp.transpose(band1, (1, 2, 0, 3)))  # [5,28,6,24] scattered
    cw1 = cw1.reshape(140, 256).astype(bf16)

    cb1 = jnp.zeros((256,), f32).at[lane1].set(
        jnp.broadcast_to(p["conv1_b"].astype(f32)[:, None], (6, 24))).reshape(1, 1, 256)
    g1 = jnp.zeros((24, 256), f32).at[:, lane1].set(
        jnp.transpose(p["ln1_g"].astype(f32), (1, 0, 2))).reshape(24, 1, 256)
    be1 = jnp.zeros((24, 256), f32).at[:, lane1].set(
        jnp.transpose(p["ln1_b"].astype(f32), (1, 0, 2))).reshape(24, 1, 256)

    # Conv2 output lane layout: lane2(co, w) = (w % 2) * 128 + co * 4 + w // 2.
    c2 = jnp.arange(16)[:, None]
    w2i = jnp.arange(8)[None, :]
    lane2 = (w2i % 2) * 128 + c2 * 4 + w2i // 2                        # [16, 8]

    # Conv2 banded weights: rows follow pool1's compact layout (ci*12 + w_in), K padded to 128.
    wc2 = p["conv2_w"].astype(f32)                                     # [16,6,5,5]
    wi2 = jnp.arange(12)[:, None]
    wo2 = jnp.arange(8)[None, :]
    kj2 = wi2 - wo2
    valid2 = ((kj2 >= 0) & (kj2 < 5)).astype(f32)
    band2 = wc2[:, :, :, jnp.clip(kj2, 0, 4)] * valid2[None, None, None]   # [16,6,5,12,8]
    cw2 = jnp.zeros((5, 72, 256), f32)
    cw2 = cw2.at[:, :, lane2].set(
        jnp.transpose(band2, (2, 1, 3, 0, 4)).reshape(5, 72, 16, 8))
    cw2 = jnp.pad(cw2, ((0, 0), (0, 56), (0, 0))).astype(bf16)         # [5, 128, 256]

    cb2 = jnp.zeros((256,), f32).at[lane2].set(
        jnp.broadcast_to(p["conv2_b"].astype(f32)[:, None], (16, 8))).reshape(1, 1, 256)
    g2 = jnp.zeros((8, 256), f32).at[:, lane2].set(
        jnp.transpose(p["ln2_g"].astype(f32), (1, 0, 2))).reshape(8, 1, 256)
    be2 = jnp.zeros((8, 256), f32).at[:, lane2].set(
        jnp.transpose(p["ln2_b"].astype(f32), (1, 0, 2))).reshape(8, 1, 256)

    # FC1: fold the NCHW flatten + pool2 lane order (c*4 + w) into the weights; pad K->128, N->128.
    w1fc = p["fc1_w"].astype(f32).reshape(120, 16, 4, 4)               # [n, c, h, w]
    fw1 = jnp.transpose(w1fc, (2, 1, 3, 0)).reshape(4, 64, 120)        # [h, c*4+w, n]
    fw1 = jnp.pad(fw1, ((0, 0), (0, 64), (0, 8))).astype(bf16)         # [4, 128, 128]
    fb1 = jnp.pad(p["fc1_b"].astype(f32), (0, 8)).reshape(1, 128)

    fw2 = jnp.zeros((128, 128), f32).at[:120, :84].set(p["fc2_w"].astype(f32).T).astype(bf16)
    fb2 = jnp.pad(p["fc2_b"].astype(f32), (0, 44)).reshape(1, 128)

    fw3 = jnp.zeros((128, 128), f32).at[:84, :10].set(p["fc3_w"].astype(f32).T).astype(bf16)
    fb3 = jnp.full((128,), NEG, f32).at[:10].set(p["fc3_b"].astype(f32)).reshape(1, 128)

    return (cw1, cb1, g1, be1,
            cw2, cb2, g2, be2,
            fw1, fb1, fw2, fb2, fw3, fb3)


# ------------------------------ forward wrapper ------------------------------

def lenet5_forward(x_nchw, prepped, *, block_b=128):
    """Fused LeNet-5 forward.  x_nchw: [B, 1, 28, 28] -> [B, 10] log-probs.

    block_b: batch tile per grid step (default 128; clamped to round_up(B, 8) so small
    test batches don't over-pad).  At bt=128 the per-tile VMEM footprint is well under
    the 48 MiB limit on every generation (v7x included).
    """
    B = x_nchw.shape[0]
    bt = min(block_b, ((B + 7) // 8) * 8)
    bt = max(8, (bt // 8) * 8)
    bp = ((B + bt - 1) // bt) * bt

    # Layout plumbing (outside the kernel, hoisted next to the existing transpose):
    # stack the 5 conv1 kernel-row windows along the lane axis -> [24, Bpad, 140]
    # (lane = ki*28 + w), so conv1 becomes a single K=140 dot in the kernel.
    x = x_nchw[:, 0].astype(jnp.float32)                 # [B, 28, 28]
    if bp != B:
        x = jnp.pad(x, ((0, bp - B), (0, 0), (0, 0)))
    xw = jnp.stack([x[:, k:k + 24, :] for k in range(5)], axis=2)   # [Bp, 24, 5, 28]
    xk = jnp.transpose(xw, (1, 0, 2, 3)).reshape(24, bp, 140)

    def const_spec(a):
        nd = a.ndim
        return pl.BlockSpec(a.shape, lambda i, _nd=nd: (0,) * _nd)

    in_specs = [pl.BlockSpec((24, bt, 140), lambda i: (0, i, 0))]
    in_specs += [const_spec(a) for a in prepped]

    out = pl.pallas_call(
        _lenet5_kernel,
        out_shape=jax.ShapeDtypeStruct((bp, 128), jnp.float32),
        grid=(bp // bt,),
        in_specs=in_specs,
        out_specs=pl.BlockSpec((bt, 128), lambda i: (i, 0)),
        compiler_params=pltpu.CompilerParams(
            dimension_semantics=("parallel",),      # batch tiles shard across TCs (v7x)
            vmem_limit_bytes=48 * 1024 * 1024,      # <= 48 MiB: safe on v7x, trivial on v5e/v6e
        ),
    )(xk, *prepped)

    return out[:B, :10]


# ------------------------------ pure-JAX reference ---------------------------

def _ln_ref(y, g, b):
    m = jnp.mean(y, axis=(1, 2, 3), keepdims=True)
    v = jnp.mean((y - m) ** 2, axis=(1, 2, 3), keepdims=True)
    return (y - m) * jax.lax.rsqrt(v + EPS) * g[None] + b[None]


def _pool_ref(y):
    b, c, h, w = y.shape
    return jnp.max(y.reshape(b, c, h // 2, 2, w // 2, 2), axis=(3, 5))


def lenet5_reference(x_nchw, p):
    """f32 reference with PyTorch eval-mode semantics."""
    lrelu = lambda t: jnp.where(t > 0, t, SLOPE * t)
    dn = ("NCHW", "OIHW", "NCHW")
    y = jax.lax.conv_general_dilated(x_nchw.astype(jnp.float32), p["conv1_w"],
                                     (1, 1), "VALID", dimension_numbers=dn)
    y = y + p["conv1_b"][None, :, None, None]
    y = _pool_ref(lrelu(_ln_ref(y, p["ln1_g"], p["ln1_b"])))
    y = jax.lax.conv_general_dilated(y, p["conv2_w"], (1, 1), "VALID",
                                     dimension_numbers=dn)
    y = y + p["conv2_b"][None, :, None, None]
    y = _pool_ref(lrelu(_ln_ref(y, p["ln2_g"], p["ln2_b"])))
    f = y.reshape(y.shape[0], -1)
    h = lrelu(f @ p["fc1_w"].T + p["fc1_b"])
    h = lrelu(h @ p["fc2_w"].T + p["fc2_b"])
    logits = h @ p["fc3_w"].T + p["fc3_b"]
    return jax.nn.log_softmax(logits, axis=-1)


# ----------------------------------- main ------------------------------------

if __name__ == "__main__":
    key = jax.random.PRNGKey(0)
    k_x, k_p, k_x2 = jax.random.split(key, 3)
    # LeNet-5 input implied by LayerNorm([6,24,24]): [B, 1, 28, 28]
    x = jax.random.normal(k_x, (2, 1, 28, 28), jnp.float32)
    params = init_params(k_p)
    prepped = prepare_params(params)          # one-time parameter repack (hoisted)

    fwd = jax.jit(lambda xx: lenet5_forward(xx, prepped))
    out = jax.block_until_ready(fwd(x))

    assert out.shape == (2, 10), out.shape
    assert bool(jnp.all(jnp.isfinite(out)))
    # rows of log-softmax must (approximately) exponentiate-sum to 1
    assert bool(jnp.allclose(jnp.sum(jnp.exp(out), axis=-1), 1.0, atol=1e-4))
    # agree with the f32 reference (loose tolerance: MXU inputs are bf16)
    ref = lenet5_reference(x, params)
    assert float(jnp.max(jnp.abs(out - ref))) < 0.3

    # second shape: exercises batch padding + a multi-step grid (two 8-sample tiles)
    x2 = jax.random.normal(k_x2, (10, 1, 28, 28), jnp.float32)
    fwd2 = jax.jit(lambda xx: lenet5_forward(xx, prepped, block_b=8))
    out2 = jax.block_until_ready(fwd2(x2))
    ref2 = lenet5_reference(x2, params)
    assert out2.shape == (10, 10)
    assert float(jnp.max(jnp.abs(out2 - ref2))) < 0.3

    print("KERNEL_OK")
</pallas_src>

<mosaic_0001>
module attributes {stable_mosaic.version = 11 : i64} {
  func.func @_lenet5_kernel(%arg0: i32, %arg1: memref<24x8x140xf32, #tpu.memory_space<vmem>>, %arg2: memref<140x256xbf16, #tpu.memory_space<vmem>>, %arg3: memref<1x1x256xf32, #tpu.memory_space<vmem>>, %arg4: memref<24x1x256xf32, #tpu.memory_space<vmem>>, %arg5: memref<24x1x256xf32, #tpu.memory_space<vmem>>, %arg6: memref<5x128x256xbf16, #tpu.memory_space<vmem>>, %arg7: memref<1x1x256xf32, #tpu.memory_space<vmem>>, %arg8: memref<8x1x256xf32, #tpu.memory_space<vmem>>, %arg9: memref<8x1x256xf32, #tpu.memory_space<vmem>>, %arg10: memref<4x128x128xbf16, #tpu.memory_space<vmem>>, %arg11: memref<1x128xf32, #tpu.memory_space<vmem>>, %arg12: memref<128x128xbf16, #tpu.memory_space<vmem>>, %arg13: memref<1x128xf32, #tpu.memory_space<vmem>>, %arg14: memref<128x128xbf16, #tpu.memory_space<vmem>>, %arg15: memref<1x128xf32, #tpu.memory_space<vmem>>, %arg16: memref<8x128xf32, #tpu.memory_space<vmem>>) attributes {dimension_semantics = [#tpu.dimension_semantics<parallel>], iteration_bounds = array<i64: 1>, scalar_prefetch = 0 : i64, scratch_operands = 0 : i64, tpu.core_type = #tpu.core_type<tc>, window_params = [{transform_indices = @transform_0, window_bounds = array<i64: 24, 8, 140>}, {pipeline_mode = #tpu.pipeline_mode<synchronous>, transform_indices = @transform_1, window_bounds = array<i64: 140, 256>}, {pipeline_mode = #tpu.pipeline_mode<synchronous>, transform_indices = @transform_2, window_bounds = array<i64: 1, 1, 256>}, {pipeline_mode = #tpu.pipeline_mode<synchronous>, transform_indices = @transform_3, window_bounds = array<i64: 24, 1, 256>}, {pipeline_mode = #tpu.pipeline_mode<synchronous>, transform_indices = @transform_4, window_bounds = array<i64: 24, 1, 256>}, {pipeline_mode = #tpu.pipeline_mode<synchronous>, transform_indices = @transform_5, window_bounds = array<i64: 5, 128, 256>}, {pipeline_mode = #tpu.pipeline_mode<synchronous>, transform_indices = @transform_6, window_bounds = array<i64: 1, 1, 256>}, {pipeline_mode = #tpu.pipeline_mode<synchronous>, transform_indices = @transform_7, window_bounds = array<i64: 8, 1, 256>}, {pipeline_mode = #tpu.pipeline_mode<synchronous>, transform_indices = @transform_8, window_bounds = array<i64: 8, 1, 256>}, {pipeline_mode = #tpu.pipeline_mode<synchronous>, transform_indices = @transform_9, window_bounds = array<i64: 4, 128, 128>}, {pipeline_mode = #tpu.pipeline_mode<synchronous>, transform_indices = @transform_10, window_bounds = array<i64: 1, 128>}, {pipeline_mode = #tpu.pipeline_mode<synchronous>, transform_indices = @transform_11, window_bounds = array<i64: 128, 128>}, {pipeline_mode = #tpu.pipeline_mode<synchronous>, transform_indices = @transform_12, window_bounds = array<i64: 1, 128>}, {pipeline_mode = #tpu.pipeline_mode<synchronous>, transform_indices = @transform_13, window_bounds = array<i64: 128, 128>}, {pipeline_mode = #tpu.pipeline_mode<synchronous>, transform_indices = @transform_14, window_bounds = array<i64: 1, 128>}, {transform_indices = @transform_15, window_bounds = array<i64: 8, 128>}]} {
    %c0 = arith.constant 0 : index
    %c0_0 = arith.constant 0 : index
    %c0_1 = arith.constant 0 : index
    %0 = vector.load %arg1[%c0, %c0_0, %c0_1] : memref<24x8x140xf32, #tpu.memory_space<vmem>>, vector<24x8x140xf32>
    %1 = vector.shape_cast %0 : vector<24x8x140xf32> to vector<192x140xf32>
    %2 = arith.truncf %1 : vector<192x140xf32> to vector<192x140xbf16>
    %c0_2 = arith.constant 0 : index
    %c0_3 = arith.constant 0 : index
    %3 = vector.load %arg2[%c0_2, %c0_3] : memref<140x256xbf16, #tpu.memory_space<vmem>>, vector<140x256xbf16>
    %cst = arith.constant dense<0.000000e+00> : vector<192x256xf32>
    %4 = tpu.matmul %2, %3, %cst {dimension_numbers = #tpu.dot_dimension_numbers<[1], [0], [0], [1], [0, 0, 1, 1], [], []>} : vector<192x140xbf16>, vector<140x256xbf16>, vector<192x256xf32> -> vector<192x256xf32>
    %5 = vector.shape_cast %4 : vector<192x256xf32> to vector<24x8x256xf32>
    %c0_4 = arith.constant 0 : index
    %c0_5 = arith.constant 0 : index
    %c0_6 = arith.constant 0 : index
    %6 = vector.load %arg3[%c0_4, %c0_5, %c0_6] : memref<1x1x256xf32, #tpu.memory_space<vmem>>, vector<1x1x256xf32>
    %7 = vector.broadcast %6 : vector<1x1x256xf32> to vector<24x8x256xf32>
    %8 = arith.addf %5, %7 : vector<24x8x256xf32>
    %cst_7 = arith.constant dense<0.000000e+00> : vector<24x8xf32>
    %9 = vector.multi_reduction <add>, %8, %cst_7 [2] : vector<24x8x256xf32> to vector<24x8xf32>
    %10 = vector.shape_cast %9 : vector<24x8xf32> to vector<24x8x1xf32>
    %cst_8 = arith.constant dense<0.000000e+00> : vector<8x1xf32>
    %11 = vector.multi_reduction <add>, %10, %cst_8 [0] : vector<24x8x1xf32> to vector<8x1xf32>
    %12 = vector.shape_cast %11 : vector<8x1xf32> to vector<1x8x1xf32>
    %cst_9 = arith.constant 3.456000e+03 : f32
    %13 = vector.broadcast %cst_9 : f32 to vector<1x8x1xf32>
    %14 = arith.divf %12, %13 : vector<1x8x1xf32>
    %15 = vector.broadcast %14 : vector<1x8x1xf32> to vector<24x8x256xf32>
    %16 = arith.subf %8, %15 : vector<24x8x256xf32>
    %17 = arith.mulf %16, %16 : vector<24x8x256xf32>
    %cst_10 = arith.constant dense<0.000000e+00> : vector<24x8xf32>
    %18 = vector.multi_reduction <add>, %17, %cst_10 [2] : vector<24x8x256xf32> to vector<24x8xf32>
    %19 = vector.shape_cast %18 : vector<24x8xf32> to vector<24x8x1xf32>
    %cst_11 = arith.constant dense<0.000000e+00> : vector<8x1xf32>
    %20 = vector.multi_reduction <add>, %19, %cst_11 [0] : vector<24x8x1xf32> to vector<8x1xf32>
    %21 = vector.shape_cast %20 : vector<8x1xf32> to vector<1x8x1xf32>
    %cst_12 = arith.constant 2.688000e+03 : f32
    %22 = vector.broadcast %cst_12 : f32 to vector<1x8x1xf32>
    %23 = arith.mulf %22, %14 : vector<1x8x1xf32>
    %24 = arith.mulf %23, %14 : vector<1x8x1xf32>
    %25 = arith.subf %21, %24 : vector<1x8x1xf32>
    %cst_13 = arith.constant 3.456000e+03 : f32
    %26 = vector.broadcast %cst_13 : f32 to vector<1x8x1xf32>
    %27 = arith.divf %25, %26 : vector<1x8x1xf32>
    %cst_14 = arith.constant 0.000000e+00 : f32
    %28 = vector.broadcast %cst_14 : f32 to vector<1x8x1xf32>
    %29 = arith.maximumf %27, %28 : vector<1x8x1xf32>
    %cst_15 = arith.constant 9.99999974E-6 : f32
    %30 = vector.broadcast %cst_15 : f32 to vector<1x8x1xf32>
    %31 = arith.addf %29, %30 : vector<1x8x1xf32>
    %32 = math.rsqrt %31 : vector<1x8x1xf32>
    %33 = vector.broadcast %32 : vector<1x8x1xf32> to vector<24x8x256xf32>
    %34 = arith.mulf %16, %33 : vector<24x8x256xf32>
    %c0_16 = arith.constant 0 : index
    %c0_17 = arith.constant 0 : index
    %c0_18 = arith.constant 0 : index
    %35 = vector.load %arg4[%c0_16, %c0_17, %c0_18] : memref<24x1x256xf32, #tpu.memory_space<vmem>>, vector<24x1x256xf32>
    %36 = vector.broadcast %35 : vector<24x1x256xf32> to vector<24x8x256xf32>
    %37 = arith.mulf %34, %36 : vector<24x8x256xf32>
    %c0_19 = arith.constant 0 : index
    %c0_20 = arith.constant 0 : index
    %c0_21 = arith.constant 0 : index
    %38 = vector.load %arg5[%c0_19, %c0_20, %c0_21] : memref<24x1x256xf32, #tpu.memory_space<vmem>>, vector<24x1x256xf32>
    %39 = vector.broadcast %38 : vector<24x1x256xf32> to vector<24x8x256xf32>
    %40 = arith.addf %37, %39 : vector<24x8x256xf32>
    %cst_22 = arith.constant 0.000000e+00 : f32
    %41 = vector.broadcast %cst_22 : f32 to vector<24x8x256xf32>
    %42 = arith.cmpf ogt, %40, %41 : vector<24x8x256xf32>
    %cst_23 = arith.constant 0.00999999977 : f32
    %43 = vector.broadcast %cst_23 : f32 to vector<24x8x256xf32>
    %44 = arith.mulf %43, %40 : vector<24x8x256xf32>
    %45 = arith.select %42, %40, %44 : vector<24x8x256xi1>, vector<24x8x256xf32>
    %46 = vector.shape_cast %45 : vector<24x8x256xf32> to vector<12x2x8x256xf32>
    %47 = vector.extract_strided_slice %46 {offsets = [0, 0, 0, 0], sizes = [12, 1, 8, 256], strides = [1, 1, 1, 1]} : vector<12x2x8x256xf32> to vector<12x1x8x256xf32>
    %48 = vector.shape_cast %47 : vector<12x1x8x256xf32> to vector<12x8x256xf32>
    %49 = vector.extract_strided_slice %46 {offsets = [0, 1, 0, 0], sizes = [12, 1, 8, 256], strides = [1, 1, 1, 1]} : vector<12x2x8x256xf32> to vector<12x1x8x256xf32>
    %50 = vector.shape_cast %49 : vector<12x1x8x256xf32> to vector<12x8x256xf32>
    %51 = arith.maximumf %48, %50 : vector<12x8x256xf32>
    %52 = vector.extract_strided_slice %51 {offsets = [0, 0, 0], sizes = [12, 8, 128], strides = [1, 1, 1]} : vector<12x8x256xf32> to vector<12x8x128xf32>
    %53 = vector.extract_strided_slice %51 {offsets = [0, 0, 128], sizes = [12, 8, 128], strides = [1, 1, 1]} : vector<12x8x256xf32> to vector<12x8x128xf32>
    %54 = arith.maximumf %52, %53 : vector<12x8x128xf32>
    %55 = vector.extract_strided_slice %54 {offsets = [0, 0, 0], sizes = [8, 8, 128], strides = [1, 1, 1]} : vector<12x8x128xf32> to vector<8x8x128xf32>
    %56 = vector.shape_cast %55 : vector<8x8x128xf32> to vector<64x128xf32>
    %57 = arith.truncf %56 : vector<64x128xf32> to vector<64x128xbf16>
    %c0_24 = arith.constant 0 : index
    %c0_25 = arith.constant 0 : index
    %c0_26 = arith.constant 0 : index
    %58 = vector.load %arg6[%c0_24, %c0_25, %c0_26] : memref<5x128x256xbf16, #tpu.memory_space<vmem>>, vector<1x128x256xbf16>
    %59 = vector.shape_cast %58 : vector<1x128x256xbf16> to vector<128x256xbf16>
    %cst_27 = arith.constant dense<0.000000e+00> : vector<64x256xf32>
    %60 = tpu.matmul %57, %59, %cst_27 {dimension_numbers = #tpu.dot_dimension_numbers<[1], [0], [0], [1], [0, 0, 1, 1], [], []>} : vector<64x128xbf16>, vector<128x256xbf16>, vector<64x256xf32> -> vector<64x256xf32>
    %61 = vector.extract_strided_slice %54 {offsets = [1, 0, 0], sizes = [8, 8, 128], strides = [1, 1, 1]} : vector<12x8x128xf32> to vector<8x8x128xf32>
    %62 = vector.shape_cast %61 : vector<8x8x128xf32> to vector<64x128xf32>
    %63 = arith.truncf %62 : vector<64x128xf32> to vector<64x128xbf16>
    %c1 = arith.constant 1 : index
    %c0_28 = arith.constant 0 : index
    %c0_29 = arith.constant 0 : index
    %64 = vector.load %arg6[%c1, %c0_28, %c0_29] : memref<5x128x256xbf16, #tpu.memory_space<vmem>>, vector<1x128x256xbf16>
    %65 = vector.shape_cast %64 : vector<1x128x256xbf16> to vector<128x256xbf16>
    %cst_30 = arith.constant dense<0.000000e+00> : vector<64x256xf32>
    %66 = tpu.matmul %63, %65, %cst_30 {dimension_numbers = #tpu.dot_dimension_numbers<[1], [0], [0], [1], [0, 0, 1, 1], [], []>} : vector<64x128xbf16>, vector<128x256xbf16>, vector<64x256xf32> -> vector<64x256xf32>
    %67 = arith.addf %60, %66 : vector<64x256xf32>
    %68 = vector.extract_strided_slice %54 {offsets = [2, 0, 0], sizes = [8, 8, 128], strides = [1, 1, 1]} : vector<12x8x128xf32> to vector<8x8x128xf32>
    %69 = vector.shape_cast %68 : vector<8x8x128xf32> to vector<64x128xf32>
    %70 = arith.truncf %69 : vector<64x128xf32> to vector<64x128xbf16>
    %c2 = arith.constant 2 : index
    %c0_31 = arith.constant 0 : index
    %c0_32 = arith.constant 0 : index
    %71 = vector.load %arg6[%c2, %c0_31, %c0_32] : memref<5x128x256xbf16, #tpu.memory_space<vmem>>, vector<1x128x256xbf16>
    %72 = vector.shape_cast %71 : vector<1x128x256xbf16> to vector<128x256xbf16>
    %cst_33 = arith.constant dense<0.000000e+00> : vector<64x256xf32>
    %73 = tpu.matmul %70, %72, %cst_33 {dimension_numbers = #tpu.dot_dimension_numbers<[1], [0], [0], [1], [0, 0, 1, 1], [], []>} : vector<64x128xbf16>, vector<128x256xbf16>, vector<64x256xf32> -> vector<64x256xf32>
    %74 = arith.addf %67, %73 : vector<64x256xf32>
    %75 = vector.extract_strided_slice %54 {offsets = [3, 0, 0], sizes = [8, 8, 128], strides = [1, 1, 1]} : vector<12x8x128xf32> to vector<8x8x128xf32>
    %76 = vector.shape_cast %75 : vector<8x8x128xf32> to vector<64x128xf32>
    %77 = arith.truncf %76 : vector<64x128xf32> to vector<64x128xbf16>
    %c3 = arith.constant 3 : index
    %c0_34 = arith.constant 0 : index
    %c0_35 = arith.constant 0 : index
    %78 = vector.load %arg6[%c3, %c0_34, %c0_35] : memref<5x128x256xbf16, #tpu.memory_space<vmem>>, vector<1x128x256xbf16>
    %79 = vector.shape_cast %78 : vector<1x128x256xbf16> to vector<128x256xbf16>
    %cst_36 = arith.constant dense<0.000000e+00> : vector<64x256xf32>
    %80 = tpu.matmul %77, %79, %cst_36 {dimension_numbers = #tpu.dot_dimension_numbers<[1], [0], [0], [1], [0, 0, 1, 1], [], []>} : vector<64x128xbf16>, vector<128x256xbf16>, vector<64x256xf32> -> vector<64x256xf32>
    %81 = arith.addf %74, %80 : vector<64x256xf32>
    %82 = vector.extract_strided_slice %54 {offsets = [4, 0, 0], sizes = [8, 8, 128], strides = [1, 1, 1]} : vector<12x8x128xf32> to vector<8x8x128xf32>
    %83 = vector.shape_cast %82 : vector<8x8x128xf32> to vector<64x128xf32>
    %84 = arith.truncf %83 : vector<64x128xf32> to vector<64x128xbf16>
    %c4 = arith.constant 4 : index
    %c0_37 = arith.constant 0 : index
    %c0_38 = arith.constant 0 : index
    %85 = vector.load %arg6[%c4, %c0_37, %c0_38] : memref<5x128x256xbf16, #tpu.memory_space<vmem>>, vector<1x128x256xbf16>
    %86 = vector.shape_cast %85 : vector<1x128x256xbf16> to vector<128x256xbf16>
    %cst_39 = arith.constant dense<0.000000e+00> : vector<64x256xf32>
    %87 = tpu.matmul %84, %86, %cst_39 {dimension_numbers = #tpu.dot_dimension_numbers<[1], [0], [0], [1], [0, 0, 1, 1], [], []>} : vector<64x128xbf16>, vector<128x256xbf16>, vector<64x256xf32> -> vector<64x256xf32>
    %88 = arith.addf %81, %87 : vector<64x256xf32>
    %89 = vector.shape_cast %88 : vector<64x256xf32> to vector<8x8x256xf32>
    %c0_40 = arith.constant 0 : index
    %c0_41 = arith.constant 0 : index
    %c0_42 = arith.constant 0 : index
    %90 = vector.load %arg7[%c0_40, %c0_41, %c0_42] : memref<1x1x256xf32, #tpu.memory_space<vmem>>, vector<1x1x256xf32>
    %91 = vector.broadcast %90 : vector<1x1x256xf32> to vector<8x8x256xf32>
    %92 = arith.addf %89, %91 : vector<8x8x256xf32>
    %cst_43 = arith.constant dense<0.000000e+00> : vector<8x8xf32>
    %93 = vector.multi_reduction <add>, %92, %cst_43 [2] : vector<8x8x256xf32> to vector<8x8xf32>
    %94 = vector.shape_cast %93 : vector<8x8xf32> to vector<8x8x1xf32>
    %cst_44 = arith.constant dense<0.000000e+00> : vector<8x1xf32>
    %95 = vector.multi_reduction <add>, %94, %cst_44 [0] : vector<8x8x1xf32> to vector<8x1xf32>
    %96 = vector.shape_cast %95 : vector<8x1xf32> to vector<1x8x1xf32>
    %cst_45 = arith.constant 1.024000e+03 : f32
    %97 = vector.broadcast %cst_45 : f32 to vector<1x8x1xf32>
    %98 = arith.divf %96, %97 : vector<1x8x1xf32>
    %99 = vector.broadcast %98 : vector<1x8x1xf32> to vector<8x8x256xf32>
    %100 = arith.subf %92, %99 : vector<8x8x256xf32>
    %101 = arith.mulf %100, %100 : vector<8x8x256xf32>
    %cst_46 = arith.constant dense<0.000000e+00> : vector<8x8xf32>
    %102 = vector.multi_reduction <add>, %101, %cst_46 [2] : vector<8x8x256xf32> to vector<8x8xf32>
    %103 = vector.shape_cast %102 : vector<8x8xf32> to vector<8x8x1xf32>
    %cst_47 = arith.constant dense<0.000000e+00> : vector<8x1xf32>
    %104 = vector.multi_reduction <add>, %103, %cst_47 [0] : vector<8x8x1xf32> to vector<8x1xf32>
    %105 = vector.shape_cast %104 : vector<8x1xf32> to vector<1x8x1xf32>
    %cst_48 = arith.constant 1.024000e+03 : f32
    %106 = vector.broadcast %cst_48 : f32 to vector<1x8x1xf32>
    %107 = arith.mulf %106, %98 : vector<1x8x1xf32>
    %108 = arith.mulf %107, %98 : vector<1x8x1xf32>
    %109 = arith.subf %105, %108 : vector<1x8x1xf32>
    %cst_49 = arith.constant 1.024000e+03 : f32
    %110 = vector.broadcast %cst_49 : f32 to vector<1x8x1xf32>
    %111 = arith.divf %109, %110 : vector<1x8x1xf32>
    %cst_50 = arith.constant 0.000000e+00 : f32
    %112 = vector.broadcast %cst_50 : f32 to vector<1x8x1xf32>
    %113 = arith.maximumf %111, %112 : vector<1x8x1xf32>
    %cst_51 = arith.constant 9.99999974E-6 : f32
    %114 = vector.broadcast %cst_51 : f32 to vector<1x8x1xf32>
    %115 = arith.addf %113, %114 : vector<1x8x1xf32>
    %116 = math.rsqrt %115 : vector<1x8x1xf32>
    %117 = vector.broadcast %116 : vector<1x8x1xf32> to vector<8x8x256xf32>
    %118 = arith.mulf %100, %117 : vector<8x8x256xf32>
    %c0_52 = arith.constant 0 : index
    %c0_53 = arith.constant 0 : index
    %c0_54 = arith.constant 0 : index
    %119 = vector.load %arg8[%c0_52, %c0_53, %c0_54] : memref<8x1x256xf32, #tpu.memory_space<vmem>>, vector<8x1x256xf32>
    %120 = vector.broadcast %119 : vector<8x1x256xf32> to vector<8x8x256xf32>
    %121 = arith.mulf %118, %120 : vector<8x8x256xf32>
    %c0_55 = arith.constant 0 : index
    %c0_56 = arith.constant 0 : index
    %c0_57 = arith.constant 0 : index
    %122 = vector.load %arg9[%c0_55, %c0_56, %c0_57] : memref<8x1x256xf32, #tpu.memory_space<vmem>>, vector<8x1x256xf32>
    %123 = vector.broadcast %122 : vector<8x1x256xf32> to vector<8x8x256xf32>
    %124 = arith.addf %121, %123 : vector<8x8x256xf32>
    %cst_58 = arith.constant 0.000000e+00 : f32
    %125 = vector.broadcast %cst_58 : f32 to vector<8x8x256xf32>
    %126 = arith.cmpf ogt, %124, %125 : vector<8x8x256xf32>
    %cst_59 = arith.constant 0.00999999977 : f32
    %127 = vector.broadcast %cst_59 : f32 to vector<8x8x256xf32>
    %128 = arith.mulf %127, %124 : vector<8x8x256xf32>
    %129 = arith.select %126, %124, %128 : vector<8x8x256xi1>, vector<8x8x256xf32>
    %130 = vector.shape_cast %129 : vector<8x8x256xf32> to vector<4x2x8x256xf32>
    %131 = vector.extract_strided_slice %130 {offsets = [0, 0, 0, 0], sizes = [4, 1, 8, 256], strides = [1, 1, 1, 1]} : vector<4x2x8x256xf32> to vector<4x1x8x256xf32>
    %132 = vector.shape_cast %131 : vector<4x1x8x256xf32> to vector<4x8x256xf32>
    %133 = vector.extract_strided_slice %130 {offsets = [0, 1, 0, 0], sizes = [4, 1, 8, 256], strides = [1, 1, 1, 1]} : vector<4x2x8x256xf32> to vector<4x1x8x256xf32>
    %134 = vector.shape_cast %133 : vector<4x1x8x256xf32> to vector<4x8x256xf32>
    %135 = arith.maximumf %132, %134 : vector<4x8x256xf32>
    %136 = vector.extract_strided_slice %135 {offsets = [0, 0, 0], sizes = [4, 8, 128], strides = [1, 1, 1]} : vector<4x8x256xf32> to vector<4x8x128xf32>
    %137 = vector.extract_strided_slice %135 {offsets = [0, 0, 128], sizes = [4, 8, 128], strides = [1, 1, 1]} : vector<4x8x256xf32> to vector<4x8x128xf32>
    %138 = arith.maximumf %136, %137 : vector<4x8x128xf32>
    %c0_60 = arith.constant 0 : index
    %c0_61 = arith.constant 0 : index
    %139 = vector.load %arg11[%c0_60, %c0_61] : memref<1x128xf32, #tpu.memory_space<vmem>>, vector<1x128xf32>
    %140 = vector.extract_strided_slice %138 {offsets = [0, 0, 0], sizes = [1, 8, 128], strides = [1, 1, 1]} : vector<4x8x128xf32> to vector<1x8x128xf32>
    %141 = vector.shape_cast %140 : vector<1x8x128xf32> to vector<8x128xf32>
    %142 = arith.truncf %141 : vector<8x128xf32> to vector<8x128xbf16>
    %c0_62 = arith.constant 0 : index
    %c0_63 = arith.constant 0 : index
    %c0_64 = arith.constant 0 : index
    %143 = vector.load %arg10[%c0_62, %c0_63, %c0_64] : memref<4x128x128xbf16, #tpu.memory_space<vmem>>, vector<1x128x128xbf16>
    %144 = vector.shape_cast %143 : vector<1x128x128xbf16> to vector<128x128xbf16>
    %cst_65 = arith.constant dense<0.000000e+00> : vector<8x128xf32>
    %145 = tpu.matmul %142, %144, %cst_65 {dimension_numbers = #tpu.dot_dimension_numbers<[1], [0], [0], [1], [0, 0, 1, 1], [], []>} : vector<8x128xbf16>, vector<128x128xbf16>, vector<8x128xf32> -> vector<8x128xf32>
    %146 = vector.broadcast %139 : vector<1x128xf32> to vector<8x128xf32>
    %147 = arith.addf %146, %145 : vector<8x128xf32>
    %148 = vector.extract_strided_slice %138 {offsets = [1, 0, 0], sizes = [1, 8, 128], strides = [1, 1, 1]} : vector<4x8x128xf32> to vector<1x8x128xf32>
    %149 = vector.shape_cast %148 : vector<1x8x128xf32> to vector<8x128xf32>
    %150 = arith.truncf %149 : vector<8x128xf32> to vector<8x128xbf16>
    %c1_66 = arith.constant 1 : index
    %c0_67 = arith.constant 0 : index
    %c0_68 = arith.constant 0 : index
    %151 = vector.load %arg10[%c1_66, %c0_67, %c0_68] : memref<4x128x128xbf16, #tpu.memory_space<vmem>>, vector<1x128x128xbf16>
    %152 = vector.shape_cast %151 : vector<1x128x128xbf16> to vector<128x128xbf16>
    %cst_69 = arith.constant dense<0.000000e+00> : vector<8x128xf32>
    %153 = tpu.matmul %150, %152, %cst_69 {dimension_numbers = #tpu.dot_dimension_numbers<[1], [0], [0], [1], [0, 0, 1, 1], [], []>} : vector<8x128xbf16>, vector<128x128xbf16>, vector<8x128xf32> -> vector<8x128xf32>
    %154 = arith.addf %147, %153 : vector<8x128xf32>
    %155 = vector.extract_strided_slice %138 {offsets = [2, 0, 0], sizes = [1, 8, 128], strides = [1, 1, 1]} : vector<4x8x128xf32> to vector<1x8x128xf32>
    %156 = vector.shape_cast %155 : vector<1x8x128xf32> to vector<8x128xf32>
    %157 = arith.truncf %156 : vector<8x128xf32> to vector<8x128xbf16>
    %c2_70 = arith.constant 2 : index
    %c0_71 = arith.constant 0 : index
    %c0_72 = arith.constant 0 : index
    %158 = vector.load %arg10[%c2_70, %c0_71, %c0_72] : memref<4x128x128xbf16, #tpu.memory_space<vmem>>, vector<1x128x128xbf16>
    %159 = vector.shape_cast %158 : vector<1x128x128xbf16> to vector<128x128xbf16>
    %cst_73 = arith.constant dense<0.000000e+00> : vector<8x128xf32>
    %160 = tpu.matmul %157, %159, %cst_73 {dimension_numbers = #tpu.dot_dimension_numbers<[1], [0], [0], [1], [0, 0, 1, 1], [], []>} : vector<8x128xbf16>, vector<128x128xbf16>, vector<8x128xf32> -> vector<8x128xf32>
    %161 = arith.addf %154, %160 : vector<8x128xf32>
    %162 = vector.extract_strided_slice %138 {offsets = [3, 0, 0], sizes = [1, 8, 128], strides = [1, 1, 1]} : vector<4x8x128xf32> to vector<1x8x128xf32>
    %163 = vector.shape_cast %162 : vector<1x8x128xf32> to vector<8x128xf32>
    %164 = arith.truncf %163 : vector<8x128xf32> to vector<8x128xbf16>
    %c3_74 = arith.constant 3 : index
    %c0_75 = arith.constant 0 : index
    %c0_76 = arith.constant 0 : index
    %165 = vector.load %arg10[%c3_74, %c0_75, %c0_76] : memref<4x128x128xbf16, #tpu.memory_space<vmem>>, vector<1x128x128xbf16>
    %166 = vector.shape_cast %165 : vector<1x128x128xbf16> to vector<128x128xbf16>
    %cst_77 = arith.constant dense<0.000000e+00> : vector<8x128xf32>
    %167 = tpu.matmul %164, %166, %cst_77 {dimension_numbers = #tpu.dot_dimension_numbers<[1], [0], [0], [1], [0, 0, 1, 1], [], []>} : vector<8x128xbf16>, vector<128x128xbf16>, vector<8x128xf32> -> vector<8x128xf32>
    %168 = arith.addf %161, %167 : vector<8x128xf32>
    %cst_78 = arith.constant 0.000000e+00 : f32
    %169 = vector.broadcast %cst_78 : f32 to vector<8x128xf32>
    %170 = arith.cmpf ogt, %168, %169 : vector<8x128xf32>
    %cst_79 = arith.constant 0.00999999977 : f32
    %171 = vector.broadcast %cst_79 : f32 to vector<8x128xf32>
    %172 = arith.mulf %171, %168 : vector<8x128xf32>
    %173 = arith.select %170, %168, %172 : vector<8x128xi1>, vector<8x128xf32>
    %174 = arith.truncf %173 : vector<8x128xf32> to vector<8x128xbf16>
    %c0_80 = arith.constant 0 : index
    %c0_81 = arith.constant 0 : index
    %175 = vector.load %arg12[%c0_80, %c0_81] : memref<128x128xbf16, #tpu.memory_space<vmem>>, vector<128x128xbf16>
    %cst_82 = arith.constant dense<0.000000e+00> : vector<8x128xf32>
    %176 = tpu.matmul %174, %175, %cst_82 {dimension_numbers = #tpu.dot_dimension_numbers<[1], [0], [0], [1], [0, 0, 1, 1], [], []>} : vector<8x128xbf16>, vector<128x128xbf16>, vector<8x128xf32> -> vector<8x128xf32>
    %c0_83 = arith.constant 0 : index
    %c0_84 = arith.constant 0 : index
    %177 = vector.load %arg13[%c0_83, %c0_84] : memref<1x128xf32, #tpu.memory_space<vmem>>, vector<1x128xf32>
    %178 = vector.broadcast %177 : vector<1x128xf32> to vector<8x128xf32>
    %179 = arith.addf %176, %178 : vector<8x128xf32>
    %cst_85 = arith.constant 0.000000e+00 : f32
    %180 = vector.broadcast %cst_85 : f32 to vector<8x128xf32>
    %181 = arith.cmpf ogt, %179, %180 : vector<8x128xf32>
    %cst_86 = arith.constant 0.00999999977 : f32
    %182 = vector.broadcast %cst_86 : f32 to vector<8x128xf32>
    %183 = arith.mulf %182, %179 : vector<8x128xf32>
    %184 = arith.select %181, %179, %183 : vector<8x128xi1>, vector<8x128xf32>
    %185 = arith.truncf %184 : vector<8x128xf32> to vector<8x128xbf16>
    %c0_87 = arith.constant 0 : index
    %c0_88 = arith.constant 0 : index
    %186 = vector.load %arg14[%c0_87, %c0_88] : memref<128x128xbf16, #tpu.memory_space<vmem>>, vector<128x128xbf16>
    %cst_89 = arith.constant dense<0.000000e+00> : vector<8x128xf32>
    %187 = tpu.matmul %185, %186, %cst_89 {dimension_numbers = #tpu.dot_dimension_numbers<[1], [0], [0], [1], [0, 0, 1, 1], [], []>} : vector<8x128xbf16>, vector<128x128xbf16>, vector<8x128xf32> -> vector<8x128xf32>
    %c0_90 = arith.constant 0 : index
    %c0_91 = arith.constant 0 : index
    %188 = vector.load %arg15[%c0_90, %c0_91] : memref<1x128xf32, #tpu.memory_space<vmem>>, vector<1x128xf32>
    %189 = vector.broadcast %188 : vector<1x128xf32> to vector<8x128xf32>
    %190 = arith.addf %187, %189 : vector<8x128xf32>
    %cst_92 = arith.constant dense<0xFF800000> : vector<8xf32>
    %191 = vector.multi_reduction <maximumf>, %190, %cst_92 [1] : vector<8x128xf32> to vector<8xf32>
    %192 = vector.shape_cast %191 : vector<8xf32> to vector<8x1xf32>
    %193 = vector.broadcast %192 : vector<8x1xf32> to vector<8x128xf32>
    %194 = arith.subf %190, %193 : vector<8x128xf32>
    %195 = math.exp %194 : vector<8x128xf32>
    %cst_93 = arith.constant dense<0.000000e+00> : vector<8xf32>
    %196 = vector.multi_reduction <add>, %195, %cst_93 [1] : vector<8x128xf32> to vector<8xf32>
    %197 = vector.shape_cast %196 : vector<8xf32> to vector<8x1xf32>
    %198 = math.log %197 : vector<8x1xf32>
    %199 = vector.broadcast %198 : vector<8x1xf32> to vector<8x128xf32>
    %200 = arith.subf %194, %199 : vector<8x128xf32>
    %c0_94 = arith.constant 0 : index
    %c0_95 = arith.constant 0 : index
    %201 = vector.load %arg16[%c0_94, %c0_95] : memref<8x128xf32, #tpu.memory_space<vmem>>, vector<8x128xf32>
    tpu.vector_store %arg16[%c0_94, %c0_95], %200 {strides = array<i32>} : memref<8x128xf32, #tpu.memory_space<vmem>>, vector<8x128xf32>,
    return
  }
  func.func @transform_0(%arg0: i32) -> (i32, i32, i32) {
    %c0_i32 = arith.constant 0 : i32
    %c0_i32_0 = arith.constant 0 : i32
    %c0_i32_1 = arith.constant 0 : i32
    return %c0_i32, %arg0, %c0_i32_0 : i32, i32, i32
  }
  func.func @transform_1(%arg0: i32) -> (i32, i32) {
    %c0_i32 = arith.constant 0 : i32
    %c0_i32_0 = arith.constant 0 : i32
    %c0_i32_1 = arith.constant 0 : i32
    return %c0_i32, %c0_i32_0 : i32, i32
  }
  func.func @transform_2(%arg0: i32) -> (i32, i32, i32) {
    %c0_i32 = arith.constant 0 : i32
    %c0_i32_0 = arith.constant 0 : i32
    %c0_i32_1 = arith.constant 0 : i32
    %c0_i32_2 = arith.constant 0 : i32
    return %c0_i32, %c0_i32_0, %c0_i32_1 : i32, i32, i32
  }
  func.func @transform_3(%arg0: i32) -> (i32, i32, i32) {
    %c0_i32 = arith.constant 0 : i32
    %c0_i32_0 = arith.constant 0 : i32
    %c0_i32_1 = arith.constant 0 : i32
    %c0_i32_2 = arith.constant 0 : i32
    return %c0_i32, %c0_i32_0, %c0_i32_1 : i32, i32, i32
  }
  func.func @transform_4(%arg0: i32) -> (i32, i32, i32) {
    %c0_i32 = arith.constant 0 : i32
    %c0_i32_0 = arith.constant 0 : i32
    %c0_i32_1 = arith.constant 0 : i32
    %c0_i32_2 = arith.constant 0 : i32
    return %c0_i32, %c0_i32_0, %c0_i32_1 : i32, i32, i32
  }
  func.func @transform_5(%arg0: i32) -> (i32, i32, i32) {
    %c0_i32 = arith.constant 0 : i32
    %c0_i32_0 = arith.constant 0 : i32
    %c0_i32_1 = arith.constant 0 : i32
    %c0_i32_2 = arith.constant 0 : i32
    return %c0_i32, %c0_i32_0, %c0_i32_1 : i32, i32, i32
  }
  func.func @transform_6(%arg0: i32) -> (i32, i32, i32) {
    %c0_i32 = arith.constant 0 : i32
    %c0_i32_0 = arith.constant 0 : i32
    %c0_i32_1 = arith.constant 0 : i32
    %c0_i32_2 = arith.constant 0 : i32
    return %c0_i32, %c0_i32_0, %c0_i32_1 : i32, i32, i32
  }
  func.func @transform_7(%arg0: i32) -> (i32, i32, i32) {
    %c0_i32 = arith.constant 0 : i32
    %c0_i32_0 = arith.constant 0 : i32
    %c0_i32_1 = arith.constant 0 : i32
    %c0_i32_2 = arith.constant 0 : i32
    return %c0_i32, %c0_i32_0, %c0_i32_1 : i32, i32, i32
  }
  func.func @transform_8(%arg0: i32) -> (i32, i32, i32) {
    %c0_i32 = arith.constant 0 : i32
    %c0_i32_0 = arith.constant 0 : i32
    %c0_i32_1 = arith.constant 0 : i32
    %c0_i32_2 = arith.constant 0 : i32
    return %c0_i32, %c0_i32_0, %c0_i32_1 : i32, i32, i32
  }
  func.func @transform_9(%arg0: i32) -> (i32, i32, i32) {
    %c0_i32 = arith.constant 0 : i32
    %c0_i32_0 = arith.constant 0 : i32
    %c0_i32_1 = arith.constant 0 : i32
    %c0_i32_2 = arith.constant 0 : i32
    return %c0_i32, %c0_i32_0, %c0_i32_1 : i32, i32, i32
  }
  func.func @transform_10(%arg0: i32) -> (i32, i32) {
    %c0_i32 = arith.constant 0 : i32
    %c0_i32_0 = arith.constant 0 : i32
    %c0_i32_1 = arith.constant 0 : i32
    return %c0_i32, %c0_i32_0 : i32, i32
  }
  func.func @transform_11(%arg0: i32) -> (i32, i32) {
    %c0_i32 = arith.constant 0 : i32
    %c0_i32_0 = arith.constant 0 : i32
    %c0_i32_1 = arith.constant 0 : i32
    return %c0_i32, %c0_i32_0 : i32, i32
  }
  func.func @transform_12(%arg0: i32) -> (i32, i32) {
    %c0_i32 = arith.constant 0 : i32
    %c0_i32_0 = arith.constant 0 : i32
    %c0_i32_1 = arith.constant 0 : i32
    return %c0_i32, %c0_i32_0 : i32, i32
  }
  func.func @transform_13(%arg0: i32) -> (i32, i32) {
    %c0_i32 = arith.constant 0 : i32
    %c0_i32_0 = arith.constant 0 : i32
    %c0_i32_1 = arith.constant 0 : i32
    return %c0_i32, %c0_i32_0 : i32, i32
  }
  func.func @transform_14(%arg0: i32) -> (i32, i32) {
    %c0_i32 = arith.constant 0 : i32
    %c0_i32_0 = arith.constant 0 : i32
    %c0_i32_1 = arith.constant 0 : i32
    return %c0_i32, %c0_i32_0 : i32, i32
  }
  func.func @transform_15(%arg0: i32) -> (i32, i32) {
    %c0_i32 = arith.constant 0 : i32
    %c0_i32_0 = arith.constant 0 : i32
    return %arg0, %c0_i32 : i32, i32
  }
}

</mosaic_0001>

<bundles_post_ra>
// kernel: _lambda_.1
= control target key start
LH: loop header
LB: loop body
LE: loop exit
PB: predicated region body
PF: predicated region fallthrough
CT: control target
= control target key end

     0   :  { %vm229_vm0 = vcmask 97280   ;;  %vm266_vm1 = vcmask 1045504   ;;  %s7262_s1 = inlined_call_operand.vmem [shape: bf16[140,256], index: 1, kind: input, shape index: {}]   ;;  %s7263_s0 = inlined_call_operand.vmem [shape: f32[24,8,140], index: 0, kind: input, shape index: {}]   ;;  %s7264_s2 = inlined_call_operand.vmem [shape: f32[1,1,256], index: 2, kind: input, shape index: {}]   ;;  %s7265_s5 = inlined_call_operand.vmem [shape: bf16[5,128,256], index: 5, kind: input, shape index: {}]   ;;  %s7266_s3 = inlined_call_operand.vmem [shape: f32[24,1,256], index: 3, kind: input, shape index: {}]   ;;  %s7267_s4 = inlined_call_operand.vmem [shape: f32[24,1,256], index: 4, kind: input, shape index: {}]   ;;  %s7268_s6 = inlined_call_operand.vmem [shape: f32[1,1,256], index: 6, kind: input, shape index: {}]   ;;  %s7269_s9 = inlined_call_operand.vmem [shape: bf16[4,128,128], index: 9, kind: input, shape index: {}]   ;;  %s7270_s7 = inlined_call_operand.vmem [shape: f32[8,1,256], index: 7, kind: input, shape index: {}]   ;;  %s7271_s8 = inlined_call_operand.vmem [shape: f32[8,1,256], index: 8, kind: input, shape index: {}]   ;;  %s7272_s11 = inlined_call_operand.vmem [shape: bf16[128,128], index: 11, kind: input, shape index: {}]   ;;  %s7273_s13 = inlined_call_operand.vmem [shape: bf16[128,128], index: 13, kind: input, shape index: {}]   ;;  %s7274_s10 = inlined_call_operand.vmem [shape: f32[1,128], index: 10, kind: input, shape index: {}]   ;;  %s7275_s12 = inlined_call_operand.vmem [shape: f32[1,128], index: 12, kind: input, shape index: {}]   ;;  %s7276_s14 = inlined_call_operand.vmem [shape: f32[1,128], index: 14, kind: input, shape index: {}]   ;;  %s7277_s15 = inlined_call_operand.vmem [shape: f32[8,128], index: 15, kind: output, shape index: {}]  }
   0x1   :  { %v4150_v0 = vld [vmem:[%s7262_s1 + $0x74] ss:$8 sps:$4 sm:$0xff]   ;;  %v4152_v1 = vld [vmem:[%s7262_s1 + $0x70] ss:$8 sps:$4 sm:$0xff]   ;;  %v4153_v2 = vld [vmem:[%s7262_s1 + $0x64] ss:$8 sps:$4 sm:$0xff]  }
   0x2   :  { %273 = vmatprep.subr.bf16.mxu0 %v4150_v0  ;;  %v4155_v3 = vld [vmem:[%s7262_s1 + $0x60] ss:$8 sps:$4 sm:$0xff]   ;;  %v4156_v4 = vld [vmem:[%s7262_s1 + $0x54] ss:$8 sps:$4 sm:$0xff]   ;;  %v4158_v5 = vld [vmem:[%s7262_s1 + $0x50] ss:$8 sps:$4 sm:$0xff]  }
   0x3   :  { %274 = vmatpush1.bf16.msra.mxu0 %v4152_v1  ;;  %v4159_v6 = vld [vmem:[%s7262_s1 + $0x44] ss:$8 sps:$4 sm:$0xff]   ;;  %v4161_v7 = vld [vmem:[%s7262_s1 + $0x40] ss:$8 sps:$4 sm:$0xff]   ;;  %v4162_v9 = vld [vmem:[%s7262_s1 + $0x34] ss:$8 sps:$4 sm:$0xff]  }
   0x4   :  { %275 = vmatprep.subr.bf16.mxu0 %v4153_v2  ;;  %v52_v8 = vld [vmem:[%s7263_s0 + $0x8] sm:$0xff]  ;;  %v54_v10 = vld [vmem:[%s7263_s0 + $0x18] sm:$0xff]  ;;  %v51_v21 = vld [vmem:[%s7263_s0] sm:$0xff] }
   0x5   :  { %v100_v11 = vpack.c.bf16 %v54_v10, %v52_v8  ;;  %v4164_v12 = vld [vmem:[%s7262_s1 + $0x30] ss:$8 sps:$4 sm:$0xff]   ;;  %v4165_v13 = vld [vmem:[%s7262_s1 + $0x24] ss:$8 sps:$4 sm:$0xff]   ;;  %v4167_v14 = vld [vmem:[%s7262_s1 + $0x20] ss:$8 sps:$4 sm:$0xff]  }
   0x6   :  { %v4168_v15 = vld [vmem:[%s7262_s1 + $0x14] ss:$8 sps:$4 sm:$0xff]   ;;  %v4170_v16 = vld [vmem:[%s7262_s1 + $0x10] ss:$8 sps:$4 sm:$0xff]   ;;  %v4171_v17 = vld [vmem:[%s7262_s1 + $0x4] ss:$8 sps:$4 sm:$0xff]  }
   0x7   :  { %276 = vmatpush1.bf16.msra.mxu0 %v4155_v3  ;;  %3718 = vmatprep.mubr.msk.bf16.mxu0 %vm229_vm0, %v100_v11  ;;  %v4173_v18 = vld [vmem:[%s7262_s1] ss:$8 sps:$4 sm:$0xff]   ;;  %v4174_v19 = vld [vmem:[%s7262_s1 + $0x84] ss:$8 sps:$4 sm:$0x3f]   ;;  %v53_v22 = vld [vmem:[%s7263_s0 + $0x10] sm:$0xff] }
   0x8   :  { %277 = vmatprep.subr.bf16.mxu0 %v4156_v4  ;;  %v4176_v20 = vld [vmem:[%s7262_s1 + $0x80] ss:$8 sps:$4 sm:$0x3f]   ;;  %v58_v25 = vld [vmem:[%s7263_s0 + $0x38] sm:$0xff]  ;;  %v99_v26 = vpack.c.bf16 %v53_v22, %v51_v21  ;;  %v57_v29 = vld [vmem:[%s7263_s0 + $0x30] sm:$0xff] }
   0x9   :  { %v268_v23 = vsel %vm266_vm1, %v4176_v20, 0  ;;  %v56_v24 = vld [vmem:[%s7263_s0 + $0x28] sm:$0xff]  ;;  %v55_v28 = vld [vmem:[%s7263_s0 + $0x20] sm:$0xff]  ;;  %v62_v31 = vld [vmem:[%s7263_s0 + $0x58] sm:$0xff] }
   0xa   :  { %v102_v27 = vpack.c.bf16 %v58_v25, %v56_v24  ;;  %v60_v30 = vld [vmem:[%s7263_s0 + $0x48] sm:$0xff]  ;;  %v101_v32 = vpack.c.bf16 %v57_v29, %v55_v28  ;;  %v59_v34 = vld [vmem:[%s7263_s0 + $0x40] sm:$0xff]  ;;  %v61_v35 = vld [vmem:[%s7263_s0 + $0x50] sm:$0xff] }
   0xb   :  { %278 = vmatpush1.bf16.msra.mxu0 %v4158_v5  ;;  %v104_v33 = vpack.c.bf16 %v62_v31, %v60_v30  ;;  %v64_v36 = vld [vmem:[%s7263_s0 + $0x68] sm:$0xff]  ;;  %v66_v37 = vld [vmem:[%s7263_s0 + $0x78] sm:$0xff]  ;;  %v103_v38 = vpack.c.bf16 %v61_v35, %v59_v34  ;;  %v63_v40 = vld [vmem:[%s7263_s0 + $0x60] sm:$0xff] }
   0xc   :  { %279 = vmatprep.subr.bf16.mxu0 %v4159_v6  ;;  %v106_v39 = vpack.c.bf16 %v66_v37, %v64_v36  ;;  %v65_v41 = vld [vmem:[%s7263_s0 + $0x70] sm:$0xff]  ;;  %v68_v42 = vld [vmem:[%s7263_s0 + $0x88] sm:$0xff]  ;;  %v70_v43 = vld [vmem:[%s7263_s0 + $0x98] sm:$0xff] }
   0xd   :  { %v105_v44 = vpack.c.bf16 %v65_v41, %v63_v40  ;;  %v108_v45 = vpack.c.bf16 %v70_v43, %v68_v42  ;;  %v67_v46 = vld [vmem:[%s7263_s0 + $0x80] sm:$0xff]  ;;  %v69_v47 = vld [vmem:[%s7263_s0 + $0x90] sm:$0xff]  ;;  %v72_v48 = vld [vmem:[%s7263_s0 + $0xa8] sm:$0xff] }
   0xe   :  { %v74_v49 = vld [vmem:[%s7263_s0 + $0xb8] sm:$0xff]  ;;  %v107_v50 = vpack.c.bf16 %v69_v47, %v67_v46  ;;  %v71_v52 = vld [vmem:[%s7263_s0 + $0xa0] sm:$0xff]  ;;  %v73_v53 = vld [vmem:[%s7263_s0 + $0xb0] sm:$0xff] }
   0xf   :  { %280 = vmatpush1.bf16.msra.mxu0 %v4161_v7  ;;  %v110_v51 = vpack.c.bf16 %v74_v49, %v72_v48  ;;  %v76_v54 = vld [vmem:[%s7263_s0 + $0xc8] sm:$0xff]  ;;  %v78_v55 = vld [vmem:[%s7263_s0 + $0xd8] sm:$0xff]  ;;  %v109_v56 = vpack.c.bf16 %v73_v53, %v71_v52  ;;  %v75_v58 = vld [vmem:[%s7263_s0 + $0xc0] sm:$0xff] }
  0x10   :  { %281 = vmatprep.subr.bf16.mxu0 %v4162_v9  ;;  %v112_v57 = vpack.c.bf16 %v78_v55, %v76_v54  ;;  %v77_v59 = vld [vmem:[%s7263_s0 + $0xd0] sm:$0xff]  ;;  %v80_v60 = vld [vmem:[%s7263_s0 + $0xe8] sm:$0xff]  ;;  %v82_v61 = vld [vmem:[%s7263_s0 + $0xf8] sm:$0xff] }
  0x11   :  { %v111_v62 = vpack.c.bf16 %v77_v59, %v75_v58  ;;  %v114_v63 = vpack.c.bf16 %v82_v61, %v80_v60  ;;  %v79_v0 = vld [vmem:[%s7263_s0 + $0xe0] sm:$0xff]  ;;  %v81_v1 = vld [vmem:[%s7263_s0 + $0xf0] sm:$0xff]  ;;  %v84_v2 = vld [vmem:[%s7263_s0 + $0x108] sm:$0xff] }
  0x12   :  { %v86_v3 = vld [vmem:[%s7263_s0 + $0x118] sm:$0xff]  ;;  %v113_v4 = vpack.c.bf16 %v81_v1, %v79_v0  ;;  %v83_v6 = vld [vmem:[%s7263_s0 + $0x100] sm:$0xff]  ;;  %v85_v7 = vld [vmem:[%s7263_s0 + $0x110] sm:$0xff] }
  0x13   :  { %282 = vmatpush1.bf16.msra.mxu0 %v4164_v12  ;;  %v116_v5 = vpack.c.bf16 %v86_v3, %v84_v2  ;;  %v88_v8 = vld [vmem:[%s7263_s0 + $0x128] sm:$0xff]  ;;  %v90_v9 = vld [vmem:[%s7263_s0 + $0x138] sm:$0xff]  ;;  %v115_v10 = vpack.c.bf16 %v85_v7, %v83_v6  ;;  %v87_v12 = vld [vmem:[%s7263_s0 + $0x120] sm:$0xff] }
  0x14   :  { %283 = vmatprep.subr.bf16.mxu0 %v4165_v13  ;;  %v118_v11 = vpack.c.bf16 %v90_v9, %v88_v8  ;;  %v89_v13 = vld [vmem:[%s7263_s0 + $0x130] sm:$0xff]  ;;  %v96_v20 = vld [vmem:[%s7263_s0 + $0x168] sm:$0xff]  ;;  %v98_v21 = vld [vmem:[%s7263_s0 + $0x178] sm:$0xff] }
  0x15   :  { %v95_v24 = vld [vmem:[%s7263_s0 + $0x160] sm:$0xff]  ;;  %v97_v25 = vld [vmem:[%s7263_s0 + $0x170] sm:$0xff] }
  0x16   :  { %v426_v31 = vld [vmem:[%s7264_s2] sm:$0x3] }
  0x17   :  { %284 = vmatpush1.bf16.msra.mxu0 %v4167_v14  ;;  %v92_v14 = vld [vmem:[%s7263_s0 + $0x148] sm:$0xff] }
  0x18   :  { %285 = vmatprep.subr.bf16.mxu0 %v4168_v15  ;;  %v94_v15 = vld [vmem:[%s7263_s0 + $0x158] sm:$0xff] }
  0x1b   :  { %286 = vmatpush1.bf16.msra.mxu0 %v4170_v16  ;;  %v117_v16 = vpack.c.bf16 %v89_v13, %v87_v12 }
  0x1c   :  { %287 = vmatprep.subr.bf16.mxu0 %v4171_v17  ;;  %v120_v17 = vpack.c.bf16 %v94_v15, %v92_v14 }
  0x1f   :  { %288 = vmatpush1.bf16.msra.mxu0 %v4173_v18  ;;  %v91_v18 = vld [vmem:[%s7263_s0 + $0x140] sm:$0xff] }
  0x20   :  { %3717 = vmatprep.subr.msk.bf16.mxu0 %vm266_vm1, %v4174_v19  ;;  %v93_v19 = vld [vmem:[%s7263_s0 + $0x150] sm:$0xff] }
  0x21   :  { %v119_v22 = vpack.c.bf16 %v93_v19, %v91_v18 }
  0x23   :  { %304 = vmatpush2.bf16.msra.mxu0 %v268_v23  ;;  %v122_v23 = vpack.c.bf16 %v98_v21, %v96_v20 }
  0x26   :  { %306 = vmatmul.mubr.bf16.vlgmr.msra.gmra.mxu0 %v99_v26  ;;  %v121_v26 = vpack.c.bf16 %v97_v25, %v95_v24 }
  0x27   :  { %3719 = vmatprep.mubr.msk.bf16.mxu0 %vm229_vm0, %v102_v27  ;;  %v428_v27 = vlaneseq }
  0x29   :  { %v429_v28 = vshrl.u32 %v428_v27, 7 }
  0x2b   :  { %v4646_v29 = vsub.s32 0, %v429_v28  ;;  %v4648_v30 = vsub.s32 1, %v429_v28 }
  0x2d   :  { %7405 = vst [vmem:[#allocation2_spill] sm:$0xff] %v4646_v29  ;;  %7406 = vst [vmem:[#allocation3_spill] sm:$0xff] %v4648_v30 }
  0x2e   :  { %316 = vmatmul.mubr.bf16.gmra.mxu0 %v101_v32  ;;  %v4654_v32 = vrot.slane %v426_v31, %v4646_v29 }
  0x2f   :  { %3720 = vmatprep.mubr.msk.bf16.mxu0 %vm229_vm0, %v104_v33  ;;  %v4657_v33 = vrot.slane %v426_v31, %v4648_v30 }
  0x36   :  { %326 = vmatmul.mubr.bf16.gmra.mxu0 %v103_v38 }
  0x37   :  { %3721 = vmatprep.mubr.msk.bf16.mxu0 %vm229_vm0, %v106_v39 }
  0x3e   :  { %336 = vmatmul.mubr.bf16.gmra.mxu0 %v105_v44 }
  0x3f   :  { %3722 = vmatprep.mubr.msk.bf16.mxu0 %vm229_vm0, %v108_v45 }
  0x46   :  { %346 = vmatmul.mubr.bf16.gmra.mxu0 %v107_v50 }
  0x47   :  { %3723 = vmatprep.mubr.msk.bf16.mxu0 %vm229_vm0, %v110_v51 }
  0x4e   :  { %356 = vmatmul.mubr.bf16.gmra.mxu0 %v109_v56 }
  0x4f   :  { %3724 = vmatprep.mubr.msk.bf16.mxu0 %vm229_vm0, %v112_v57 }
  0x56   :  { %366 = vmatmul.mubr.bf16.gmra.mxu0 %v111_v62 }
  0x57   :  { %3725 = vmatprep.mubr.msk.bf16.mxu0 %vm229_vm0, %v114_v63 }
  0x5e   :  { %376 = vmatmul.mubr.bf16.gmra.mxu0 %v113_v4 }
  0x5f   :  { %3726 = vmatprep.mubr.msk.bf16.mxu0 %vm229_vm0, %v116_v5 }
  0x66   :  { %386 = vmatmul.mubr.bf16.gmra.mxu0 %v115_v10 }
  0x67   :  { %3727 = vmatprep.mubr.msk.bf16.mxu0 %vm229_vm0, %v118_v11 }
  0x6e   :  { %396 = vmatmul.mubr.bf16.gmra.mxu0 %v117_v16 }
  0x6f   :  { %3728 = vmatprep.mubr.msk.bf16.mxu0 %vm229_vm0, %v120_v17 }
  0x76   :  { %406 = vmatmul.mubr.bf16.gmra.mxu0 %v119_v22 }
  0x77   :  { %3729 = vmatprep.mubr.msk.bf16.mxu0 %vm229_vm0, %v122_v23 }
  0x7e   :  { %416 = vmatmul.mubr.bf16.gmra.mxu0 %v121_v26 }
  0xe6   :  { %v307_v34 = vpop.f32.mrf.mxu0 }
  0xe7   :  { %v4660_v36 = vadd.f32 %v4654_v32, %v307_v34 }
  0xe8   :  { %v309_v35 = vpop.f32.mrf.mxu0 }
  0xe9   :  { %v4663_v37 = vadd.f32 %v4657_v33, %v309_v35 }
  0xea   :  { %v311_v38 = vpop.f32.mrf.mxu0 }
  0xeb   :  { %v486_v39 = vadd.f32 %v4663_v37, %v4660_v36  ;;  %v4668_v41 = vadd.f32 %v4654_v32, %v311_v38 }
  0xec   :  { %v313_v40 = vpop.f32.mrf.mxu0 }
  0xed   :  { %v4671_v42 = vadd.f32 %v4657_v33, %v313_v40  ;;  %487 = vadd.xlane.f32.xlu0 %v486_v39 }
  0xee   :  { %v317_v43 = vpop.f32.mrf.mxu0 }
  0xef   :  { %v489_v44 = vadd.f32 %v4671_v42, %v4668_v41  ;;  %v4676_v46 = vadd.f32 %v4654_v32, %v317_v43 }
  0xf0   :  { %v319_v45 = vpop.f32.mrf.mxu0 }
  0xf1   :  { %v4679_v47 = vadd.f32 %v4657_v33, %v319_v45  ;;  %490 = vadd.xlane.f32.xlu0 %v489_v44 }
  0xf2   :  { %v321_v48 = vpop.f32.mrf.mxu0 }
  0xf3   :  { %v492_v49 = vadd.f32 %v4679_v47, %v4676_v46  ;;  %v4684_v51 = vadd.f32 %v4654_v32, %v321_v48 }
  0xf4   :  { %v323_v50 = vpop.f32.mrf.mxu0 }
  0xf5   :  { %v4687_v52 = vadd.f32 %v4657_v33, %v323_v50  ;;  %493 = vadd.xlane.f32.xlu1 %v492_v49 }
  0xf6   :  { %v327_v53 = vpop.f32.mrf.mxu0 }
  0xf7   :  { %v495_v54 = vadd.f32 %v4687_v52, %v4684_v51  ;;  %v4692_v56 = vadd.f32 %v4654_v32, %v327_v53 }
  0xf8   :  { %v329_v55 = vpop.f32.mrf.mxu0 }
  0xf9   :  { %v4695_v57 = vadd.f32 %v4657_v33, %v329_v55  ;;  %496 = vadd.xlane.f32.xlu1 %v495_v54 }
  0xfa   :  { %v331_v58 = vpop.f32.mrf.mxu0 }
  0xfb   :  { %v498_v59 = vadd.f32 %v4695_v57, %v4692_v56  ;;  %v4700_v61 = vadd.f32 %v4654_v32, %v331_v58 }
  0xfc   :  { %v333_v60 = vpop.f32.mrf.mxu0 }
  0xfd   :  { %v4703_v62 = vadd.f32 %v4657_v33, %v333_v60  ;;  %499 = vadd.xlane.f32.xlu0 %v498_v59 }
  0xfe   :  { %v337_v63 = vpop.f32.mrf.mxu0 }
  0xff   :  { %v501_v0 = vadd.f32 %v4703_v62, %v4700_v61  ;;  %v4708_v2 = vadd.f32 %v4654_v32, %v337_v63 }
 0x100   :  { %v339_v1 = vpop.f32.mrf.mxu0 }
 0x101   :  { %v4711_v3 = vadd.f32 %v4657_v33, %v339_v1  ;;  %502 = vadd.xlane.f32.xlu1 %v501_v0 }
 0x102   :  { %v341_v4 = vpop.f32.mrf.mxu0 }
 0x103   :  { %v504_v5 = vadd.f32 %v4711_v3, %v4708_v2  ;;  %v4716_v7 = vadd.f32 %v4654_v32, %v341_v4 }
 0x104   :  { %v343_v6 = vpop.f32.mrf.mxu0 }
 0x105   :  { %v4719_v8 = vadd.f32 %v4657_v33, %v343_v6  ;;  %505 = vadd.xlane.f32.xlu0 %v504_v5 }
 0x106   :  { %v347_v9 = vpop.f32.mrf.mxu0 }
 0x107   :  { %v507_v10 = vadd.f32 %v4719_v8, %v4716_v7  ;;  %v4724_v12 = vadd.f32 %v4654_v32, %v347_v9 }
 0x108   :  { %v349_v11 = vpop.f32.mrf.mxu0 }
 0x109   :  { %v4727_v13 = vadd.f32 %v4657_v33, %v349_v11  ;;  %508 = vadd.xlane.f32.xlu1 %v507_v10 }
 0x10a   :  { %v351_v14 = vpop.f32.mrf.mxu0 }
 0x10b   :  { %v510_v15 = vadd.f32 %v4727_v13, %v4724_v12  ;;  %v4732_v17 = vadd.f32 %v4654_v32, %v351_v14 }
 0x10c   :  { %v353_v16 = vpop.f32.mrf.mxu0 }
 0x10d   :  { %v4735_v18 = vadd.f32 %v4657_v33, %v353_v16  ;;  %511 = vadd.xlane.f32.xlu0 %v510_v15 }
 0x10e   :  { %v357_v19 = vpop.f32.mrf.mxu0 }
 0x10f   :  { %v513_v20 = vadd.f32 %v4735_v18, %v4732_v17  ;;  %v4740_v22 = vadd.f32 %v4654_v32, %v357_v19 }
 0x110   :  { %v359_v21 = vpop.f32.mrf.mxu0 }
 0x111   :  { %v4743_v23 = vadd.f32 %v4657_v33, %v359_v21  ;;  %514 = vadd.xlane.f32.xlu1 %v513_v20 }
 0x112   :  { %v361_v24 = vpop.f32.mrf.mxu0 }
 0x113   :  { %v516_v25 = vadd.f32 %v4743_v23, %v4740_v22  ;;  %v4748_v27 = vadd.f32 %v4654_v32, %v361_v24 }
 0x114   :  { %v363_v26 = vpop.f32.mrf.mxu0 }
 0x115   :  { %v4751_v28 = vadd.f32 %v4657_v33, %v363_v26  ;;  %517 = vadd.xlane.f32.xlu0 %v516_v25 }
 0x116   :  { %v367_v31 = vpop.f32.mrf.mxu0 }
 0x117   :  { %v519_v34 = vadd.f32 %v4751_v28, %v4748_v27  ;;  %v4756_v38 = vadd.f32 %v4654_v32, %v367_v31 }
 0x118   :  { %v369_v35 = vpop.f32.mrf.mxu0 }
 0x119   :  { %v4759_v39 = vadd.f32 %v4657_v33, %v369_v35  ;;  %520 = vadd.xlane.f32.xlu1 %v519_v34 }
 0x11a   :  { %v371_v40 = vpop.f32.mrf.mxu0 }
 0x11b   :  { %v522_v43 = vadd.f32 %v4759_v39, %v4756_v38  ;;  %v4764_v45 = vadd.f32 %v4654_v32, %v371_v40 }
 0x11c   :  { %v373_v44 = vpop.f32.mrf.mxu0 }
 0x11d   :  { %v4767_v48 = vadd.f32 %v4657_v33, %v373_v44  ;;  %523 = vadd.xlane.f32.xlu0 %v522_v43 }
 0x11e   :  { %v377_v49 = vpop.f32.mrf.mxu0 }
 0x11f   :  { %v525_v50 = vadd.f32 %v4767_v48, %v4764_v45  ;;  %v4772_v54 = vadd.f32 %v4654_v32, %v377_v49 }
 0x120   :  { %v379_v53 = vpop.f32.mrf.mxu0 }
 0x121   :  { %v4775_v55 = vadd.f32 %v4657_v33, %v379_v53  ;;  %526 = vadd.xlane.f32.xlu1 %v525_v50 }
 0x122   :  { %v381_v58 = vpop.f32.mrf.mxu0 }
 0x123   :  { %v528_v59 = vadd.f32 %v4775_v55, %v4772_v54  ;;  %v4780_v63 = vadd.f32 %v4654_v32, %v381_v58 }
 0x124   :  { %v383_v60 = vpop.f32.mrf.mxu0 }
 0x125   :  { %v4783_v0 = vadd.f32 %v4657_v33, %v383_v60  ;;  %529 = vadd.xlane.f32.xlu0 %v528_v59 }
 0x126   :  { %v387_v1 = vpop.f32.mrf.mxu0 }
 0x127   :  { %v531_v4 = vadd.f32 %v4783_v0, %v4780_v63  ;;  %v4788_v6 = vadd.f32 %v4654_v32, %v387_v1 }
 0x128   :  { %v389_v5 = vpop.f32.mrf.mxu0 }
 0x129   :  { %v4791_v9 = vadd.f32 %v4657_v33, %v389_v5  ;;  %532 = vadd.xlane.f32.xlu1 %v531_v4 }
 0x12a   :  { %v391_v10 = vpop.f32.mrf.mxu0 }
 0x12b   :  { %v534_v11 = vadd.f32 %v4791_v9, %v4788_v6  ;;  %v4796_v15 = vadd.f32 %v4654_v32, %v391_v10 }
 0x12c   :  { %v393_v14 = vpop.f32.mrf.mxu0 }
 0x12d   :  { %v4799_v16 = vadd.f32 %v4657_v33, %v393_v14  ;;  %535 = vadd.xlane.f32.xlu0 %v534_v11 }
 0x12e   :  { %v397_v19 = vpop.f32.mrf.mxu0 }
 0x12f   :  { %v537_v20 = vadd.f32 %v4799_v16, %v4796_v15  ;;  %v4804_v24 = vadd.f32 %v4654_v32, %v397_v19 }
 0x130   :  { %v399_v21 = vpop.f32.mrf.mxu0 }
 0x131   :  { %v4807_v25 = vadd.f32 %v4657_v33, %v399_v21  ;;  %538 = vadd.xlane.f32.xlu1 %v537_v20 }
 0x132   :  { %v401_v26 = vpop.f32.mrf.mxu0 }
 0x133   :  { %v540_v31 = vadd.f32 %v4807_v25, %v4804_v24  ;;  %v4812_v35 = vadd.f32 %v4654_v32, %v401_v26 }
 0x134   :  { %v403_v34 = vpop.f32.mrf.mxu0 }
 0x135   :  { %v4815_v40 = vadd.f32 %v4657_v33, %v403_v34  ;;  %541 = vadd.xlane.f32.xlu0 %v540_v31 }
 0x136   :  { %v407_v43 = vpop.f32.mrf.mxu0 }
 0x137   :  { %v543_v44 = vadd.f32 %v4815_v40, %v4812_v35  ;;  %v4820_v50 = vadd.f32 %v4654_v32, %v407_v43 }
 0x138   :  { %v409_v49 = vpop.f32.mrf.mxu0 }
 0x139   :  { %v4823_v53 = vadd.f32 %v4657_v33, %v409_v49  ;;  %544 = vadd.xlane.f32.xlu1 %v543_v44 }
 0x13a   :  { %v411_v58 = vpop.f32.mrf.mxu0 }
 0x13b   :  { %7407 = vst [vmem:[#allocation4_spill] sm:$0xff] %v4823_v53  ;;  %v546_v59 = vadd.f32 %v4823_v53, %v4820_v50  ;;  %v4828_v1 = vadd.f32 %v4654_v32, %v411_v58 }
 0x13c   :  { %v413_v60 = vpop.f32.mrf.mxu0 }
 0x13d   :  { %7408 = vst [vmem:[#allocation5_spill] sm:$0xff] %v4828_v1  ;;  %v4831_v4 = vadd.f32 %v4657_v33, %v413_v60  ;;  %547 = vadd.xlane.f32.xlu0 %v546_v59 }
 0x13e   :  { %v417_v5 = vpop.f32.mrf.mxu0 }
 0x13f   :  { %7409 = vst [vmem:[#allocation6_spill] sm:$0xff] %v4831_v4  ;;  %v549_v10 = vadd.f32 %v4831_v4, %v4828_v1  ;;  %v4836_v14 = vadd.f32 %v4654_v32, %v417_v5 }
 0x140   :  { %v419_v11 = vpop.f32.mrf.mxu0 }
 0x141   :  { %7410 = vst [vmem:[#allocation7_spill] sm:$0xff] %v4836_v14  ;;  %v4839_v19 = vadd.f32 %v4657_v33, %v419_v11  ;;  %550 = vadd.xlane.f32.xlu1 %v549_v10 }
 0x142   :  { %v421_v20 = vpop.f32.mrf.mxu0 }
 0x143   :  { %7411 = vst [vmem:[#allocation8_spill] sm:$0xff] %v4839_v19  ;;  %v552_v21 = vadd.f32 %v4839_v19, %v4836_v14  ;;  %v4844_v31 = vadd.f32 %v4654_v32, %v421_v20 }
 0x144   :  { %v423_v26 = vpop.f32.mrf.mxu0 }
 0x145   :  { %7412 = vst [vmem:[#allocation9_spill] sm:$0xff] %v4844_v31  ;;  %v4847_v34 = vadd.f32 %v4657_v33, %v423_v26  ;;  %553 = vadd.xlane.f32.xlu0 %v552_v21 }
 0x147   :  { %7413 = vst [vmem:[#allocation10_spill] sm:$0xff] %v4847_v34  ;;  %v555_v43 = vadd.f32 %v4847_v34, %v4844_v31 }
 0x149   :  { %556 = vadd.xlane.f32.xlu1 %v555_v43 }
 0x176   :  { %v488_v44 = vpop.xlane.xlu0 %487 }
 0x17a   :  { %v491_v58 = vpop.xlane.xlu0 %490 }
 0x17b   :  { %v558_v59 = vadd.f32 %v491_v58, %v488_v44 }
 0x17e   :  { %v494_v49 = vpop.xlane.xlu1 %493 }
 0x17f   :  { %v559_v5 = vadd.f32 %v558_v59, %v494_v49 }
 0x182   :  { %v497_v60 = vpop.xlane.xlu1 %496 }
 0x183   :  { %v560_v11 = vadd.f32 %v559_v5, %v497_v60 }
 0x186   :  { %v500_v10 = vpop.xlane.xlu0 %499 }
 0x187   :  { %v561_v29 = vadd.f32 %v560_v11, %v500_v10 }
 0x18a   :  { %v503_v30 = vpop.xlane.xlu1 %502 }
 0x18b   :  { %v562_v20 = vadd.f32 %v561_v29, %v503_v30 }
 0x18e   :  { %v506_v32 = vpop.xlane.xlu0 %505 }
 0x18f   :  { %v563_v33 = vadd.f32 %v562_v20, %v506_v32 }
 0x192   :  { %v509_v19 = vpop.xlane.xlu1 %508 }
 0x193   :  { %v564_v21 = vadd.f32 %v563_v33, %v509_v19 }
 0x196   :  { %v512_v26 = vpop.xlane.xlu0 %511 }
 0x197   :  { %v565_v4 = vadd.f32 %v564_v21, %v512_v26 }
 0x19a   :  { %v515_v14 = vpop.xlane.xlu1 %514 }
 0x19b   :  { %v566_v43 = vadd.f32 %v565_v4, %v515_v14 }
 0x19e   :  { %v518_v34 = vpop.xlane.xlu0 %517 }
 0x19f   :  { %v567_v1 = vadd.f32 %v566_v43, %v518_v34 }
 0x1a2   :  { %v521_v31 = vpop.xlane.xlu1 %520 }
 0x1a3   :  { %v568_v44 = vadd.f32 %v567_v1, %v521_v31 }
 0x1a6   :  { %v524_v53 = vpop.xlane.xlu0 %523 }
 0x1a7   :  { %v569_v49 = vadd.f32 %v568_v44, %v524_v53 }
 0x1aa   :  { %v527_v58 = vpop.xlane.xlu1 %526 }
 0x1ab   :  { %v570_v60 = vadd.f32 %v569_v49, %v527_v58 }
 0x1ae   :  { %v530_v59 = vpop.xlane.xlu0 %529 }
 0x1af   :  { %v571_v10 = vadd.f32 %v570_v60, %v530_v59 }
 0x1b2   :  { %v533_v5 = vpop.xlane.xlu1 %532 }
 0x1b3   :  { %v572_v29 = vadd.f32 %v571_v10, %v533_v5 }
 0x1b6   :  { %v536_v11 = vpop.xlane.xlu0 %535 }
 0x1b7   :  { %v573_v32 = vadd.f32 %v572_v29, %v536_v11 }
 0x1ba   :  { %v539_v30 = vpop.xlane.xlu1 %538 }
 0x1bb   :  { %v574_v19 = vadd.f32 %v573_v32, %v539_v30 }
 0x1be   :  { %v542_v20 = vpop.xlane.xlu0 %541 }
 0x1bf   :  { %v575_v26 = vadd.f32 %v574_v19, %v542_v20 }
 0x1c2   :  { %v545_v33 = vpop.xlane.xlu1 %544 }
 0x1c3   :  { %v576_v4 = vadd.f32 %v575_v26, %v545_v33 }
 0x1c6   :  { %v548_v21 = vpop.xlane.xlu0 %547 }
 0x1c7   :  { %v577_v34 = vadd.f32 %v576_v4, %v548_v21 }
 0x1ca   :  { %v551_v14 = vpop.xlane.xlu1 %550 }
 0x1cb   :  { %v578_v1 = vadd.f32 %v577_v34, %v551_v14 }
 0x1ce   :  { %v554_v43 = vpop.xlane.xlu0 %553 }
 0x1cf   :  { %v579_v53 = vadd.f32 %v578_v1, %v554_v43 }
 0x1d2   :  { %v557_v31 = vpop.xlane.xlu1 %556 }
 0x1d3   :  { %v580_v44 = vadd.f32 %v579_v53, %v557_v31 }
 0x1d5   :  { %v4851_v58 = vmul.f32 0.00028935185, %v580_v44 }
 0x1d7   :  { %v4855_v49 = vsub.f32 %v4660_v36, %v4851_v58  ;;  %v4859_v59 = vsub.f32 %v4663_v37, %v4851_v58  ;;  %v4863_v60 = vsub.f32 %v4668_v41, %v4851_v58  ;;  %v4867_v5 = vsub.f32 %v4671_v42, %v4851_v58 }
 0x1d8   :  { %v4871_v10 = vsub.f32 %v4684_v51, %v4851_v58  ;;  %v4875_v36 = vsub.f32 %v4687_v52, %v4851_v58  ;;  %v4879_v37 = vsub.f32 %v4676_v46, %v4851_v58  ;;  %v4883_v41 = vsub.f32 %v4679_v47, %v4851_v58 }
 0x1d9   :  { %v4887_v42 = vsub.f32 %v4692_v56, %v4851_v58  ;;  %v4891_v51 = vsub.f32 %v4695_v57, %v4851_v58  ;;  %v633_v52 = vmul.f32 %v4863_v60, %v4863_v60  ;;  %v634_v11 = vmul.f32 %v4867_v5, %v4867_v5 }
 0x1da   :  { %v631_v46 = vmul.f32 %v4855_v49, %v4855_v49  ;;  %v632_v47 = vmul.f32 %v4859_v59, %v4859_v59  ;;  %v4903_v56 = vsub.f32 %v4700_v61, %v4851_v58  ;;  %v4907_v57 = vsub.f32 %v4703_v62, %v4851_v58 }
 0x1db   :  { %v637_v29 = vmul.f32 %v4871_v10, %v4871_v10  ;;  %v638_v30 = vmul.f32 %v4875_v36, %v4875_v36  ;;  %v682_v32 = vadd.f32 %v634_v11, %v633_v52  ;;  %v635_v19 = vmul.f32 %v4879_v37, %v4879_v37 }
 0x1dc   :  { %v679_v20 = vadd.f32 %v632_v47, %v631_v46  ;;  %v636_v33 = vmul.f32 %v4883_v41, %v4883_v41  ;;  %v4919_v61 = vsub.f32 %v4708_v2, %v4851_v58  ;;  %v4923_v62 = vsub.f32 %v4711_v3, %v4851_v58 }
 0x1dd   :  { %683 = vadd.xlane.f32.xlu1 %v682_v32  ;;  %v4927_v26 = vsub.f32 %v4716_v7, %v4851_v58  ;;  %v4931_v21 = vsub.f32 %v4719_v8, %v4851_v58  ;;  %v641_v4 = vmul.f32 %v4903_v56, %v4903_v56  ;;  %v642_v2 = vmul.f32 %v4907_v57, %v4907_v57 }
 0x1de   :  { %680 = vadd.xlane.f32.xlu0 %v679_v20  ;;  %v688_v14 = vadd.f32 %v638_v30, %v637_v29  ;;  %v685_v34 = vadd.f32 %v636_v33, %v635_v19  ;;  %v639_v3 = vmul.f32 %v4887_v42, %v4887_v42  ;;  %v640_v43 = vmul.f32 %v4891_v51, %v4891_v51 }
 0x1df   :  { %v4943_v7 = vsub.f32 %v4724_v12, %v4851_v58  ;;  %v4947_v8 = vsub.f32 %v4727_v13, %v4851_v58  ;;  %v4951_v1 = vsub.f32 %v4732_v17, %v4851_v58  ;;  %v4955_v31 = vsub.f32 %v4735_v18, %v4851_v58 }
 0x1e0   :  { %v645_v53 = vmul.f32 %v4927_v26, %v4927_v26  ;;  %v646_v12 = vmul.f32 %v4931_v21, %v4931_v21  ;;  %v694_v44 = vadd.f32 %v642_v2, %v641_v4  ;;  %v691_v52 = vadd.f32 %v640_v43, %v639_v3 }
 0x1e1   :  { %689 = vadd.xlane.f32.xlu1 %v688_v14  ;;  %v643_v13 = vmul.f32 %v4919_v61, %v4919_v61  ;;  %v644_v11 = vmul.f32 %v4923_v62, %v4923_v62  ;;  %v4967_v17 = vsub.f32 %v4740_v22, %v4851_v58  ;;  %v4971_v18 = vsub.f32 %v4743_v23, %v4851_v58 }
 0x1e2   :  { %686 = vadd.xlane.f32.xlu0 %v685_v34  ;;  %v4975_v46 = vsub.f32 %v4748_v27, %v4851_v58  ;;  %v4979_v47 = vsub.f32 %v4751_v28, %v4851_v58  ;;  %v700_v29 = vadd.f32 %v646_v12, %v645_v53  ;;  %v649_v30 = vmul.f32 %v4951_v1, %v4951_v1 }
 0x1e3   :  { %v697_v22 = vadd.f32 %v644_v11, %v643_v13  ;;  %v650_v32 = vmul.f32 %v4955_v31, %v4955_v31  ;;  %v647_v23 = vmul.f32 %v4943_v7, %v4943_v7  ;;  %v648_v20 = vmul.f32 %v4947_v8, %v4947_v8 }
 0x1e4   :  { %v4991_v27 = vsub.f32 %v4756_v38, %v4851_v58  ;;  %v4995_v28 = vsub.f32 %v4759_v39, %v4851_v58  ;;  %v4999_v19 = vsub.f32 %v4764_v45, %v4851_v58  ;;  %v5003_v33 = vsub.f32 %v4767_v48, %v4851_v58 }
 0x1e5   :  { %695 = vadd.xlane.f32.xlu1 %v694_v44  ;;  %v653_v4 = vmul.f32 %v4975_v46, %v4975_v46  ;;  %v654_v38 = vmul.f32 %v4979_v47, %v4979_v47  ;;  %v706_v2 = vadd.f32 %v650_v32, %v649_v30  ;;  %v703_v14 = vadd.f32 %v648_v20, %v647_v23 }
 0x1e6   :  { %692 = vadd.xlane.f32.xlu0 %v691_v52  ;;  %v651_v39 = vmul.f32 %v4967_v17, %v4967_v17  ;;  %v652_v34 = vmul.f32 %v4971_v18, %v4971_v18  ;;  %v5015_v45 = vsub.f32 %v4772_v54, %v4851_v58  ;;  %v5019_v48 = vsub.f32 %v4775_v55, %v4851_v58 }
 0x1e7   :  { %v5023_v3 = vsub.f32 %v4780_v63, %v4851_v58  ;;  %v5027_v43 = vsub.f32 %v4783_v0, %v4851_v58  ;;  %v712_v53 = vadd.f32 %v654_v38, %v653_v4  ;;  %v657_v12 = vmul.f32 %v4999_v19, %v4999_v19 }
 0x1e8   :  { %v709_v54 = vadd.f32 %v652_v34, %v651_v39  ;;  %v658_v44 = vmul.f32 %v5003_v33, %v5003_v33  ;;  %v655_v55 = vmul.f32 %v4991_v27, %v4991_v27  ;;  %v656_v52 = vmul.f32 %v4995_v28, %v4995_v28  ;;  %v7417_v34 = vld [vmem:[#allocation5_spill] sm:$0xff] }
 0x1e9   :  { %701 = vadd.xlane.f32.xlu1 %v700_v29  ;;  %v5039_v63 = vsub.f32 %v4788_v6, %v4851_v58  ;;  %v5043_v0 = vsub.f32 %v4791_v9, %v4851_v58  ;;  %v5047_v13 = vsub.f32 %v4796_v15, %v4851_v58  ;;  %v5051_v11 = vsub.f32 %v4799_v16, %v4851_v58 }
 0x1ea   :  { %698 = vadd.xlane.f32.xlu0 %v697_v22  ;;  %v661_v29 = vmul.f32 %v5023_v3, %v5023_v3  ;;  %v662_v6 = vmul.f32 %v5027_v43, %v5027_v43  ;;  %v718_v30 = vadd.f32 %v658_v44, %v657_v12  ;;  %v715_v22 = vadd.f32 %v656_v52, %v655_v55  ;;  %v7419_v12 = vld [vmem:[#allocation6_spill] sm:$0xff] }
 0x1eb   :  { %v659_v9 = vmul.f32 %v5015_v45, %v5015_v45  ;;  %v660_v32 = vmul.f32 %v5019_v48, %v5019_v48  ;;  %v5063_v15 = vsub.f32 %v4804_v24, %v4851_v58  ;;  %v5067_v16 = vsub.f32 %v4807_v25, %v4851_v58 }
 0x1ec   :  { %v5071_v23 = vsub.f32 %v4812_v35, %v4851_v58  ;;  %v5075_v20 = vsub.f32 %v4815_v40, %v4851_v58  ;;  %v665_v4 = vmul.f32 %v5047_v13, %v5047_v13  ;;  %v666_v24 = vmul.f32 %v5051_v11, %v5051_v11  ;;  %v7415_v40 = vld [vmem:[#allocation4_spill] sm:$0xff] }
 0x1ed   :  { %707 = vadd.xlane.f32.xlu1 %v706_v2  ;;  %v724_v38 = vadd.f32 %v662_v6, %v661_v29  ;;  %v721_v2 = vadd.f32 %v660_v32, %v659_v9  ;;  %v663_v25 = vmul.f32 %v5039_v63, %v5039_v63  ;;  %v5087_v35 = vsub.f32 %v4820_v50, %v4851_v58  ;;  %v7423_v9 = vld [vmem:[#allocation8_spill] sm:$0xff] }
 0x1ee   :  { %704 = vadd.xlane.f32.xlu0 %v703_v14  ;;  %v664_v14 = vmul.f32 %v5043_v0, %v5043_v0  ;;  %v5091_v39 = vsub.f32 %v7415_v40, %v4851_v58  ;;  %v730_v44 = vadd.f32 %v666_v24, %v665_v4  ;;  %v669_v55 = vmul.f32 %v5071_v23, %v5071_v23  ;;  %v7425_v4 = vld [vmem:[#allocation9_spill] sm:$0xff] }
 0x1ef   :  { %7414 = vst [vmem:[#allocation11_spill] sm:$0xff] %v5087_v35  ;;  %v670_v52 = vmul.f32 %v5075_v20, %v5075_v20  ;;  %v667_v29 = vmul.f32 %v5063_v15, %v5063_v15  ;;  %v668_v6 = vmul.f32 %v5067_v16, %v5067_v16  ;;  %v5115_v32 = vsub.f32 %v7423_v9, %v4851_v58 }
 0x1f0   :  { %7416 = vst [vmem:[#allocation4_spill] sm:$0xff] %v5091_v39  ;;  %v727_v50 = vadd.f32 %v664_v14, %v663_v25  ;;  %v5119_v24 = vsub.f32 %v7425_v4, %v4851_v58 }
 0x1f1   :  { %713 = vadd.xlane.f32.xlu1 %v712_v53  ;;  %v5095_v53 = vsub.f32 %v7417_v34, %v4851_v58  ;;  %7424 = vst [vmem:[#allocation8_spill] sm:$0xff] %v5115_v32  ;;  %v736_v40 = vadd.f32 %v670_v52, %v669_v55  ;;  %v733_v34 = vadd.f32 %v668_v6, %v667_v29 }
 0x1f2   :  { %710 = vadd.xlane.f32.xlu0 %v709_v54  ;;  %v5099_v54 = vsub.f32 %v7419_v12, %v4851_v58  ;;  %7426 = vst [vmem:[#allocation9_spill] sm:$0xff] %v5119_v24  ;;  %v671_v12 = vmul.f32 %v5087_v35, %v5087_v35  ;;  %v676_v52 = vmul.f32 %v5115_v32, %v5115_v32 }
 0x1f3   :  { %7418 = vst [vmem:[#allocation5_spill] sm:$0xff] %v5095_v53  ;;  %v673_v25 = vmul.f32 %v5095_v53, %v5095_v53 }
 0x1f4   :  { %7420 = vst [vmem:[#allocation6_spill] sm:$0xff] %v5099_v54  ;;  %v674_v14 = vmul.f32 %v5099_v54, %v5099_v54 }
 0x1f5   :  { %719 = vadd.xlane.f32.xlu1 %v718_v30  ;;  %v7421_v30 = vld [vmem:[#allocation7_spill] sm:$0xff] }
 0x1f6   :  { %716 = vadd.xlane.f32.xlu0 %v715_v22  ;;  %v5111_v22 = vsub.f32 %v7421_v30, %v4851_v58  ;;  %v677_v30 = vmul.f32 %v5119_v24, %v5119_v24 }
 0x1f8   :  { %7422 = vst [vmem:[#allocation7_spill] sm:$0xff] %v5111_v22  ;;  %v675_v55 = vmul.f32 %v5111_v22, %v5111_v22 }
 0x1f9   :  { %725 = vadd.xlane.f32.xlu1 %v724_v38  ;;  %v7427_v38 = vld [vmem:[#allocation10_spill] sm:$0xff] }
 0x1fa   :  { %722 = vadd.xlane.f32.xlu0 %v721_v2  ;;  %v5123_v2 = vsub.f32 %v7427_v38, %v4851_v58  ;;  %v745_v6 = vadd.f32 %v676_v52, %v675_v55  ;;  %v4177_v38 = vld [vmem:[%s7265_s5 + $0xf4] ss:$8 sps:$4 sm:$0xff]   ;;  %v4192_v55 = vld [vmem:[%s7265_s5 + $0x250] ss:$8 sps:$4 sm:$0xff]   ;;  %v4195_v52 = vld [vmem:[%s7265_s5 + $0xc4] ss:$8 sps:$4 sm:$0xff]  }
 0x1fb   :  { %1802 = vmatprep.subr.bf16.mxu1 %v4177_v38  ;;  %v4198_v38 = vld [vmem:[%s7265_s5 + $0x240] ss:$8 sps:$4 sm:$0xff]  }
 0x1fc   :  { %7428 = vst [vmem:[#allocation10_spill] sm:$0xff] %v5123_v2  ;;  %v678_v4 = vmul.f32 %v5123_v2, %v5123_v2 }
 0x1fd   :  { %731 = vadd.xlane.f32.xlu1 %v730_v44  ;;  %v672_v44 = vmul.f32 %v5091_v39, %v5091_v39 }
 0x1fe   :  { %728 = vadd.xlane.f32.xlu0 %v727_v50  ;;  %v742_v50 = vadd.f32 %v674_v14, %v673_v25  ;;  %v748_v29 = vadd.f32 %v678_v4, %v677_v30  ;;  %v4182_v25 = vld [vmem:[%s7265_s5 + $0x274] ss:$8 sps:$4 sm:$0xff]   ;;  %v4179_v14 = vld [vmem:[%s7265_s5 + $0xf0] ss:$8 sps:$4 sm:$0xff]  }
 0x1ff   :  { %v739_v9 = vadd.f32 %v672_v44, %v671_v12  ;;  %2500 = vmatprep.subr.bf16.mxu0 %v4182_v25  ;;  %1803 = vmatpush1.bf16.msra.mxu1 %v4179_v14  ;;  %v4188_v12 = vld [vmem:[%s7265_s5 + $0x264] ss:$8 sps:$4 sm:$0xff]   ;;  %v4185_v44 = vld [vmem:[%s7265_s5 + $0xe0] ss:$8 sps:$4 sm:$0xff]   ;;  %v4189_v30 = vld [vmem:[%s7265_s5 + $0xd4] ss:$8 sps:$4 sm:$0xff]  }
 0x200   :  { %v4191_v4 = vld [vmem:[%s7265_s5 + $0xd0] ss:$8 sps:$4 sm:$0xff]   ;;  %v4201_v25 = vld [vmem:[%s7265_s5 + $0xb4] ss:$8 sps:$4 sm:$0xff]  }
 0x201   :  { %737 = vadd.xlane.f32.xlu1 %v736_v40  ;;  %v4180_v40 = vld [vmem:[%s7265_s5 + $0x270] ss:$8 sps:$4 sm:$0xff]   ;;  %v4206_v14 = vld [vmem:[%s7265_s5 + $0x234] ss:$8 sps:$4 sm:$0xff]  }
 0x202   :  { %734 = vadd.xlane.f32.xlu0 %v733_v34  ;;  %2501 = vmatpush1.bf16.msra.mxu0 %v4180_v40  ;;  %v4183_v34 = vld [vmem:[%s7265_s5 + $0xe4] ss:$8 sps:$4 sm:$0xff]   ;;  %v4203_v40 = vld [vmem:[%s7265_s5 + $0xb0] ss:$8 sps:$4 sm:$0xff]  }
 0x203   :  { %1804 = vmatprep.subr.bf16.mxu1 %v4183_v34  ;;  %2502 = vmatprep.subr.bf16.mxu0 %v4188_v12  ;;  %v4204_v34 = vld [vmem:[%s7265_s5 + $0x230] ss:$8 sps:$4 sm:$0xff]   ;;  %v4207_v12 = vld [vmem:[%s7265_s5 + $0xa4] ss:$8 sps:$4 sm:$0xff]  }
 0x204   :  { %1805 = vmatpush1.bf16.msra.mxu1 %v4185_v44  ;;  %v4212_v44 = vld [vmem:[%s7265_s5 + $0x224] ss:$8 sps:$4 sm:$0xff]  }
 0x205   :  { %743 = vadd.xlane.f32.xlu1 %v742_v50  ;;  %v4186_v50 = vld [vmem:[%s7265_s5 + $0x260] ss:$8 sps:$4 sm:$0xff]   ;;  %1806 = vmatprep.subr.bf16.mxu1 %v4189_v30 }
 0x206   :  { %740 = vadd.xlane.f32.xlu0 %v739_v9  ;;  %2503 = vmatpush1.bf16.msra.mxu0 %v4186_v50  ;;  %v4194_v9 = vld [vmem:[%s7265_s5 + $0x254] ss:$8 sps:$4 sm:$0xff]   ;;  %v4209_v50 = vld [vmem:[%s7265_s5 + $0xa0] ss:$8 sps:$4 sm:$0xff]  }
 0x207   :  { %2504 = vmatprep.subr.bf16.mxu0 %v4194_v9  ;;  %v4210_v30 = vld [vmem:[%s7265_s5 + $0x220] ss:$8 sps:$4 sm:$0xff]   ;;  %v4213_v9 = vld [vmem:[%s7265_s5 + $0x94] ss:$8 sps:$4 sm:$0xff]  }
 0x208   :  { %1807 = vmatpush1.bf16.msra.mxu1 %v4191_v4  ;;  %v4218_v4 = vld [vmem:[%s7265_s5 + $0x214] ss:$8 sps:$4 sm:$0xff]  }
 0x209   :  { %749 = vadd.xlane.f32.xlu1 %v748_v29  ;;  %v4200_v29 = vld [vmem:[%s7265_s5 + $0x244] ss:$8 sps:$4 sm:$0xff]   ;;  %1808 = vmatprep.subr.bf16.mxu1 %v4195_v52  ;;  %v4216_v52 = vld [vmem:[%s7265_s5 + $0x210] ss:$8 sps:$4 sm:$0xff]  }
 0x20a   :  { %746 = vadd.xlane.f32.xlu0 %v745_v6  ;;  %2505 = vmatpush1.bf16.msra.mxu0 %v4192_v55  ;;  %v4197_v6 = vld [vmem:[%s7265_s5 + $0xc0] ss:$8 sps:$4 sm:$0xff]   ;;  %v4215_v55 = vld [vmem:[%s7265_s5 + $0x90] ss:$8 sps:$4 sm:$0xff]  }
 0x20b   :  { %2506 = vmatprep.subr.bf16.mxu0 %v4200_v29  ;;  %v4219_v29 = vld [vmem:[%s7265_s5 + $0x84] ss:$8 sps:$4 sm:$0xff]  }
 0x20c   :  { %1809 = vmatpush1.bf16.msra.mxu1 %v4197_v6  ;;  %v4221_v6 = vld [vmem:[%s7265_s5 + $0x80] ss:$8 sps:$4 sm:$0xff]  }
 0x20d   :  { %1810 = vmatprep.subr.bf16.mxu1 %v4201_v25  ;;  %v4224_v25 = vld [vmem:[%s7265_s5 + $0x204] ss:$8 sps:$4 sm:$0xff]  }
 0x20e   :  { %2507 = vmatpush1.bf16.msra.mxu0 %v4198_v38  ;;  %v4222_v38 = vld [vmem:[%s7265_s5 + $0x200] ss:$8 sps:$4 sm:$0xff]  }
 0x20f   :  { %2508 = vmatprep.subr.bf16.mxu0 %v4206_v14 }
 0x210   :  { %1811 = vmatpush1.bf16.msra.mxu1 %v4203_v40 }
 0x211   :  { %1812 = vmatprep.subr.bf16.mxu1 %v4207_v12  ;;  %v4227_v12 = vld [vmem:[%s7265_s5 + $0x74] ss:$8 sps:$4 sm:$0xff]  }
 0x212   :  { %2509 = vmatpush1.bf16.msra.mxu0 %v4204_v34  ;;  %v7296_v34 = vmov 0  }
 0x213   :  { %2510 = vmatprep.subr.bf16.mxu0 %v4212_v44  ;;  %1834 = vmatprep.mubr.bf16.mxu1 %v7296_v34 }
 0x214   :  { %1813 = vmatpush1.bf16.msra.mxu1 %v4209_v50  ;;  %2532 = vmatprep.mubr.bf16.mxu0 %v7296_v34 }
 0x215   :  { %1814 = vmatprep.subr.bf16.mxu1 %v4213_v9 }
 0x216   :  { %2511 = vmatpush1.bf16.msra.mxu0 %v4210_v30 }
 0x217   :  { %2512 = vmatprep.subr.bf16.mxu0 %v4218_v4 }
 0x218   :  { %1815 = vmatpush1.bf16.msra.mxu1 %v4215_v55 }
 0x219   :  { %1816 = vmatprep.subr.bf16.mxu1 %v4219_v29 }
 0x21a   :  { %2513 = vmatpush1.bf16.msra.mxu0 %v4216_v52 }
 0x21b   :  { %2514 = vmatprep.subr.bf16.mxu0 %v4224_v25 }
 0x21c   :  { %1817 = vmatpush1.bf16.msra.mxu1 %v4221_v6 }
 0x21d   :  { %1955 = vmatprep.subr.bf16.mxu1 %v4227_v12 }
 0x21e   :  { %2515 = vmatpush1.bf16.msra.mxu0 %v4222_v38 }
 0x266   :  { %v684_v14 = vpop.xlane.xlu1 %683 }
 0x267   :  { %v681_v40 = vpop.xlane.xlu0 %680 }
 0x268   :  { %v751_v44 = vadd.f32 %v684_v14, %v681_v40 }
 0x26a   :  { %v690_v50 = vpop.xlane.xlu1 %689 }
 0x26b   :  { %v687_v30 = vpop.xlane.xlu0 %686 }
 0x26c   :  { %v752_v9 = vadd.f32 %v751_v44, %v687_v30 }
 0x26e   :  { %v753_v4 = vadd.f32 %v752_v9, %v690_v50  ;;  %v696_v55 = vpop.xlane.xlu1 %695 }
 0x26f   :  { %v693_v52 = vpop.xlane.xlu0 %692 }
 0x270   :  { %v754_v29 = vadd.f32 %v753_v4, %v693_v52 }
 0x272   :  { %v755_v2 = vadd.f32 %v754_v29, %v696_v55  ;;  %v702_v24 = vpop.xlane.xlu1 %701 }
 0x273   :  { %v699_v32 = vpop.xlane.xlu0 %698 }
 0x274   :  { %v756_v22 = vadd.f32 %v755_v2, %v699_v32 }
 0x276   :  { %v757_v54 = vadd.f32 %v756_v22, %v702_v24  ;;  %v708_v53 = vpop.xlane.xlu1 %707 }
 0x277   :  { %v705_v25 = vpop.xlane.xlu0 %704 }
 0x278   :  { %v758_v39 = vadd.f32 %v757_v54, %v705_v25 }
 0x27a   :  { %v759_v34 = vadd.f32 %v758_v39, %v708_v53  ;;  %v714_v14 = vpop.xlane.xlu1 %713 }
 0x27b   :  { %v711_v6 = vpop.xlane.xlu0 %710 }
 0x27c   :  { %v760_v38 = vadd.f32 %v759_v34, %v711_v6  ;;  %v774_v6 = vmul.f32 2688.0, %v4851_v58 }
 0x27e   :  { %v761_v40 = vadd.f32 %v760_v38, %v714_v14  ;;  %v720_v35 = vpop.xlane.xlu1 %719 }
 0x27f   :  { %v717_v12 = vpop.xlane.xlu0 %716 }
 0x280   :  { %v762_v44 = vadd.f32 %v761_v40, %v717_v12  ;;  %v5246_v12 = vld [vmem:[%s7266_s3] sm:$0x3] }
 0x282   :  { %v763_v50 = vadd.f32 %v762_v44, %v720_v35  ;;  %v726_v30 = vpop.xlane.xlu1 %725  ;;  %v775_v44 = vmul.f32 %v774_v6, %v4851_v58  ;;  %v5337_v6 = vld [vmem:[%s7266_s3 + $0xc] sm:$0x3]  ;;  %v5384_v58 = vld [vmem:[%s7267_s4 + $0x10] sm:$0x3] }
 0x283   :  { %v723_v9 = vpop.xlane.xlu0 %722  ;;  %7440 = vst [vmem:[#allocation21_spill] sm:$0xff] %v5337_v6  ;;  %7445 = vst [vmem:[#allocation26_spill] sm:$0xff] %v5384_v58  ;;  %v5454_v58 = vld [vmem:[%s7267_s4 + $0x18] sm:$0x3]  ;;  %v7483_v6 = vld [vmem:[#allocation10_spill] sm:$0xff] }
 0x284   :  { %v764_v4 = vadd.f32 %v763_v50, %v723_v9  ;;  %v5257_v9 = vld [vmem:[%s7266_s3 + $0x2] sm:$0x3]  ;;  %7453 = vst [vmem:[#allocation34_spill] sm:$0xff] %v5454_v58  ;;  %v5526_v58 = vld [vmem:[%s7267_s4 + $0x20] sm:$0x3] }
 0x285   :  { %7461 = vst [vmem:[#allocation42_spill] sm:$0xff] %v5526_v58  ;;  %v5598_v58 = vld [vmem:[%s7267_s4 + $0x28] sm:$0x3] }
 0x286   :  { %v765_v55 = vadd.f32 %v764_v4, %v726_v30  ;;  %v732_v52 = vpop.xlane.xlu1 %731  ;;  %v5252_v30 = vld [vmem:[%s7267_s4] sm:$0x3]  ;;  %v5262_v4 = vld [vmem:[%s7267_s4 + $0x2] sm:$0x3]  ;;  %7469 = vst [vmem:[#allocation50_spill] sm:$0xff] %v5598_v58 }
 0x287   :  { %v729_v29 = vpop.xlane.xlu0 %728  ;;  %7429 = vst [vmem:[#allocation12_spill] sm:$0xff] %v5252_v30  ;;  %7430 = vst [vmem:[#allocation13_spill] sm:$0xff] %v5262_v4  ;;  %v5436_v4 = vld [vmem:[%s7267_s4 + $0x16] sm:$0x3]  ;;  %v5459_v30 = vld [vmem:[%s7266_s3 + $0x1a] sm:$0x3] }
 0x288   :  { %v766_v32 = vadd.f32 %v765_v55, %v729_v29  ;;  %v5269_v29 = vld [vmem:[%s7266_s3 + $0x4] sm:$0x3]  ;;  %7451 = vst [vmem:[#allocation32_spill] sm:$0xff] %v5436_v4  ;;  %7454 = vst [vmem:[#allocation35_spill] sm:$0xff] %v5459_v30  ;;  %v5508_v4 = vld [vmem:[%s7267_s4 + $0x1e] sm:$0x3] }
 0x289   :  { %7459 = vst [vmem:[#allocation40_spill] sm:$0xff] %v5508_v4  ;;  %v5549_v30 = vld [vmem:[%s7266_s3 + $0x24] sm:$0x3]  ;;  %v5580_v4 = vld [vmem:[%s7267_s4 + $0x26] sm:$0x3] }
 0x28a   :  { %v767_v22 = vadd.f32 %v766_v32, %v732_v52  ;;  %v738_v24 = vpop.xlane.xlu1 %737  ;;  %v7431_v52 = vld [vmem:[#allocation2_spill] sm:$0xff]  ;;  %7464 = vst [vmem:[#allocation45_spill] sm:$0xff] %v5549_v30  ;;  %7467 = vst [vmem:[#allocation48_spill] sm:$0xff] %v5580_v4  ;;  %v5639_v30 = vld [vmem:[%s7266_s3 + $0x2e] sm:$0x3] }
 0x28b   :  { %v735_v2 = vpop.xlane.xlu0 %734  ;;  %v5274_v32 = vld [vmem:[%s7267_s4 + $0x4] sm:$0x3]  ;;  %7474 = vst [vmem:[#allocation55_spill] sm:$0xff] %v5639_v30 }
 0x28c   :  { %v768_v54 = vadd.f32 %v767_v22, %v735_v2  ;;  %7432 = vst [vmem:[#allocation14_spill] sm:$0xff] %v5274_v32  ;;  %v5407_v32 = vld [vmem:[%s7266_s3 + $0x14] sm:$0x3]  ;;  %v7479_v30 = vld [vmem:[#allocation6_spill] sm:$0xff] }
 0x28d   :  { %7448 = vst [vmem:[#allocation29_spill] sm:$0xff] %v5407_v32  ;;  %v5495_v32 = vld [vmem:[%s7266_s3 + $0x1e] sm:$0x3] }
 0x28e   :  { %v769_v39 = vadd.f32 %v768_v54, %v738_v24  ;;  %v744_v53 = vpop.xlane.xlu1 %743  ;;  %v7433_v24 = vld [vmem:[#allocation3_spill] sm:$0xff]  ;;  %7458 = vst [vmem:[#allocation39_spill] sm:$0xff] %v5495_v32 }
 0x28f   :  { %v741_v25 = vpop.xlane.xlu0 %740  ;;  %v5585_v32 = vld [vmem:[%s7266_s3 + $0x28] sm:$0x3] }
 0x290   :  { %v770_v34 = vadd.f32 %v769_v39, %v741_v25  ;;  %v5285_v39 = vld [vmem:[%s7266_s3 + $0x6] sm:$0x3]  ;;  %7468 = vst [vmem:[#allocation49_spill] sm:$0xff] %v5585_v32 }
 0x291   :  { %7434 = vst [vmem:[#allocation15_spill] sm:$0xff] %v5285_v39 }
 0x292   :  { %v771_v14 = vadd.f32 %v770_v34, %v744_v53  ;;  %v750_v40 = vpop.xlane.xlu1 %749  ;;  %v5290_v53 = vld [vmem:[%s7267_s4 + $0x6] sm:$0x3]  ;;  %v5358_v34 = vld [vmem:[%s7267_s4 + $0xe] sm:$0x3] }
 0x293   :  { %v747_v38 = vpop.xlane.xlu0 %746  ;;  %7435 = vst [vmem:[#allocation16_spill] sm:$0xff] %v5290_v53  ;;  %7443 = vst [vmem:[#allocation24_spill] sm:$0xff] %v5358_v34  ;;  %v5371_v53 = vld [vmem:[%s7266_s3 + $0x10] sm:$0x3] }
 0x294   :  { %v772_v35 = vadd.f32 %v771_v14, %v747_v38  ;;  %v5319_v38 = vld [vmem:[%s7266_s3 + $0xa] sm:$0x3]  ;;  %7444 = vst [vmem:[#allocation25_spill] sm:$0xff] %v5371_v53 }
 0x295   :  { %7438 = vst [vmem:[#allocation19_spill] sm:$0xff] %v5319_v38  ;;  %v5324_v14 = vld [vmem:[%s7267_s4 + $0xa] sm:$0x3] }
 0x296   :  { %v773_v50 = vadd.f32 %v772_v35, %v750_v40  ;;  %v5303_v35 = vld [vmem:[%s7266_s3 + $0x8] sm:$0x3]  ;;  %7439 = vst [vmem:[#allocation20_spill] sm:$0xff] %v5324_v14  ;;  %v5402_v14 = vld [vmem:[%s7267_s4 + $0x12] sm:$0x3] }
 0x297   :  { %7436 = vst [vmem:[#allocation17_spill] sm:$0xff] %v5303_v35  ;;  %v5308_v40 = vld [vmem:[%s7267_s4 + $0x8] sm:$0x3]  ;;  %7447 = vst [vmem:[#allocation28_spill] sm:$0xff] %v5402_v14  ;;  %v5472_v14 = vld [vmem:[%s7267_s4 + $0x1a] sm:$0x3] }
 0x298   :  { %v776_v55 = vsub.f32 %v773_v50, %v775_v44  ;;  %7437 = vst [vmem:[#allocation18_spill] sm:$0xff] %v5308_v40  ;;  %v5353_v44 = vld [vmem:[%s7266_s3 + $0xe] sm:$0x3]  ;;  %v5389_v40 = vld [vmem:[%s7266_s3 + $0x12] sm:$0x3]  ;;  %7455 = vst [vmem:[#allocation36_spill] sm:$0xff] %v5472_v14 }
 0x299   :  { %7442 = vst [vmem:[#allocation23_spill] sm:$0xff] %v5353_v44  ;;  %7446 = vst [vmem:[#allocation27_spill] sm:$0xff] %v5389_v40  ;;  %v5477_v40 = vld [vmem:[%s7266_s3 + $0x1c] sm:$0x3]  ;;  %v5544_v14 = vld [vmem:[%s7267_s4 + $0x22] sm:$0x3] }
 0x29a   :  { %v777_v25 = vmul.f32 0.00028935185, %v776_v55  ;;  %v5418_v55 = vld [vmem:[%s7267_s4 + $0x14] sm:$0x3]  ;;  %7456 = vst [vmem:[#allocation37_spill] sm:$0xff] %v5477_v40  ;;  %7463 = vst [vmem:[#allocation44_spill] sm:$0xff] %v5544_v14 }
 0x29b   :  { %7449 = vst [vmem:[#allocation30_spill] sm:$0xff] %v5418_v55  ;;  %v5490_v55 = vld [vmem:[%s7267_s4 + $0x1c] sm:$0x3]  ;;  %v5567_v40 = vld [vmem:[%s7266_s3 + $0x26] sm:$0x3] }
 0x29c   :  { %v778_v54 = vmax.f32 %v777_v25, 0.0  ;;  %v5342_v25 = vld [vmem:[%s7267_s4 + $0xc] sm:$0x3]  ;;  %7457 = vst [vmem:[#allocation38_spill] sm:$0xff] %v5490_v55  ;;  %v5562_v55 = vld [vmem:[%s7267_s4 + $0x24] sm:$0x3] }
 0x29d   :  { %7441 = vst [vmem:[#allocation22_spill] sm:$0xff] %v5342_v25  ;;  %v5423_v25 = vld [vmem:[%s7266_s3 + $0x16] sm:$0x3]  ;;  %7465 = vst [vmem:[#allocation46_spill] sm:$0xff] %v5562_v55  ;;  %v5616_v14 = vld [vmem:[%s7267_s4 + $0x2a] sm:$0x3] }
 0x29e   :  { %v779_v2 = vadd.f32 1e-05, %v778_v54  ;;  %7450 = vst [vmem:[#allocation31_spill] sm:$0xff] %v5423_v25  ;;  %v5513_v25 = vld [vmem:[%s7266_s3 + $0x20] sm:$0x3]  ;;  %7466 = vst [vmem:[#allocation47_spill] sm:$0xff] %v5567_v40 }
 0x29f   :  { %7460 = vst [vmem:[#allocation41_spill] sm:$0xff] %v5513_v25  ;;  %v5603_v25 = vld [vmem:[%s7266_s3 + $0x2a] sm:$0x3]  ;;  %7471 = vst [vmem:[#allocation52_spill] sm:$0xff] %v5616_v14  ;;  %v5634_v55 = vld [vmem:[%s7267_s4 + $0x2c] sm:$0x3] }
 0x2a0   :  { %4345 = vrsqrt.f32 %v779_v2  ;;  %v5441_v2 = vld [vmem:[%s7266_s3 + $0x18] sm:$0x3]  ;;  %7470 = vst [vmem:[#allocation51_spill] sm:$0xff] %v5603_v25  ;;  %7473 = vst [vmem:[#allocation54_spill] sm:$0xff] %v5634_v55  ;;  %v5654_v40 = vld [vmem:[%s7267_s4 + $0x2e] sm:$0x3] }
 0x2a1   :  { %7452 = vst [vmem:[#allocation33_spill] sm:$0xff] %v5441_v2  ;;  %v5531_v2 = vld [vmem:[%s7266_s3 + $0x22] sm:$0x3]  ;;  %7475 = vst [vmem:[#allocation56_spill] sm:$0xff] %v5654_v40  ;;  %v7476_v40 = vld [vmem:[#allocation11_spill] sm:$0xff] }
 0x2a2   :  { %7462 = vst [vmem:[#allocation43_spill] sm:$0xff] %v5531_v2  ;;  %v5621_v2 = vld [vmem:[%s7266_s3 + $0x2c] sm:$0x3]  ;;  %v7477_v55 = vld [vmem:[#allocation4_spill] sm:$0xff]  ;;  %v7478_v14 = vld [vmem:[#allocation5_spill] sm:$0xff] }
 0x2a3   :  { %7472 = vst [vmem:[#allocation53_spill] sm:$0xff] %v5621_v2  ;;  %v7480_v2 = vld [vmem:[#allocation7_spill] sm:$0xff]  ;;  %v7481_v25 = vld [vmem:[#allocation8_spill] sm:$0xff]  ;;  %v7482_v44 = vld [vmem:[#allocation9_spill] sm:$0xff] }
 0x2ad   :  { %v5641_v54 = vpop.eup %4345 }
 0x2ae   :  { %v781_v4 = vmul.f32 %v5641_v54, %v4855_v49  ;;  %v782_v58 = vmul.f32 %v5641_v54, %v4859_v59  ;;  %v783_v32 = vmul.f32 %v5641_v54, %v4863_v60  ;;  %v784_v53 = vmul.f32 %v5641_v54, %v4867_v5 }
 0x2af   :  { %v785_v22 = vmul.f32 %v5641_v54, %v4879_v37  ;;  %v786_v50 = vmul.f32 %v5641_v54, %v4883_v41  ;;  %v787_v34 = vmul.f32 %v5641_v54, %v4871_v10  ;;  %v788_v49 = vmul.f32 %v5641_v54, %v4875_v36 }
 0x2b0   :  { %v789_v59 = vmul.f32 %v5641_v54, %v4887_v42  ;;  %v790_v60 = vmul.f32 %v5641_v54, %v4891_v51  ;;  %v791_v5 = vmul.f32 %v5641_v54, %v4903_v56  ;;  %v792_v37 = vmul.f32 %v5641_v54, %v4907_v57 }
 0x2b1   :  { %v793_v41 = vmul.f32 %v5641_v54, %v4919_v61  ;;  %v794_v10 = vmul.f32 %v5641_v54, %v4923_v62  ;;  %v795_v36 = vmul.f32 %v5641_v54, %v4927_v26  ;;  %v796_v42 = vmul.f32 %v5641_v54, %v4931_v21 }
 0x2b2   :  { %v797_v51 = vmul.f32 %v5641_v54, %v4943_v7  ;;  %v798_v56 = vmul.f32 %v5641_v54, %v4947_v8  ;;  %v799_v57 = vmul.f32 %v5641_v54, %v4951_v1  ;;  %v800_v61 = vmul.f32 %v5641_v54, %v4955_v31 }
 0x2b3   :  { %v801_v62 = vmul.f32 %v5641_v54, %v4967_v17  ;;  %v802_v26 = vmul.f32 %v5641_v54, %v4971_v18  ;;  %v803_v21 = vmul.f32 %v5641_v54, %v4975_v46  ;;  %v804_v7 = vmul.f32 %v5641_v54, %v4979_v47 }
 0x2b4   :  { %v805_v8 = vmul.f32 %v5641_v54, %v4991_v27  ;;  %v806_v1 = vmul.f32 %v5641_v54, %v4995_v28  ;;  %v807_v31 = vmul.f32 %v5641_v54, %v4999_v19  ;;  %v808_v17 = vmul.f32 %v5641_v54, %v5003_v33 }
 0x2b5   :  { %v809_v18 = vmul.f32 %v5641_v54, %v5015_v45  ;;  %v810_v46 = vmul.f32 %v5641_v54, %v5019_v48  ;;  %v811_v47 = vmul.f32 %v5641_v54, %v5023_v3  ;;  %v812_v27 = vmul.f32 %v5641_v54, %v5027_v43 }
 0x2b6   :  { %v813_v28 = vmul.f32 %v5641_v54, %v5039_v63  ;;  %v814_v19 = vmul.f32 %v5641_v54, %v5043_v0  ;;  %v815_v33 = vmul.f32 %v5641_v54, %v5047_v13  ;;  %v816_v45 = vmul.f32 %v5641_v54, %v5051_v11 }
 0x2b7   :  { %v817_v48 = vmul.f32 %v5641_v54, %v5063_v15  ;;  %v818_v3 = vmul.f32 %v5641_v54, %v5067_v16  ;;  %v819_v43 = vmul.f32 %v5641_v54, %v5071_v23  ;;  %v820_v63 = vmul.f32 %v5641_v54, %v5075_v20 }
 0x2b8   :  { %v821_v0 = vmul.f32 %v5641_v54, %v7476_v40  ;;  %v822_v13 = vmul.f32 %v5641_v54, %v7477_v55  ;;  %v823_v11 = vmul.f32 %v5641_v54, %v7478_v14  ;;  %v824_v15 = vmul.f32 %v5641_v54, %v7479_v30 }
 0x2b9   :  { %v825_v16 = vmul.f32 %v5641_v54, %v7480_v2  ;;  %v826_v23 = vmul.f32 %v5641_v54, %v7481_v25  ;;  %v827_v20 = vmul.f32 %v5641_v54, %v7482_v44  ;;  %v828_v40 = vmul.f32 %v5641_v54, %v7483_v6 }
 0x2ba   :  { %v7484_v55 = vrot.slane %v5246_v12, %v7431_v52  ;;  %v7485_v14 = vrot.slane %v5246_v12, %v7433_v24  ;;  %v7486_v2 = vrot.slane %v5257_v9, %v7431_v52  ;;  %v7487_v25 = vrot.slane %v5257_v9, %v7433_v24 }
 0x2bb   :  { %v7488_v44 = vrot.slane %v5269_v29, %v7431_v52  ;;  %v7489_v54 = vrot.slane %v5269_v29, %v7433_v24 }
 0x2bc   :  { %v1117_v38 = vmul.f32 %v7484_v55, %v781_v4  ;;  %v1118_v30 = vmul.f32 %v7485_v14, %v782_v58  ;;  %v1119_v35 = vmul.f32 %v7486_v2, %v783_v32  ;;  %v1120_v39 = vmul.f32 %v7487_v25, %v784_v53  ;;  %v7490_v55 = vld [vmem:[#allocation15_spill] sm:$0xff]  ;;  %v7493_v2 = vld [vmem:[#allocation17_spill] sm:$0xff] }
 0x2bd   :  { %v1121_v6 = vmul.f32 %v7488_v44, %v785_v22  ;;  %v1122_v4 = vmul.f32 %v7489_v54, %v786_v50  ;;  %v7491_v12 = vrot.slane %v7490_v55, %v7431_v52  ;;  %v7492_v14 = vrot.slane %v7490_v55, %v7433_v24  ;;  %v7496_v44 = vld [vmem:[#allocation19_spill] sm:$0xff] }
 0x2be   :  { %v7494_v9 = vrot.slane %v7493_v2, %v7431_v52  ;;  %v7495_v25 = vrot.slane %v7493_v2, %v7433_v24  ;;  %v7497_v29 = vrot.slane %v7496_v44, %v7431_v52  ;;  %v7498_v54 = vrot.slane %v7496_v44, %v7433_v24 }
 0x2bf   :  { %v1123_v58 = vmul.f32 %v7491_v12, %v787_v34  ;;  %v1124_v32 = vmul.f32 %v7492_v14, %v788_v49  ;;  %v7499_v12 = vld [vmem:[#allocation21_spill] sm:$0xff] }
 0x2c0   :  { %v1125_v53 = vmul.f32 %v7494_v9, %v789_v59  ;;  %v1126_v22 = vmul.f32 %v7495_v25, %v790_v60  ;;  %v1127_v50 = vmul.f32 %v7497_v29, %v791_v5  ;;  %v1128_v34 = vmul.f32 %v7498_v54, %v792_v37  ;;  %v7502_v9 = vld [vmem:[#allocation23_spill] sm:$0xff]  ;;  %v7505_v29 = vld [vmem:[#allocation25_spill] sm:$0xff] }
 0x2c1   :  { %v7500_v55 = vrot.slane %v7499_v12, %v7431_v52  ;;  %v7501_v14 = vrot.slane %v7499_v12, %v7433_v24  ;;  %v7503_v2 = vrot.slane %v7502_v9, %v7431_v52  ;;  %v7504_v25 = vrot.slane %v7502_v9, %v7433_v24 }
 0x2c2   :  { %v7506_v44 = vrot.slane %v7505_v29, %v7431_v52  ;;  %v7507_v54 = vrot.slane %v7505_v29, %v7433_v24 }
 0x2c3   :  { %v1129_v49 = vmul.f32 %v7500_v55, %v793_v41  ;;  %v1130_v59 = vmul.f32 %v7501_v14, %v794_v10  ;;  %v1131_v60 = vmul.f32 %v7503_v2, %v795_v36  ;;  %v1132_v5 = vmul.f32 %v7504_v25, %v796_v42  ;;  %v7508_v55 = vld [vmem:[#allocation27_spill] sm:$0xff]  ;;  %v7511_v2 = vld [vmem:[#allocation29_spill] sm:$0xff] }
 0x2c4   :  { %v1133_v37 = vmul.f32 %v7506_v44, %v797_v51  ;;  %v1134_v41 = vmul.f32 %v7507_v54, %v798_v56  ;;  %v7509_v12 = vrot.slane %v7508_v55, %v7431_v52  ;;  %v7510_v14 = vrot.slane %v7508_v55, %v7433_v24  ;;  %v7514_v44 = vld [vmem:[#allocation31_spill] sm:$0xff] }
 0x2c5   :  { %v7512_v9 = vrot.slane %v7511_v2, %v7431_v52  ;;  %v7513_v25 = vrot.slane %v7511_v2, %v7433_v24  ;;  %v7515_v29 = vrot.slane %v7514_v44, %v7431_v52  ;;  %v7516_v54 = vrot.slane %v7514_v44, %v7433_v24 }
 0x2c6   :  { %v1135_v10 = vmul.f32 %v7509_v12, %v799_v57  ;;  %v1136_v36 = vmul.f32 %v7510_v14, %v800_v61  ;;  %v7517_v12 = vld [vmem:[#allocation33_spill] sm:$0xff] }
 0x2c7   :  { %v1137_v42 = vmul.f32 %v7512_v9, %v801_v62  ;;  %v1138_v51 = vmul.f32 %v7513_v25, %v802_v26  ;;  %v1139_v56 = vmul.f32 %v7515_v29, %v803_v21  ;;  %v1140_v57 = vmul.f32 %v7516_v54, %v804_v7  ;;  %v7520_v9 = vld [vmem:[#allocation35_spill] sm:$0xff]  ;;  %v7523_v29 = vld [vmem:[#allocation37_spill] sm:$0xff] }
 0x2c8   :  { %v7518_v55 = vrot.slane %v7517_v12, %v7431_v52  ;;  %v7519_v14 = vrot.slane %v7517_v12, %v7433_v24  ;;  %v7521_v2 = vrot.slane %v7520_v9, %v7431_v52  ;;  %v7522_v25 = vrot.slane %v7520_v9, %v7433_v24 }
 0x2c9   :  { %v7524_v44 = vrot.slane %v7523_v29, %v7431_v52  ;;  %v7525_v54 = vrot.slane %v7523_v29, %v7433_v24 }
 0x2ca   :  { %v1141_v61 = vmul.f32 %v7518_v55, %v805_v8  ;;  %v1142_v62 = vmul.f32 %v7519_v14, %v806_v1  ;;  %v1143_v26 = vmul.f32 %v7521_v2, %v807_v31  ;;  %v1144_v21 = vmul.f32 %v7522_v25, %v808_v17  ;;  %v7526_v55 = vld [vmem:[#allocation39_spill] sm:$0xff]  ;;  %v7529_v2 = vld [vmem:[#allocation41_spill] sm:$0xff] }
 0x2cb   :  { %v1145_v7 = vmul.f32 %v7524_v44, %v809_v18  ;;  %v1146_v8 = vmul.f32 %v7525_v54, %v810_v46  ;;  %v7527_v12 = vrot.slane %v7526_v55, %v7431_v52  ;;  %v7528_v14 = vrot.slane %v7526_v55, %v7433_v24  ;;  %v7532_v44 = vld [vmem:[#allocation43_spill] sm:$0xff] }
 0x2cc   :  { %v7530_v9 = vrot.slane %v7529_v2, %v7431_v52  ;;  %v7531_v25 = vrot.slane %v7529_v2, %v7433_v24  ;;  %v7533_v29 = vrot.slane %v7532_v44, %v7431_v52  ;;  %v7534_v54 = vrot.slane %v7532_v44, %v7433_v24 }
 0x2cd   :  { %v1147_v1 = vmul.f32 %v7527_v12, %v811_v47  ;;  %v1148_v31 = vmul.f32 %v7528_v14, %v812_v27  ;;  %v7535_v12 = vld [vmem:[#allocation45_spill] sm:$0xff] }
 0x2ce   :  { %v1149_v17 = vmul.f32 %v7530_v9, %v813_v28  ;;  %v1150_v18 = vmul.f32 %v7531_v25, %v814_v19  ;;  %v1151_v46 = vmul.f32 %v7533_v29, %v815_v33  ;;  %v1152_v47 = vmul.f32 %v7534_v54, %v816_v45  ;;  %v7538_v9 = vld [vmem:[#allocation47_spill] sm:$0xff]  ;;  %v7541_v29 = vld [vmem:[#allocation49_spill] sm:$0xff] }
 0x2cf   :  { %v7536_v55 = vrot.slane %v7535_v12, %v7431_v52  ;;  %v7537_v14 = vrot.slane %v7535_v12, %v7433_v24  ;;  %v7539_v2 = vrot.slane %v7538_v9, %v7431_v52  ;;  %v7540_v25 = vrot.slane %v7538_v9, %v7433_v24 }
 0x2d0   :  { %v7542_v44 = vrot.slane %v7541_v29, %v7431_v52  ;;  %v7543_v54 = vrot.slane %v7541_v29, %v7433_v24  ;;  %v7550_v29 = vld [vmem:[#allocation55_spill] sm:$0xff] }
 0x2d1   :  { %v1153_v27 = vmul.f32 %v7536_v55, %v817_v48  ;;  %v1154_v28 = vmul.f32 %v7537_v14, %v818_v3  ;;  %v1155_v19 = vmul.f32 %v7539_v2, %v819_v43  ;;  %v1156_v33 = vmul.f32 %v7540_v25, %v820_v63  ;;  %v7544_v55 = vld [vmem:[#allocation51_spill] sm:$0xff]  ;;  %v7547_v2 = vld [vmem:[#allocation53_spill] sm:$0xff] }
 0x2d2   :  { %v1157_v45 = vmul.f32 %v7542_v44, %v821_v0  ;;  %v1158_v48 = vmul.f32 %v7543_v54, %v822_v13  ;;  %v7545_v12 = vrot.slane %v7544_v55, %v7431_v52  ;;  %v7546_v14 = vrot.slane %v7544_v55, %v7433_v24 }
 0x2d3   :  { %v7548_v9 = vrot.slane %v7547_v2, %v7431_v52  ;;  %v7549_v0 = vrot.slane %v7547_v2, %v7433_v24  ;;  %v7551_v13 = vrot.slane %v7550_v29, %v7431_v52 }
 0x2d4   :  { %v1159_v3 = vmul.f32 %v7545_v12, %v823_v11  ;;  %v1160_v43 = vmul.f32 %v7546_v14, %v824_v15  ;;  %v7552_v11 = vrot.slane %v7550_v29, %v7433_v24  ;;  %v7553_v15 = vld [vmem:[#allocation12_spill] sm:$0xff]  ;;  %v7558_v14 = vld [vmem:[#allocation13_spill] sm:$0xff] }
 0x2d5   :  { %v5909_v63 = vmul.f32 %v7548_v9, %v825_v16  ;;  %v5914_v25 = vmul.f32 %v7549_v0, %v826_v23  ;;  %v5919_v44 = vmul.f32 %v7551_v13, %v827_v20  ;;  %v7554_v55 = vrot.slane %v7553_v15, %v7431_v52  ;;  %v7563_v0 = vld [vmem:[#allocation14_spill] sm:$0xff] }
 0x2d6   :  { %v5924_v54 = vmul.f32 %v7552_v11, %v828_v40  ;;  %v7556_v12 = vrot.slane %v7553_v15, %v7433_v24  ;;  %v7559_v2 = vrot.slane %v7558_v14, %v7431_v52  ;;  %v7561_v9 = vrot.slane %v7558_v14, %v7433_v24  ;;  %v7566_v11 = vld [vmem:[#allocation16_spill] sm:$0xff] }
 0x2d7   :  { %v5929_v16 = vadd.f32 %v7554_v55, %v1117_v38  ;;  %v7564_v29 = vrot.slane %v7563_v0, %v7431_v52  ;;  %v7565_v13 = vrot.slane %v7563_v0, %v7433_v24  ;;  %v7567_v15 = vrot.slane %v7566_v11, %v7431_v52 }
 0x2d8   :  { %v5934_v23 = vadd.f32 %v7556_v12, %v1118_v30  ;;  %v5939_v20 = vadd.f32 %v7559_v2, %v1119_v35  ;;  %v5944_v40 = vadd.f32 %v7561_v9, %v1120_v39  ;;  %v7568_v55 = vrot.slane %v7566_v11, %v7433_v24  ;;  %v7569_v12 = vld [vmem:[#allocation18_spill] sm:$0xff]  ;;  %v7572_v9 = vld [vmem:[#allocation20_spill] sm:$0xff] }
 0x2d9   :  { %7555 = vst [vmem:[#allocation11_spill] sm:$0xff] %v5929_v16  ;;  %v5949_v38 = vadd.f32 %v7564_v29, %v1121_v6  ;;  %v5954_v30 = vadd.f32 %v7565_v13, %v1122_v4  ;;  %v5959_v35 = vadd.f32 %v7567_v15, %v1123_v58  ;;  %v7570_v14 = vrot.slane %v7569_v12, %v7431_v52  ;;  %v7575_v13 = vld [vmem:[#allocation22_spill] sm:$0xff] }
 0x2da   :  { %7557 = vst [vmem:[#allocation4_spill] sm:$0xff] %v5934_v23  ;;  %7560 = vst [vmem:[#allocation5_spill] sm:$0xff] %v5939_v20  ;;  %v5964_v39 = vadd.f32 %v7568_v55, %v1124_v32  ;;  %v7571_v2 = vrot.slane %v7569_v12, %v7433_v24  ;;  %v7573_v0 = vrot.slane %v7572_v9, %v7431_v52  ;;  %v7579_v55 = vld [vmem:[#allocation24_spill] sm:$0xff] }
 0x2db   :  { %7562 = vst [vmem:[#allocation6_spill] sm:$0xff] %v5944_v40  ;;  %v5969_v6 = vadd.f32 %v7570_v14, %v1125_v53  ;;  %v7574_v29 = vrot.slane %v7572_v9, %v7433_v24  ;;  %v7576_v11 = vrot.slane %v7575_v13, %v7431_v52  ;;  %v7578_v15 = vrot.slane %v7575_v13, %v7433_v24 }
 0x2dc   :  { %v5974_v4 = vadd.f32 %v7571_v2, %v1126_v22  ;;  %v5979_v58 = vadd.f32 %v7573_v0, %v1127_v50  ;;  %v7580_v12 = vrot.slane %v7579_v55, %v7431_v52  ;;  %v7581_v14 = vrot.slane %v7579_v55, %v7433_v24  ;;  %v7582_v2 = vld [vmem:[#allocation26_spill] sm:$0xff] }
 0x2dd   :  { %v5984_v32 = vadd.f32 %v7574_v29, %v1128_v34  ;;  %v5989_v53 = vadd.f32 %v7576_v11, %v1129_v49  ;;  %v5994_v22 = vadd.f32 %v7578_v15, %v1130_v59  ;;  %v7583_v9 = vrot.slane %v7582_v2, %v7431_v52  ;;  %v7585_v29 = vld [vmem:[#allocation28_spill] sm:$0xff]  ;;  %v7588_v15 = vld [vmem:[#allocation30_spill] sm:$0xff] }
 0x2de   :  { %v5999_v50 = vadd.f32 %v7580_v12, %v1131_v60  ;;  %v6004_v34 = vadd.f32 %v7581_v14, %v1132_v5  ;;  %v7584_v0 = vrot.slane %v7582_v2, %v7433_v24  ;;  %v7586_v13 = vrot.slane %v7585_v29, %v7431_v52  ;;  %v7591_v14 = vld [vmem:[#allocation32_spill] sm:$0xff] }
 0x2df   :  { %7577 = vst [vmem:[#allocation7_spill] sm:$0xff] %v5989_v53  ;;  %v6009_v49 = vadd.f32 %v7583_v9, %v1133_v37  ;;  %v7587_v11 = vrot.slane %v7585_v29, %v7433_v24  ;;  %v7589_v55 = vrot.slane %v7588_v15, %v7431_v52  ;;  %v7590_v12 = vrot.slane %v7588_v15, %v7433_v24 }
 0x2e0   :  { %v6014_v59 = vadd.f32 %v7584_v0, %v1134_v41  ;;  %v6019_v60 = vadd.f32 %v7586_v13, %v1135_v10  ;;  %v7592_v2 = vrot.slane %v7591_v14, %v7431_v52  ;;  %v7593_v9 = vrot.slane %v7591_v14, %v7433_v24  ;;  %v7594_v0 = vld [vmem:[#allocation34_spill] sm:$0xff] }
 0x2e1   :  { %v6024_v5 = vadd.f32 %v7587_v11, %v1136_v36  ;;  %v6029_v37 = vadd.f32 %v7589_v55, %v1137_v42  ;;  %v6034_v41 = vadd.f32 %v7590_v12, %v1138_v51  ;;  %v7595_v29 = vrot.slane %v7594_v0, %v7431_v52  ;;  %v7597_v11 = vld [vmem:[#allocation36_spill] sm:$0xff]  ;;  %v7600_v12 = vld [vmem:[#allocation38_spill] sm:$0xff] }
 0x2e2   :  { %v6039_v10 = vadd.f32 %v7592_v2, %v1139_v56  ;;  %v6044_v36 = vadd.f32 %v7593_v9, %v1140_v57  ;;  %v7596_v13 = vrot.slane %v7594_v0, %v7433_v24  ;;  %v7598_v15 = vrot.slane %v7597_v11, %v7431_v52  ;;  %v7603_v9 = vld [vmem:[#allocation40_spill] sm:$0xff] }
 0x2e3   :  { %v6049_v42 = vadd.f32 %v7595_v29, %v1141_v61  ;;  %v7599_v55 = vrot.slane %v7597_v11, %v7433_v24  ;;  %v7601_v14 = vrot.slane %v7600_v12, %v7431_v52  ;;  %v7602_v2 = vrot.slane %v7600_v12, %v7433_v24 }
 0x2e4   :  { %v6054_v51 = vadd.f32 %v7596_v13, %v1142_v62  ;;  %v6059_v56 = vadd.f32 %v7598_v15, %v1143_v26  ;;  %v7604_v0 = vrot.slane %v7603_v9, %v7431_v52  ;;  %v7605_v29 = vrot.slane %v7603_v9, %v7433_v24  ;;  %v7606_v13 = vld [vmem:[#allocation42_spill] sm:$0xff] }
 0x2e5   :  { %v6064_v57 = vadd.f32 %v7599_v55, %v1144_v21  ;;  %v6069_v61 = vadd.f32 %v7601_v14, %v1145_v7  ;;  %v6074_v62 = vadd.f32 %v7602_v2, %v1146_v8  ;;  %v7607_v11 = vrot.slane %v7606_v13, %v7431_v52  ;;  %v7610_v55 = vld [vmem:[#allocation44_spill] sm:$0xff]  ;;  %v7613_v2 = vld [vmem:[#allocation46_spill] sm:$0xff] }
 0x2e6   :  { %v6079_v26 = vadd.f32 %v7604_v0, %v1147_v1  ;;  %v6084_v21 = vadd.f32 %v7605_v29, %v1148_v31  ;;  %v7609_v15 = vrot.slane %v7606_v13, %v7433_v24  ;;  %v7611_v12 = vrot.slane %v7610_v55, %v7431_v52  ;;  %v7616_v29 = vld [vmem:[#allocation48_spill] sm:$0xff] }
 0x2e7   :  { %v6089_v7 = vadd.f32 %v7607_v11, %v1149_v17  ;;  %v7612_v14 = vrot.slane %v7610_v55, %v7433_v24  ;;  %v7614_v9 = vrot.slane %v7613_v2, %v7431_v52  ;;  %v7615_v0 = vrot.slane %v7613_v2, %v7433_v24 }
 0x2e8   :  { %v6094_v8 = vadd.f32 %v7609_v15, %v1150_v18  ;;  %v6099_v1 = vadd.f32 %v7611_v12, %v1151_v46  ;;  %v7617_v13 = vrot.slane %v7616_v29, %v7431_v52  ;;  %v7618_v11 = vrot.slane %v7616_v29, %v7433_v24  ;;  %v7619_v15 = vld [vmem:[#allocation50_spill] sm:$0xff] }
 0x2e9   :  { %7608 = vst [vmem:[#allocation8_spill] sm:$0xff] %v6089_v7  ;;  %v6104_v31 = vadd.f32 %v7612_v14, %v1152_v47  ;;  %v6109_v17 = vadd.f32 %v7614_v9, %v1153_v27  ;;  %v6114_v18 = vadd.f32 %v7615_v0, %v1154_v28  ;;  %v7620_v55 = vrot.slane %v7619_v15, %v7431_v52  ;;  %v7625_v14 = vld [vmem:[#allocation52_spill] sm:$0xff] }
 0x2ea   :  { %v6119_v46 = vadd.f32 %v7617_v13, %v1155_v19  ;;  %v6124_v47 = vadd.f32 %v7618_v11, %v1156_v33  ;;  %vm1517_vm2 = vcmp.gt.f32.partialorder %v6009_v49, 0.0  ;;  %vm1518_vm3 = vcmp.gt.f32.partialorder %v6014_v59, 0.0 }
 0x2eb   :  { %v6129_v27 = vadd.f32 %v7620_v55, %v1157_v45  ;;  %vm1519_vm4 = vcmp.gt.f32.partialorder %v6019_v60, 0.0  ;;  %vm1520_vm5 = vcmp.gt.f32.partialorder %v6024_v5, 0.0  ;;  %v7621_v28 = vrot.slane %v7619_v15, %v7433_v24 }
 0x2ec   :  { %vm1521_vm6 = vcmp.gt.f32.partialorder %v6029_v37, 0.0  ;;  %v6142_v33 = vmul.f32 0.01, %v5929_v16  ;;  %v6145_v45 = vmul.f32 0.01, %v5934_v23  ;;  %v7626_v2 = vrot.slane %v7625_v14, %v7431_v52 }
 0x2ed   :  { %v6138_v19 = vadd.f32 %v7621_v28, %v1158_v48  ;;  %v6148_v12 = vmul.f32 0.01, %v5939_v20  ;;  %vm1522_vm7 = vcmp.gt.f32.partialorder %v6034_v41, 0.0  ;;  %vm1523_vm8 = vcmp.gt.f32.partialorder %v6039_v10, 0.0  ;;  %v7629_v28 = vld [vmem:[#allocation54_spill] sm:$0xff] }
 0x2ee   :  { %7622 = vst [vmem:[#allocation9_spill] sm:$0xff] %v6142_v33  ;;  %7623 = vst [vmem:[#allocation10_spill] sm:$0xff] %v6145_v45  ;;  %v6153_v9 = vadd.f32 %v7626_v2, %v1159_v3  ;;  %v6158_v48 = vmul.f32 0.01, %v5944_v40  ;;  %v6161_v0 = vmul.f32 0.01, %v5949_v38  ;;  %v7628_v13 = vrot.slane %v7625_v14, %v7433_v24 }
 0x2ef   :  { %7624 = vst [vmem:[#allocation15_spill] sm:$0xff] %v6148_v12  ;;  %v6164_v29 = vmul.f32 0.01, %v5954_v30  ;;  %vm1524_vm9 = vcmp.gt.f32.partialorder %v6044_v36, 0.0  ;;  %v6173_v3 = vmul.f32 0.01, %v5959_v35  ;;  %v7630_v2 = vrot.slane %v7629_v28, %v7431_v52 }
 0x2f0   :  { %7627 = vst [vmem:[#allocation17_spill] sm:$0xff] %v6158_v48  ;;  %v6169_v11 = vadd.f32 %v7628_v13, %v1160_v43  ;;  %v6176_v15 = vmul.f32 0.01, %v5964_v39  ;;  %v6179_v55 = vmul.f32 0.01, %v5969_v6  ;;  %v7631_v12 = vrot.slane %v7629_v28, %v7433_v24  ;;  %v7633_v40 = vld [vmem:[#allocation56_spill] sm:$0xff] }
 0x2f1   :  { %v6185_v48 = vadd.f32 %v7630_v2, %v5909_v63  ;;  %v6188_v43 = vmul.f32 0.01, %v5974_v4  ;;  %v6191_v14 = vmul.f32 0.01, %v5979_v58  ;;  %v6194_v13 = vmul.f32 0.01, %v5984_v32 }
 0x2f2   :  { %v6200_v45 = vadd.f32 %v7631_v12, %v5914_v25  ;;  %v6203_v33 = vmul.f32 0.01, %v5989_v53  ;;  %v1565_v63 = vmul.f32 0.01, %v6009_v49  ;;  %v1566_v2 = vmul.f32 0.01, %v6014_v59 }
 0x2f3   :  { %v7634_v20 = vrot.slane %v7633_v40, %v7431_v52  ;;  %v6214_v16 = vmul.f32 0.01, %v5994_v22  ;;  %v6217_v28 = vmul.f32 0.01, %v5999_v50  ;;  %v1567_v25 = vmul.f32 0.01, %v6019_v60 }
 0x2f4   :  { %7632 = vst [vmem:[#allocation19_spill] sm:$0xff] %v6203_v33  ;;  %v7638_v12 = vrot.slane %v7633_v40, %v7433_v24  ;;  %v6227_v53 = vmul.f32 0.01, %v6004_v34  ;;  %v1570_v52 = vmul.f32 0.01, %v6034_v41  ;;  %v1614_v24 = vsel %vm1518_vm3, %v6014_v59, %v1566_v2 }
 0x2f5   :  { %v6211_v23 = vadd.f32 %v7634_v20, %v5919_v44  ;;  %7636 = vst [vmem:[#allocation23_spill] sm:$0xff] %v6214_v16  ;;  %7637 = vst [vmem:[#allocation25_spill] sm:$0xff] %v6217_v28  ;;  %v1568_v44 = vmul.f32 0.01, %v6024_v5  ;;  %v1569_v20 = vmul.f32 0.01, %v6029_v37  ;;  %v1613_v16 = vsel %vm1517_vm2, %v6009_v49, %v1565_v63 }
 0x2f6   :  { %v6224_v33 = vadd.f32 %v7638_v12, %v5924_v54  ;;  %7640 = vst [vmem:[#allocation29_spill] sm:$0xff] %v6227_v53  ;;  %v1572_v28 = vmul.f32 0.01, %v6044_v36  ;;  %v6238_v54 = vmul.f32 0.01, %v6049_v42  ;;  %v1615_v63 = vsel %vm1519_vm4, %v6019_v60, %v1567_v25 }
 0x2f7   :  { %7635 = vst [vmem:[#allocation21_spill] sm:$0xff] %v6211_v23  ;;  %v1571_v23 = vmul.f32 0.01, %v6039_v10  ;;  %v6241_v40 = vmul.f32 0.01, %v6054_v51  ;;  %v1616_v2 = vsel %vm1520_vm5, %v6024_v5, %v1568_v44  ;;  %v1617_v25 = vsel %vm1521_vm6, %v6029_v37, %v1569_v20 }
 0x2f8   :  { %7639 = vst [vmem:[#allocation27_spill] sm:$0xff] %v6224_v33  ;;  %v6244_v12 = vmul.f32 0.01, %v6059_v56  ;;  %v6250_v33 = vmul.f32 0.01, %v6064_v57  ;;  %v1618_v5 = vsel %vm1522_vm7, %v6034_v41, %v1570_v52  ;;  %v1620_v20 = vsel %vm1524_vm9, %v6044_v36, %v1572_v28 }
 0x2f9   :  { %7641 = vst [vmem:[#allocation31_spill] sm:$0xff] %v6241_v40  ;;  %v6253_v53 = vmul.f32 0.01, %v6069_v61  ;;  %v6256_v49 = vmul.f32 0.01, %v6074_v62  ;;  %v1619_v44 = vsel %vm1523_vm8, %v6039_v10, %v1571_v23  ;;  %v1653_v41 = vmax.f32 %v1613_v16, %v1615_v63 }
 0x2fa   :  { %7642 = vst [vmem:[#allocation33_spill] sm:$0xff] %v6244_v12  ;;  %v6262_v40 = vmul.f32 0.01, %v6079_v26  ;;  %v6265_v12 = vmul.f32 0.01, %v6084_v21  ;;  %v1654_v10 = vmax.f32 %v1614_v24, %v1616_v2  ;;  %vm1505_vm10 = vcmp.gt.f32.partialorder %v5949_v38, 0.0 }
 0x2fb   :  { %7643 = vst [vmem:[#allocation35_spill] sm:$0xff] %v6253_v53  ;;  %7644 = vst [vmem:[#allocation37_spill] sm:$0xff] %v6256_v49  ;;  %v6268_v59 = vmul.f32 0.01, %v6089_v7  ;;  %v6274_v53 = vmul.f32 0.01, %v6094_v8  ;;  %v1601_v24 = vsel %vm1505_vm10, %v5949_v38, %v6161_v0 }
 0x2fc   :  { %v6277_v49 = vmul.f32 0.01, %v6099_v1  ;;  %v6280_v60 = vmul.f32 0.01, %v6104_v31  ;;  %v6286_v7 = vmul.f32 0.01, %v6109_v17 }
 0x2fd   :  { %7645 = vst [vmem:[#allocation39_spill] sm:$0xff] %v6268_v59  ;;  %v6289_v59 = vmul.f32 0.01, %v6114_v18  ;;  %v6304_v37 = vmul.f32 0.01, %v6129_v27  ;;  %vm1506_vm11 = vcmp.gt.f32.partialorder %v5954_v30, 0.0 }
 0x2fe   :  { %7646 = vst [vmem:[#allocation41_spill] sm:$0xff] %v6277_v49  ;;  %7647 = vst [vmem:[#allocation43_spill] sm:$0xff] %v6280_v60  ;;  %v6298_v60 = vmul.f32 0.01, %v6119_v46  ;;  %v6301_v49 = vmul.f32 0.01, %v6124_v47  ;;  %v1602_v16 = vsel %vm1506_vm11, %v5954_v30, %v6164_v29 }
 0x2ff   :  { %7648 = vst [vmem:[#allocation45_spill] sm:$0xff] %v6289_v59  ;;  %v6310_v59 = vmul.f32 0.01, %v6138_v19  ;;  %v6313_v52 = vmul.f32 0.01, %v6153_v9  ;;  %vm1507_vm12 = vcmp.gt.f32.partialorder %v5959_v35, 0.0 }
 0x300   :  { %7649 = vst [vmem:[#allocation47_spill] sm:$0xff] %v6298_v60  ;;  %7650 = vst [vmem:[#allocation49_spill] sm:$0xff] %v6301_v49  ;;  %v6316_v23 = vmul.f32 0.01, %v6169_v11  ;;  %v1655_v60 = vmax.f32 %v1617_v25, %v1619_v44  ;;  %v1656_v49 = vmax.f32 %v1618_v5, %v1620_v20  ;;  %vm1508_vm13 = vcmp.gt.f32.partialorder %v5964_v39, 0.0 }
 0x301   :  { %vm1509_vm14 = vcmp.gt.f32.partialorder %v5969_v6, 0.0  ;;  %vm1510_vm15 = vcmp.gt.f32.partialorder %v5974_v4, 0.0  ;;  %vm1511_vm0 = vcmp.gt.f32.partialorder %v5979_v58, 0.0  ;;  %vm1512_vm1 = vcmp.gt.f32.partialorder %v5984_v32, 0.0 }
 0x302   :  { %v1603_v36 = vsel %vm1507_vm12, %v5959_v35, %v6173_v3  ;;  %v1604_v28 = vsel %vm1508_vm13, %v5964_v39, %v6176_v15  ;;  %v1605_v63 = vsel %vm1509_vm14, %v5969_v6, %v6179_v55  ;;  %v6337_v2 = vmul.f32 0.01, %v6185_v48  ;;  %v7651_v55 = vld [vmem:[#allocation7_spill] sm:$0xff] }
 0x303   :  { %v1606_v25 = vsel %vm1510_vm15, %v5974_v4, %v6188_v43  ;;  %v1607_v38 = vsel %vm1511_vm0, %v5979_v58, %v6191_v14  ;;  %v1608_v30 = vsel %vm1512_vm1, %v5984_v32, %v6194_v13  ;;  %v1647_v0 = vmax.f32 %v1601_v24, %v1603_v36  ;;  %v4225_v58 = vld [vmem:[%s7265_s5 + $0x70] ss:$8 sps:$4 sm:$0xff]   ;;  %v7652_v43 = vld [vmem:[#allocation19_spill] sm:$0xff] }
 0x304   :  { %v1648_v35 = vmax.f32 %v1602_v16, %v1604_v28  ;;  %v1649_v29 = vmax.f32 %v1605_v63, %v1607_v38  ;;  %v1650_v3 = vmax.f32 %v1606_v25, %v1608_v30  ;;  %v6346_v39 = vmul.f32 0.01, %v6200_v45  ;;  %v7653_v13 = vld [vmem:[#allocation23_spill] sm:$0xff]  ;;  %v7656_v16 = vld [vmem:[#allocation29_spill] sm:$0xff] }
 0x305   :  { %v1673_v6 = vmax.f32 %v1653_v41, %v1654_v10  ;;  %v6348_v15 = vmax.f32 %v1655_v60, %v1656_v49  ;;  %vm1513_vm2 = vcmp.gt.f32.partialorder %v7651_v55, 0.0  ;;  %vm1514_vm3 = vcmp.gt.f32.partialorder %v5994_v22, 0.0  ;;  %v7654_v60 = vld [vmem:[#allocation21_spill] sm:$0xff]  ;;  %v4230_v41 = vld [vmem:[%s7265_s5 + $0x64] ss:$8 sps:$4 sm:$0xff]  }
 0x306   :  { %v6351_v5 = vmax.f32 %v1647_v0, %v1648_v35  ;;  %v6353_v4 = vmax.f32 %v1649_v29, %v1650_v3  ;;  %vm1515_vm4 = vcmp.gt.f32.partialorder %v5999_v50, 0.0  ;;  %vm1516_vm5 = vcmp.gt.f32.partialorder %v6004_v34, 0.0  ;;  %v7655_v10 = vld [vmem:[#allocation25_spill] sm:$0xff]  ;;  %v7658_v30 = vld [vmem:[#allocation31_spill] sm:$0xff] }
 0x307   :  { %v6361_v32 = vpack.c.bf16 %v6348_v15, %v1673_v6  ;;  %v1609_v14 = vsel %vm1513_vm2, %v7651_v55, %v7652_v43  ;;  %v1610_v49 = vsel %vm1514_vm3, %v5994_v22, %v7653_v13  ;;  %v6369_v44 = vmul.f32 0.01, %v7654_v60  ;;  %v4233_v38 = vld [vmem:[%s7265_s5 + $0x54] ss:$8 sps:$4 sm:$0xff]   ;;  %v7660_v55 = vld [vmem:[#allocation35_spill] sm:$0xff] }
 0x308   :  { %v1701_v20 = vpack.c.bf16 %v6353_v4, %v6351_v5  ;;  %v1611_v24 = vsel %vm1515_vm4, %v5999_v50, %v7655_v10  ;;  %v1612_v36 = vsel %vm1516_vm5, %v6004_v34, %v7656_v16  ;;  %vm1525_vm6 = vcmp.gt.f32.partialorder %v6049_v42, 0.0  ;;  %v4228_v50 = vld [vmem:[%s7265_s5 + $0x60] ss:$8 sps:$4 sm:$0xff]   ;;  %v7659_v35 = vld [vmem:[#allocation33_spill] sm:$0xff] }
 0x309   :  { %2533 = vmatmul.mubr.bf16.vlgmr.msra.gmra.mxu0 %v6361_v32  ;;  %v1651_v28 = vmax.f32 %v1609_v14, %v1611_v24  ;;  %v1652_v22 = vmax.f32 %v1610_v49, %v1612_v36  ;;  %vm1526_vm7 = vcmp.gt.f32.partialorder %v6054_v51, 0.0  ;;  %v7657_v63 = vmov 0   ;;  %v7666_v10 = vld [vmem:[#allocation5_spill] sm:$0xff]  ;;  %v7667_v24 = vld [vmem:[#allocation6_spill] sm:$0xff]  ;;  %v7668_v16 = vld [vmem:[#allocation27_spill] sm:$0xff] }
 0x30a   :  { %1835 = vmatmul.mubr.bf16.vlgmr.msra.gmra.mxu1 %v1701_v20  ;;  %2542 = vmatprep.mubr.bf16.mxu0 %v7657_v63  ;;  %vm1527_vm8 = vcmp.gt.f32.partialorder %v6059_v56, 0.0  ;;  %vm1528_vm9 = vcmp.gt.f32.partialorder %v6064_v57, 0.0  ;;  %vm1529_vm10 = vcmp.gt.f32.partialorder %v6069_v61, 0.0  ;;  %vm1530_vm11 = vcmp.gt.f32.partialorder %v6074_v62, 0.0 }
 0x30b   :  { %1956 = vmatpush1.bf16.msra.mxu1 %v4225_v58  ;;  %1844 = vmatprep.mubr.bf16.mxu1 %v7657_v63  ;;  %v6392_v34 = vmax.f32 %v1651_v28, %v1652_v22  ;;  %vm1531_vm12 = vcmp.gt.f32.partialorder %v6079_v26, 0.0  ;;  %vm1532_vm13 = vcmp.gt.f32.partialorder %v6084_v21, 0.0  ;;  %v1621_v25 = vsel %vm1525_vm6, %v6049_v42, %v6238_v54  ;;  %v7661_v54 = vld [vmem:[#allocation37_spill] sm:$0xff] }
 0x30c   :  { %1957 = vmatprep.subr.bf16.mxu1 %v4230_v41  ;;  %v1622_v0 = vsel %vm1526_vm7, %v6054_v51, %v7658_v30  ;;  %v1623_v29 = vsel %vm1527_vm8, %v6059_v56, %v7659_v35  ;;  %v1624_v3 = vsel %vm1528_vm9, %v6064_v57, %v6250_v33  ;;  %v1625_v58 = vsel %vm1529_vm10, %v6069_v61, %v7660_v55  ;;  %v4231_v57 = vld [vmem:[%s7265_s5 + $0x50] ss:$8 sps:$4 sm:$0xff]   ;;  %v7663_v33 = vld [vmem:[#allocation39_spill] sm:$0xff]  ;;  %v4239_v35 = vld [vmem:[%s7265_s5 + $0x34] ss:$8 sps:$4 sm:$0xff]  }
 0x30d   :  { %v6412_v42 = vpack.c.bf16 %v1673_v6, %v6392_v34  ;;  %v1626_v43 = vsel %vm1530_vm11, %v6074_v62, %v7661_v54  ;;  %v1627_v14 = vsel %vm1531_vm12, %v6079_v26, %v6262_v40  ;;  %v1628_v51 = vsel %vm1532_vm13, %v6084_v21, %v6265_v12  ;;  %v7662_v61 = vld [vmem:[#allocation8_spill] sm:$0xff]  ;;  %v4236_v21 = vld [vmem:[%s7265_s5 + $0x44] ss:$8 sps:$4 sm:$0xff]   ;;  %v7669_v22 = vld [vmem:[#allocation41_spill] sm:$0xff] }
 0x30e   :  { %v1657_v13 = vmax.f32 %v1621_v25, %v1623_v29  ;;  %v1658_v56 = vmax.f32 %v1622_v0, %v1624_v3  ;;  %v1659_v49 = vmax.f32 %v1625_v58, %v1627_v14  ;;  %v1660_v20 = vmax.f32 %v1626_v43, %v1628_v51  ;;  %v7664_v6 = vld [vmem:[#allocation11_spill] sm:$0xff]  ;;  %v7665_v41 = vld [vmem:[#allocation4_spill] sm:$0xff]  ;;  %v7671_v30 = vld [vmem:[#allocation45_spill] sm:$0xff] }
 0x30f   :  { %1958 = vmatpush1.bf16.msra.mxu1 %v4228_v50  ;;  %vm1533_vm14 = vcmp.gt.f32.partialorder %v7662_v61, 0.0  ;;  %vm1534_vm15 = vcmp.gt.f32.partialorder %v6094_v8, 0.0  ;;  %vm1535_vm0 = vcmp.gt.f32.partialorder %v6099_v1, 0.0  ;;  %vm1536_vm1 = vcmp.gt.f32.partialorder %v6104_v31, 0.0  ;;  %v4234_v25 = vld [vmem:[%s7265_s5 + $0x40] ss:$8 sps:$4 sm:$0xff]  }
 0x310   :  { %1959 = vmatprep.subr.bf16.mxu1 %v4233_v38  ;;  %v1675_v62 = vmax.f32 %v1657_v13, %v1658_v56  ;;  %v6427_v26 = vmax.f32 %v1659_v49, %v1660_v20  ;;  %vm1537_vm2 = vcmp.gt.f32.partialorder %v6109_v17, 0.0  ;;  %vm1538_vm3 = vcmp.gt.f32.partialorder %v6114_v18, 0.0  ;;  %v7672_v0 = vld [vmem:[#allocation47_spill] sm:$0xff] }
 0x311   :  { %vm1539_vm4 = vcmp.gt.f32.partialorder %v6119_v46, 0.0  ;;  %vm1540_vm5 = vcmp.gt.f32.partialorder %v6124_v47, 0.0  ;;  %v1629_v40 = vsel %vm1533_vm14, %v7662_v61, %v7663_v33  ;;  %v1630_v12 = vsel %vm1534_vm15, %v6094_v8, %v6274_v53  ;;  %v7670_v8 = vld [vmem:[#allocation43_spill] sm:$0xff]  ;;  %v7677_v61 = vld [vmem:[#allocation17_spill] sm:$0xff] }
 0x312   :  { %vm1501_vm6 = vcmp.gt.f32.partialorder %v7664_v6, 0.0  ;;  %vm1502_vm7 = vcmp.gt.f32.partialorder %v7665_v41, 0.0  ;;  %vm1503_vm8 = vcmp.gt.f32.partialorder %v7666_v10, 0.0  ;;  %vm1504_vm9 = vcmp.gt.f32.partialorder %v7667_v24, 0.0  ;;  %1845 = vmatmul.mubr.bf16.gmra.mxu1 %v6412_v42  ;;  %v4242_v51 = vld [vmem:[%s7265_s5 + $0x24] ss:$8 sps:$4 sm:$0xff]  }
 0x313   :  { %v1596_v36 = vmul.f32 0.01, %v7668_v16  ;;  %v6447_v28 = vpack.c.bf16 %v6427_v26, %v1675_v62  ;;  %v1631_v53 = vsel %vm1535_vm0, %v6099_v1, %v7669_v22  ;;  %v1632_v50 = vsel %vm1536_vm1, %v6104_v31, %v7670_v8  ;;  %1960 = vmatpush1.bf16.msra.mxu1 %v4231_v57  ;;  %1854 = vmatprep.mubr.bf16.mxu1 %v7657_v63  ;;  %v7676_v20 = vld [vmem:[#allocation15_spill] sm:$0xff]  ;;  %v4249_v22 = vld [vmem:[%s7265_s5 + $0x170] ss:$8 sps:$4 sm:$0xff]  }
 0x314   :  { %v1633_v38 = vsel %vm1537_vm2, %v6109_v17, %v6286_v7  ;;  %v1634_v1 = vsel %vm1538_vm3, %v6114_v18, %v7671_v30  ;;  %v1635_v31 = vsel %vm1539_vm4, %v6119_v46, %v7672_v0  ;;  %vm1541_vm10 = vcmp.gt.f32.partialorder %v6129_v27, 0.0  ;;  %1961 = vmatprep.subr.bf16.mxu1 %v4236_v21  ;;  %v7673_v7 = vld [vmem:[#allocation49_spill] sm:$0xff]  ;;  %v4254_v8 = vld [vmem:[%s7265_s5 + $0x164] ss:$8 sps:$4 sm:$0xff]  }
 0x315   :  { %2543 = vmatmul.mubr.bf16.gmra.mxu0 %v6447_v28  ;;  %v1636_v17 = vsel %vm1540_vm5, %v6124_v47, %v7673_v7  ;;  %v1661_v18 = vmax.f32 %v1629_v40, %v1631_v53  ;;  %v1662_v29 = vmax.f32 %v1630_v12, %v1632_v50  ;;  %vm1542_vm11 = vcmp.gt.f32.partialorder %v6138_v19, 0.0  ;;  %v4237_v47 = vld [vmem:[%s7265_s5 + $0x30] ss:$8 sps:$4 sm:$0xff]   ;;  %v4252_v50 = vld [vmem:[%s7265_s5 + $0x160] ss:$8 sps:$4 sm:$0xff]  }
 0x316   :  { %2552 = vmatprep.mubr.bf16.mxu0 %v7657_v63  ;;  %v1663_v46 = vmax.f32 %v1633_v38, %v1635_v31  ;;  %v1664_v3 = vmax.f32 %v1634_v1, %v1636_v17  ;;  %vm1543_vm12 = vcmp.gt.f32.partialorder %v6153_v9, 0.0  ;;  %vm1544_vm13 = vcmp.gt.f32.partialorder %v6169_v11, 0.0  ;;  %v4243_v40 = vld [vmem:[%s7265_s5 + $0x10] ss:$8 sps:$4 sm:$0xff]   ;;  %v4260_v30 = vld [vmem:[%s7265_s5 + $0x144] ss:$8 sps:$4 sm:$0xff]  }
 0x317   :  { %v1677_v55 = vmax.f32 %v1661_v18, %v1662_v29  ;;  %vm1545_vm14 = vcmp.gt.f32.partialorder %v6185_v48, 0.0  ;;  %vm1546_vm15 = vcmp.gt.f32.partialorder %v6200_v45, 0.0  ;;  %vm1547_vm0 = vcmp.gt.f32.partialorder %v7654_v60, 0.0  ;;  %1962 = vmatpush1.bf16.msra.mxu1 %v4234_v25  ;;  %v4257_v25 = vld [vmem:[%s7265_s5 + $0x154] ss:$8 sps:$4 sm:$0xff]  }
 0x318   :  { %v6492_v58 = vmax.f32 %v1663_v46, %v1664_v3  ;;  %vm1548_vm1 = vcmp.gt.f32.partialorder %v7668_v16, 0.0  ;;  %v1637_v54 = vsel %vm1541_vm10, %v6129_v27, %v6304_v37  ;;  %v1638_v43 = vsel %vm1542_vm11, %v6138_v19, %v6310_v59  ;;  %1963 = vmatprep.subr.bf16.mxu1 %v4239_v35  ;;  %v4258_v1 = vld [vmem:[%s7265_s5 + $0x140] ss:$8 sps:$4 sm:$0xff]   ;;  %v4263_v0 = vld [vmem:[%s7265_s5 + $0x134] ss:$8 sps:$4 sm:$0xff]  }
 0x319   :  { %v6502_v14 = vpack.c.bf16 %v1675_v62, %v6348_v15  ;;  %v1639_v13 = vsel %vm1543_vm12, %v6153_v9, %v6313_v52  ;;  %v1640_v56 = vsel %vm1544_vm13, %v6169_v11, %v6316_v23  ;;  %v1641_v27 = vsel %vm1545_vm14, %v6185_v48, %v6337_v2  ;;  %v4240_v48 = vld [vmem:[%s7265_s5 + $0x20] ss:$8 sps:$4 sm:$0xff]   ;;  %v7674_v2 = vld [vmem:[#allocation9_spill] sm:$0xff]  ;;  %v4272_v17 = vld [vmem:[%s7265_s5 + $0x104] ss:$8 sps:$4 sm:$0xff]  }
 0x31a   :  { %v6514_v37 = vpack.c.bf16 %v6492_v58, %v1677_v55  ;;  %v1642_v19 = vsel %vm1546_vm15, %v6200_v45, %v6346_v39  ;;  %v1643_v59 = vsel %vm1547_vm0, %v7654_v60, %v6369_v44  ;;  %v1644_v15 = vsel %vm1548_vm1, %v7668_v16, %v1596_v36  ;;  %v4245_v45 = vld [vmem:[%s7265_s5 + $0x14] ss:$8 sps:$4 sm:$0xff]   ;;  %v7675_v60 = vld [vmem:[#allocation10_spill] sm:$0xff]  ;;  %v4267_v7 = vld [vmem:[%s7265_s5 + $0x110] ss:$8 sps:$4 sm:$0xff]  }
 0x31b   :  { %1855 = vmatmul.mubr.bf16.gmra.mxu1 %v6502_v14  ;;  %v1665_v9 = vmax.f32 %v1637_v54, %v1639_v13  ;;  %v1666_v52 = vmax.f32 %v1638_v43, %v1640_v56  ;;  %v1667_v49 = vmax.f32 %v1641_v27, %v1643_v59  ;;  %v1668_v11 = vmax.f32 %v1642_v19, %v1644_v15  ;;  %v4246_v16 = vld [vmem:[%s7265_s5] ss:$8 sps:$4 sm:$0xff]   ;;  %v4269_v35 = vld [vmem:[%s7265_s5 + $0x114] ss:$8 sps:$4 sm:$0xff]   ;;  %v4273_v46 = vld [vmem:[%s7265_s5 + $0x1f0] ss:$8 sps:$4 sm:$0xff]  }
 0x31c   :  { %1964 = vmatpush1.bf16.msra.mxu1 %v4237_v47  ;;  %1864 = vmatprep.mubr.bf16.mxu1 %v7657_v63  ;;  %v1597_v39 = vsel %vm1501_vm6, %v7664_v6, %v7674_v2  ;;  %v1598_v44 = vsel %vm1502_vm7, %v7665_v41, %v7675_v60  ;;  %v1599_v57 = vsel %vm1503_vm8, %v7666_v10, %v7676_v20  ;;  %v4248_v10 = vld [vmem:[%s7265_s5 + $0x4] ss:$8 sps:$4 sm:$0xff]   ;;  %v4264_v31 = vld [vmem:[%s7265_s5 + $0x120] ss:$8 sps:$4 sm:$0xff]   ;;  %v4275_v29 = vld [vmem:[%s7265_s5 + $0x1f4] ss:$8 sps:$4 sm:$0xff]  }
 0x31d   :  { %2553 = vmatmul.mubr.bf16.gmra.mxu0 %v6514_v37  ;;  %1965 = vmatprep.subr.bf16.mxu1 %v4242_v51  ;;  %v6530_v23 = vmax.f32 %v1665_v9, %v1666_v52  ;;  %v1600_v62 = vsel %vm1504_vm9, %v7667_v24, %v7677_v61  ;;  %v1680_v21 = vmax.f32 %v1667_v49, %v1668_v11  ;;  %v4270_v18 = vld [vmem:[%s7265_s5 + $0x100] ss:$8 sps:$4 sm:$0xff]   ;;  %v4278_v3 = vld [vmem:[%s7265_s5 + $0x1e4] ss:$8 sps:$4 sm:$0xff]   ;;  %v4281_v47 = vld [vmem:[%s7265_s5 + $0x1d4] ss:$8 sps:$4 sm:$0xff]  }
 0x31e   :  { %2562 = vmatprep.mubr.bf16.mxu0 %v7657_v63  ;;  %v1645_v12 = vmax.f32 %v1597_v39, %v1599_v57  ;;  %v1646_v6 = vmax.f32 %v1598_v44, %v1600_v62  ;;  %v6555_v41 = vpack.c.bf16 %v1677_v55, %v6427_v26  ;;  %v4251_v26 = vld [vmem:[%s7265_s5 + $0x174] ss:$8 sps:$4 sm:$0xff]   ;;  %v1682_v38 = vpack.c.bf16 %v6392_v34, %v6353_v4  ;;  %v4261_v4 = vld [vmem:[%s7265_s5 + $0x130] ss:$8 sps:$4 sm:$0xff]   ;;  %v4266_v34 = vld [vmem:[%s7265_s5 + $0x124] ss:$8 sps:$4 sm:$0xff]  }
 0x31f   :  { %v2215_v33 = vpack.c.bf16 %v6530_v23, %v6492_v58  ;;  %v2402_v24 = vpack.c.bf16 %v1680_v21, %v6530_v23  ;;  %v4276_v55 = vld [vmem:[%s7265_s5 + $0x1e0] ss:$8 sps:$4 sm:$0xff]   ;;  %v4279_v54 = vld [vmem:[%s7265_s5 + $0x1d0] ss:$8 sps:$4 sm:$0xff]   ;;  %v4284_v43 = vld [vmem:[%s7265_s5 + $0x1c4] ss:$8 sps:$4 sm:$0xff]  }
 0x320   :  { %1966 = vmatpush1.bf16.msra.mxu1 %v4240_v48  ;;  %v1669_v36 = vmax.f32 %v1645_v12, %v1646_v6  ;;  %v4282_v51 = vld [vmem:[%s7265_s5 + $0x1c0] ss:$8 sps:$4 sm:$0xff]   ;;  %v4287_v13 = vld [vmem:[%s7265_s5 + $0x1b4] ss:$8 sps:$4 sm:$0xff]   ;;  %v4285_v56 = vld [vmem:[%s7265_s5 + $0x1b0] ss:$8 sps:$4 sm:$0xff]  }
 0x321   :  { %1967 = vmatprep.subr.bf16.mxu1 %v4245_v45  ;;  %v4288_v27 = vld [vmem:[%s7265_s5 + $0x1a0] ss:$8 sps:$4 sm:$0xff]   ;;  %v4293_v19 = vld [vmem:[%s7265_s5 + $0x194] ss:$8 sps:$4 sm:$0xff]   ;;  %v4291_v59 = vld [vmem:[%s7265_s5 + $0x190] ss:$8 sps:$4 sm:$0xff]  }
 0x322   :  { %v1681_v53 = vpack.c.bf16 %v6351_v5, %v1669_v36  ;;  %v4255_v5 = vld [vmem:[%s7265_s5 + $0x150] ss:$8 sps:$4 sm:$0xff]   ;;  %v4294_v15 = vld [vmem:[%s7265_s5 + $0x180] ss:$8 sps:$4 sm:$0xff]   ;;  %vm4355_vm2 = vmmov 0  }
 0x323   :  { %1865 = vmatmul.mubr.bf16.gmra.mxu1 %v6555_v41 }
 0x324   :  { %1968 = vmatpush1.bf16.msra.mxu1 %v4243_v40  ;;  %1987 = vmatprep.mubr.bf16.mxu1 %v7657_v63 }
 0x325   :  { %2563 = vmatmul.mubr.bf16.gmra.mxu0 %v2402_v24  ;;  %1969 = vmatprep.subr.bf16.mxu1 %v4248_v10 }
 0x328   :  { %1970 = vmatpush1.bf16.msra.mxu1 %v4246_v16 }
 0x329   :  { %2126 = vmatprep.subr.bf16.mxu1 %v4251_v26 }
 0x32b   :  { %1988 = vmatmul.mubr.bf16.vlgmr.msra.gmra.mxu1 %v1681_v53 }
 0x32c   :  { %2127 = vmatpush1.bf16.msra.mxu1 %v4249_v22  ;;  %1997 = vmatprep.mubr.bf16.mxu1 %v7657_v63 }
 0x32d   :  { %2128 = vmatprep.subr.bf16.mxu1 %v4254_v8 }
 0x330   :  { %2129 = vmatpush1.bf16.msra.mxu1 %v4252_v50 }
 0x331   :  { %2130 = vmatprep.subr.bf16.mxu1 %v4257_v25 }
 0x333   :  { %1998 = vmatmul.mubr.bf16.gmra.mxu1 %v1682_v38 }
 0x334   :  { %2131 = vmatpush1.bf16.msra.mxu1 %v4255_v5  ;;  %2007 = vmatprep.mubr.bf16.mxu1 %v7657_v63 }
 0x335   :  { %2132 = vmatprep.subr.bf16.mxu1 %v4260_v30 }
 0x338   :  { %2133 = vmatpush1.bf16.msra.mxu1 %v4258_v1 }
 0x339   :  { %2134 = vmatprep.subr.bf16.mxu1 %v4263_v0 }
 0x33b   :  { %2008 = vmatmul.mubr.bf16.gmra.mxu1 %v6361_v32 }
 0x33c   :  { %2135 = vmatpush1.bf16.msra.mxu1 %v4261_v4  ;;  %2017 = vmatprep.mubr.bf16.mxu1 %v7657_v63 }
 0x33d   :  { %2136 = vmatprep.subr.bf16.mxu1 %v4266_v34 }
 0x340   :  { %2137 = vmatpush1.bf16.msra.mxu1 %v4264_v31 }
 0x341   :  { %2138 = vmatprep.subr.bf16.mxu1 %v4269_v35 }
 0x343   :  { %2018 = vmatmul.mubr.bf16.gmra.mxu1 %v6447_v28 }
 0x344   :  { %2139 = vmatpush1.bf16.msra.mxu1 %v4267_v7  ;;  %2158 = vmatprep.mubr.bf16.mxu1 %v7657_v63 }
 0x345   :  { %2140 = vmatprep.subr.bf16.mxu1 %v4272_v17 }
 0x348   :  { %2141 = vmatpush1.bf16.msra.mxu1 %v4270_v18 }
 0x349   :  { %2313 = vmatprep.subr.bf16.mxu1 %v4275_v29 }
 0x34b   :  { %2159 = vmatmul.mubr.bf16.vlgmr.msra.gmra.mxu1 %v1682_v38 }
 0x34c   :  { %2314 = vmatpush1.bf16.msra.mxu1 %v4273_v46  ;;  %2168 = vmatprep.mubr.bf16.mxu1 %v7657_v63 }
 0x34d   :  { %2315 = vmatprep.subr.bf16.mxu1 %v4278_v3 }
 0x350   :  { %2316 = vmatpush1.bf16.msra.mxu1 %v4276_v55 }
 0x351   :  { %2317 = vmatprep.subr.bf16.mxu1 %v4281_v47 }
 0x353   :  { %2169 = vmatmul.mubr.bf16.gmra.mxu1 %v6361_v32  ;;  %v4290_v32 = vld [vmem:[%s7265_s5 + $0x1a4] ss:$8 sps:$4 sm:$0xff]  }
 0x354   :  { %2318 = vmatpush1.bf16.msra.mxu1 %v4279_v54  ;;  %2178 = vmatprep.mubr.bf16.mxu1 %v7657_v63 }
 0x355   :  { %2319 = vmatprep.subr.bf16.mxu1 %v4284_v43 }
 0x358   :  { %2320 = vmatpush1.bf16.msra.mxu1 %v4282_v51 }
 0x359   :  { %2321 = vmatprep.subr.bf16.mxu1 %v4287_v13 }
 0x35b   :  { %2179 = vmatmul.mubr.bf16.gmra.mxu1 %v6447_v28  ;;  %v4296_v28 = vld [vmem:[%s7265_s5 + $0x184] ss:$8 sps:$4 sm:$0xff]  }
 0x35c   :  { %2322 = vmatpush1.bf16.msra.mxu1 %v4285_v56  ;;  %2188 = vmatprep.mubr.bf16.mxu1 %v7657_v63 }
 0x35d   :  { %2323 = vmatprep.subr.bf16.mxu1 %v4290_v32  ;;  %v2589_v32 = vld [vmem:[%s7268_s6] sm:$0x3] }
 0x360   :  { %2324 = vmatpush1.bf16.msra.mxu1 %v4288_v27 }
 0x361   :  { %2325 = vmatprep.subr.bf16.mxu1 %v4293_v19 }
 0x363   :  { %2189 = vmatmul.mubr.bf16.gmra.mxu1 %v6514_v37 }
 0x364   :  { %2326 = vmatpush1.bf16.msra.mxu1 %v4291_v59  ;;  %2345 = vmatprep.mubr.bf16.mxu1 %v7657_v63 }
 0x365   :  { %2327 = vmatprep.subr.bf16.mxu1 %v4296_v28 }
 0x368   :  { %2328 = vmatpush1.bf16.msra.mxu1 %v4294_v15 }
 0x36b   :  { %2346 = vmatmul.mubr.bf16.vlgmr.msra.gmra.mxu1 %v6412_v42 }
 0x36c   :  { %2355 = vmatprep.mubr.bf16.mxu1 %v7657_v63 }
 0x373   :  { %2356 = vmatmul.mubr.bf16.gmra.mxu1 %v6502_v14 }
 0x374   :  { %2365 = vmatprep.mubr.bf16.mxu1 %v7657_v63 }
 0x37b   :  { %2366 = vmatmul.mubr.bf16.gmra.mxu1 %v6555_v41 }
 0x37c   :  { %2375 = vmatprep.mubr.bf16.mxu1 %v7657_v63 }
 0x383   :  { %2376 = vmatmul.mubr.bf16.gmra.mxu1 %v2215_v33 }
 0x3c9   :  { %v2534_v50 = vpop.f32.mrf.mxu0 }
 0x3ca   :  { %v1836_v37 = vpop.f32.mrf.mxu1 }
 0x3cb   :  { %v2536_v38 = vpop.f32.mrf.mxu0 }
 0x3cc   :  { %v1838_v9 = vpop.f32.mrf.mxu1 }
 0x3cd   :  { %v2538_v0 = vpop.f32.mrf.mxu0 }
 0x3ce   :  { %v1840_v52 = vpop.f32.mrf.mxu1 }
 0x3cf   :  { %v2540_v31 = vpop.f32.mrf.mxu0 }
 0x3d0   :  { %v6687_v49 = vpop.f32.mrf.mxu1 }
 0x3d2   :  { %v6689_v42 = vpop.f32.mrf.mxu1 }
 0x3d4   :  { %v6691_v11 = vpop.f32.mrf.mxu1 }
 0x3d5   :  { %v2544_v17 = vpop.f32.mrf.mxu0 }
 0x3d6   :  { %v6693_v14 = vpop.f32.mrf.mxu1 }
 0x3d7   :  { %v2546_v46 = vpop.f32.mrf.mxu0 }
 0x3d8   :  { %v6695_v48 = vpop.f32.mrf.mxu1 }
 0x3d9   :  { %v2548_v47 = vpop.f32.mrf.mxu0 }
 0x3db   :  { %v6697_v45 = vpop.f32.mrf.mxu1  ;;  %v2550_v27 = vpop.f32.mrf.mxu0 }
 0x3dd   :  { %v6699_v63 = vpop.f32.mrf.mxu1 }
 0x3df   :  { %v6701_v2 = vpop.f32.mrf.mxu1 }
 0x3e1   :  { %v6703_v58 = vpop.f32.mrf.mxu1 }
 0x3e3   :  { %v6705_v23 = vpop.f32.mrf.mxu1 }
 0x3e5   :  { %v6707_v39 = vpop.f32.mrf.mxu1 }
 0x3e7   :  { %v6709_v60 = vpop.f32.mrf.mxu1 }
 0x3e8   :  { %7678 = vst [vmem:[#allocation51_spill] sm:$0xff] %v6709_v60 }
 0x3e9   :  { %v6711_v44 = vpop.f32.mrf.mxu1 }
 0x3ea   :  { %7679 = vst [vmem:[#allocation53_spill] sm:$0xff] %v6711_v44  ;;  %v7685_v44 = vld [vmem:[#allocation2_spill] sm:$0xff] }
 0x3eb   :  { %v1989_v20 = vpop.f32.mrf.mxu1 }
 0x3ec   :  { %v1990_v43 = vadd.f32 %v1989_v20, %v1836_v37 }
 0x3ed   :  { %v1991_v57 = vpop.f32.mrf.mxu1 }
 0x3ee   :  { %v1992_v13 = vadd.f32 %v1991_v57, %v1838_v9 }
 0x3ef   :  { %v1993_v61 = vpop.f32.mrf.mxu1 }
 0x3f0   :  { %v1994_v59 = vadd.f32 %v1993_v61, %v1840_v52 }
 0x3f1   :  { %v1995_v62 = vpop.f32.mrf.mxu1 }
 0x3f2   :  { %v1996_v37 = vadd.f32 %v1995_v62, %v6687_v49 }
 0x3f3   :  { %v1999_v21 = vpop.f32.mrf.mxu1 }
 0x3f5   :  { %v2001_v33 = vpop.f32.mrf.mxu1 }
 0x3f7   :  { %v6713_v40 = vpop.f32.mrf.mxu1 }
 0x3f9   :  { %v6715_v12 = vpop.f32.mrf.mxu1 }
 0x3fb   :  { %v6717_v6 = vpop.f32.mrf.mxu1 }
 0x3fd   :  { %v6719_v41 = vpop.f32.mrf.mxu1 }
 0x3ff   :  { %v6721_v10 = vpop.f32.mrf.mxu1 }
 0x401   :  { %v6723_v24 = vpop.f32.mrf.mxu1 }
 0x403   :  { %v6725_v16 = vpop.f32.mrf.mxu1 }
 0x405   :  { %v6727_v36 = vpop.f32.mrf.mxu1 }
 0x407   :  { %v6729_v26 = vpop.f32.mrf.mxu1 }
 0x408   :  { %7680 = vst [vmem:[#allocation55_spill] sm:$0xff] %v6729_v26  ;;  %v7686_v26 = vld [vmem:[#allocation3_spill] sm:$0xff] }
 0x409   :  { %v6731_v22 = vpop.f32.mrf.mxu1 }
 0x40a   :  { %7681 = vst [vmem:[#allocation12_spill] sm:$0xff] %v6731_v22 }
 0x40b   :  { %v2160_v53 = vpop.f32.mrf.mxu1 }
 0x40c   :  { %v2199_v56 = vadd.f32 %v2160_v53, %v1990_v43  ;;  %v2554_v53 = vpop.f32.mrf.mxu0  ;;  %v2000_v43 = vadd.f32 %v1999_v21, %v6689_v42  ;;  %v2004_v42 = vadd.f32 %v6713_v40, %v6693_v14 }
 0x40d   :  { %v2162_v8 = vpop.f32.mrf.mxu1 }
 0x40e   :  { %v2200_v28 = vadd.f32 %v2162_v8, %v1992_v13  ;;  %v2002_v8 = vadd.f32 %v2001_v33, %v6691_v11  ;;  %v2556_v62 = vpop.f32.mrf.mxu0 }
 0x40f   :  { %v2164_v25 = vpop.f32.mrf.mxu1 }
 0x410   :  { %v2201_v9 = vadd.f32 %v2164_v25, %v1994_v59  ;;  %v2558_v40 = vpop.f32.mrf.mxu0 }
 0x411   :  { %v2166_v5 = vpop.f32.mrf.mxu1 }
 0x412   :  { %v2202_v60 = vadd.f32 %v2166_v5, %v1996_v37 }
 0x413   :  { %v2170_v30 = vpop.f32.mrf.mxu1 }
 0x414   :  { %v2203_v13 = vadd.f32 %v2170_v30, %v2000_v43 }
 0x415   :  { %v2172_v1 = vpop.f32.mrf.mxu1 }
 0x417   :  { %v2174_v4 = vpop.f32.mrf.mxu1 }
 0x418   :  { %v2205_v33 = vadd.f32 %v2174_v4, %v2004_v42 }
 0x419   :  { %v2176_v34 = vpop.f32.mrf.mxu1 }
 0x41b   :  { %v6733_v35 = vpop.f32.mrf.mxu1 }
 0x41d   :  { %v6735_v7 = vpop.f32.mrf.mxu1 }
 0x41f   :  { %v6737_v18 = vpop.f32.mrf.mxu1 }
 0x421   :  { %v6739_v29 = vpop.f32.mrf.mxu1 }
 0x423   :  { %v6741_v3 = vpop.f32.mrf.mxu1 }
 0x425   :  { %v6743_v55 = vpop.f32.mrf.mxu1 }
 0x426   :  { %7682 = vst [vmem:[#allocation13_spill] sm:$0xff] %v6743_v55  ;;  %v6753_v55 = vrot.slane %v2589_v32, %v7685_v44 }
 0x427   :  { %v6745_v54 = vpop.f32.mrf.mxu1 }
 0x428   :  { %7683 = vst [vmem:[#allocation14_spill] sm:$0xff] %v6745_v54  ;;  %v6756_v54 = vrot.slane %v2589_v32, %v7686_v26 }
 0x429   :  { %v6747_v51 = vpop.f32.mrf.mxu1 }
 0x42a   :  { %7684 = vst [vmem:[#allocation16_spill] sm:$0xff] %v6747_v51 }
 0x42b   :  { %v2347_v19 = vpop.f32.mrf.mxu1 }
 0x42c   :  { %v2386_v15 = vadd.f32 %v2347_v19, %v2199_v56 }
 0x42d   :  { %v2349_v22 = vpop.f32.mrf.mxu1 }
 0x42e   :  { %v2573_v20 = vadd.f32 %v2534_v50, %v2386_v15  ;;  %v2387_v57 = vadd.f32 %v2349_v22, %v2200_v28  ;;  %v2204_v22 = vadd.f32 %v2172_v1, %v2002_v8 }
 0x42f   :  { %v2351_v51 = vpop.f32.mrf.mxu1 }
 0x430   :  { %v2574_v52 = vadd.f32 %v2536_v38, %v2387_v57  ;;  %v2388_v61 = vadd.f32 %v2351_v51, %v2201_v9  ;;  %v6762_v32 = vadd.f32 %v6753_v55, %v2573_v20 }
 0x431   :  { %v2353_v56 = vpop.f32.mrf.mxu1 }
 0x432   :  { %v2575_v19 = vadd.f32 %v2538_v0, %v2388_v61  ;;  %v2389_v44 = vadd.f32 %v2353_v56, %v2202_v60  ;;  %v6765_v49 = vadd.f32 %v6756_v54, %v2574_v52  ;;  %v2006_v60 = vadd.f32 %v6715_v12, %v6695_v48 }
 0x433   :  { %v2357_v21 = vpop.f32.mrf.mxu1  ;;  %v2012_v12 = vadd.f32 %v6719_v41, %v6699_v63 }
 0x434   :  { %v2576_v50 = vadd.f32 %v2540_v31, %v2389_v44  ;;  %v2390_v25 = vadd.f32 %v2357_v21, %v2203_v13  ;;  %v2617_v11 = vadd.f32 %v6765_v49, %v6762_v32  ;;  %v6774_v0 = vadd.f32 %v6753_v55, %v2575_v19 }
 0x435   :  { %v2359_v5 = vpop.f32.mrf.mxu1  ;;  %v2010_v44 = vadd.f32 %v6717_v6, %v6697_v45  ;;  %v2206_v31 = vadd.f32 %v2176_v34, %v2006_v60  ;;  %v2560_v6 = vpop.f32.mrf.mxu0  ;;  %v2014_v34 = vadd.f32 %v6721_v10, %v6701_v2  ;;  %v2208_v9 = vadd.f32 %v6735_v7, %v2012_v12  ;;  %v7690_v60 = vld [vmem:[#allocation53_spill] sm:$0xff]  ;;  %v7693_v12 = vld [vmem:[#allocation16_spill] sm:$0xff] }
 0x436   :  { %v2577_v38 = vadd.f32 %v2544_v17, %v2390_v25  ;;  %v2391_v30 = vadd.f32 %v2359_v5, %v2204_v22  ;;  %2618 = vadd.xlane.f32.xlu0 %v2617_v11  ;;  %v6777_v14 = vadd.f32 %v6756_v54, %v2576_v50  ;;  %v2020_v7 = vadd.f32 %v6725_v16, %v6705_v23  ;;  %v7689_v25 = vld [vmem:[#allocation13_spill] sm:$0xff] }
 0x437   :  { %v2361_v1 = vpop.f32.mrf.mxu1  ;;  %v2207_v4 = vadd.f32 %v6733_v35, %v2010_v44  ;;  %v2209_v20 = vadd.f32 %v6737_v18, %v2014_v34  ;;  %v2564_v10 = vpop.f32.mrf.mxu0 }
 0x438   :  { %v2578_v51 = vadd.f32 %v2546_v46, %v2391_v30  ;;  %v2392_v59 = vadd.f32 %v2361_v1, %v2205_v33  ;;  %v2620_v48 = vadd.f32 %v6777_v14, %v6774_v0  ;;  %v6787_v37 = vadd.f32 %v6753_v55, %v2577_v38  ;;  %v7691_v33 = vld [vmem:[#allocation12_spill] sm:$0xff]  ;;  %v7692_v38 = vld [vmem:[#allocation14_spill] sm:$0xff] }
 0x439   :  { %v2363_v17 = vpop.f32.mrf.mxu1  ;;  %v2211_v13 = vadd.f32 %v6741_v3, %v2020_v7  ;;  %v2566_v16 = vpop.f32.mrf.mxu0  ;;  %v2026_v5 = vadd.f32 %v7691_v33, %v7690_v60 }
 0x43a   :  { %v2579_v28 = vadd.f32 %v2548_v47, %v2392_v59  ;;  %v2393_v15 = vadd.f32 %v2363_v17, %v2206_v31  ;;  %2621 = vadd.xlane.f32.xlu1 %v2620_v48  ;;  %v6790_v45 = vadd.f32 %v6756_v54, %v2578_v51  ;;  %v2016_v47 = vadd.f32 %v6723_v24, %v6703_v58 }
 0x43b   :  { %v2367_v46 = vpop.f32.mrf.mxu1  ;;  %v2568_v59 = vpop.f32.mrf.mxu0 }
 0x43c   :  { %v2580_v63 = vadd.f32 %v2550_v27, %v2393_v15  ;;  %v2394_v41 = vadd.f32 %v2367_v46, %v2207_v4  ;;  %v2623_v35 = vadd.f32 %v6790_v45, %v6787_v37  ;;  %v6801_v61 = vadd.f32 %v6753_v55, %v2579_v28 }
 0x43d   :  { %v2369_v57 = vpop.f32.mrf.mxu1  ;;  %v2210_v8 = vadd.f32 %v6739_v29, %v2016_v47  ;;  %v7687_v29 = vld [vmem:[#allocation51_spill] sm:$0xff]  ;;  %v2214_v4 = vadd.f32 %v7693_v12, %v2026_v5 }
 0x43e   :  { %v2581_v43 = vadd.f32 %v2554_v53, %v2394_v41  ;;  %v2395_v52 = vadd.f32 %v2369_v57, %v2208_v9  ;;  %2624 = vadd.xlane.f32.xlu0 %v2623_v35  ;;  %v6804_v2 = vadd.f32 %v6756_v54, %v2580_v63  ;;  %v2022_v53 = vadd.f32 %v6727_v36, %v6707_v39  ;;  %v2570_v41 = vpop.f32.mrf.mxu0 }
 0x43f   :  { %v2371_v27 = vpop.f32.mrf.mxu1 }
 0x440   :  { %v2582_v58 = vadd.f32 %v2556_v62, %v2395_v52  ;;  %v2396_v24 = vadd.f32 %v2371_v27, %v2209_v20  ;;  %v2626_v18 = vadd.f32 %v6804_v2, %v6801_v61  ;;  %v6815_v21 = vadd.f32 %v6753_v55, %v2581_v43  ;;  %v7688_v62 = vld [vmem:[#allocation55_spill] sm:$0xff] }
 0x441   :  { %v2373_v56 = vpop.f32.mrf.mxu1  ;;  %v2024_v22 = vadd.f32 %v7688_v62, %v7687_v29  ;;  %v2212_v11 = vadd.f32 %v7689_v25, %v2022_v53 }
 0x442   :  { %v2583_v19 = vadd.f32 %v2558_v40, %v2396_v24  ;;  %v2397_v42 = vadd.f32 %v2373_v56, %v2210_v8  ;;  %2627 = vadd.xlane.f32.xlu1 %v2626_v18  ;;  %v6818_v23 = vadd.f32 %v6756_v54, %v2582_v58 }
 0x443   :  { %v2377_v50 = vpop.f32.mrf.mxu1  ;;  %v2213_v30 = vadd.f32 %v7692_v38, %v2024_v22 }
 0x444   :  { %v2584_v39 = vadd.f32 %v2560_v6, %v2397_v42  ;;  %v2398_v36 = vadd.f32 %v2377_v50, %v2211_v13  ;;  %v2629_v3 = vadd.f32 %v6818_v23, %v6815_v21  ;;  %v2611_v31 = vadd.f32 %v6753_v55, %v2583_v19 }
 0x445   :  { %v2379_v40 = vpop.f32.mrf.mxu1 }
 0x446   :  { %v2585_v44 = vadd.f32 %v2564_v10, %v2398_v36  ;;  %v2399_v1 = vadd.f32 %v2379_v40, %v2212_v11  ;;  %2630 = vadd.xlane.f32.xlu0 %v2629_v3  ;;  %v2612_v51 = vadd.f32 %v6756_v54, %v2584_v39 }
 0x447   :  { %v2381_v48 = vpop.f32.mrf.mxu1 }
 0x448   :  { %v2586_v17 = vadd.f32 %v2566_v16, %v2399_v1  ;;  %v2400_v28 = vadd.f32 %v2381_v48, %v2213_v30  ;;  %v2632_v15 = vadd.f32 %v2612_v51, %v2611_v31  ;;  %v2613_v9 = vadd.f32 %v6753_v55, %v2585_v44 }
 0x449   :  { %v2383_v6 = vpop.f32.mrf.mxu1 }
 0x44a   :  { %v2587_v34 = vadd.f32 %v2568_v59, %v2400_v28  ;;  %v2401_v46 = vadd.f32 %v2383_v6, %v2214_v4  ;;  %2633 = vadd.xlane.f32.xlu1 %v2632_v15  ;;  %v2614_v63 = vadd.f32 %v6756_v54, %v2586_v17 }
 0x44c   :  { %v2588_v35 = vadd.f32 %v2570_v41, %v2401_v46  ;;  %v2635_v47 = vadd.f32 %v2614_v63, %v2613_v9  ;;  %v2615_v20 = vadd.f32 %v6753_v55, %v2587_v34  ;;  %v4297_v41 = vld [vmem:[%s7269_s9 + $0x38] sm:$0xff]  }
 0x44e   :  { %2636 = vadd.xlane.f32.xlu0 %v2635_v47  ;;  %v2616_v57 = vadd.f32 %v6756_v54, %v2588_v35  ;;  %v4298_v35 = vld [vmem:[%s7269_s9 + $0x78] sm:$0xff]   ;;  %v4299_v47 = vld [vmem:[%s7269_s9 + $0x30] sm:$0xff]  }
 0x450   :  { %v2638_v43 = vadd.f32 %v2616_v57, %v2615_v20 }
 0x452   :  { %2639 = vadd.xlane.f32.xlu1 %v2638_v43  ;;  %v4302_v43 = vld [vmem:[%s7269_s9 + $0x68] sm:$0xff]  }
 0x4bf   :  { %v2619_v52 = vpop.xlane.xlu0 %2618 }
 0x4c3   :  { %v2622_v10 = vpop.xlane.xlu1 %2621 }
 0x4c4   :  { %v2641_v27 = vadd.f32 %v2622_v10, %v2619_v52  ;;  %v4303_v52 = vld [vmem:[%s7269_s9 + $0x20] sm:$0xff]  }
 0x4c5   :  { %v4304_v10 = vld [vmem:[%s7269_s9 + $0x60] sm:$0xff]  }
 0x4c7   :  { %v2625_v7 = vpop.xlane.xlu0 %2624 }
 0x4c8   :  { %v2642_v58 = vadd.f32 %v2641_v27, %v2625_v7  ;;  %v4305_v7 = vld [vmem:[%s7269_s9 + $0x18] sm:$0xff]  }
 0x4c9   :  { %v4306_v27 = vld [vmem:[%s7269_s9 + $0x58] sm:$0xff]  }
 0x4cb   :  { %v2628_v8 = vpop.xlane.xlu1 %2627 }
 0x4cc   :  { %v2643_v18 = vadd.f32 %v2642_v58, %v2628_v8  ;;  %v4307_v8 = vld [vmem:[%s7269_s9 + $0x10] sm:$0xff]  }
 0x4cd   :  { %v4308_v58 = vld [vmem:[%s7269_s9 + $0x50] sm:$0xff]  }
 0x4cf   :  { %v2631_v24 = vpop.xlane.xlu0 %2630 }
 0x4d0   :  { %v2644_v13 = vadd.f32 %v2643_v18, %v2631_v24  ;;  %v4309_v24 = vld [vmem:[%s7269_s9 + $0x8] sm:$0xff]  }
 0x4d1   :  { %v4310_v18 = vld [vmem:[%s7269_s9 + $0x48] sm:$0xff]  }
 0x4d3   :  { %v2634_v53 = vpop.xlane.xlu1 %2633 }
 0x4d4   :  { %v2645_v19 = vadd.f32 %v2644_v13, %v2634_v53  ;;  %v4311_v53 = vld [vmem:[%s7269_s9] sm:$0xff]  }
 0x4d5   :  { %v4312_v13 = vld [vmem:[%s7269_s9 + $0x40] sm:$0xff]  }
 0x4d7   :  { %v2637_v56 = vpop.xlane.xlu0 %2636 }
 0x4d8   :  { %v2646_v42 = vadd.f32 %v2645_v19, %v2637_v56 }
 0x4db   :  { %v2640_v16 = vpop.xlane.xlu1 %2639 }
 0x4dc   :  { %v2647_v29 = vadd.f32 %v2646_v42, %v2640_v16 }
 0x4de   :  { %v6835_v55 = vmul.f32 0.0009765625, %v2647_v29 }
 0x4e0   :  { %v6839_v54 = vsub.f32 %v6774_v0, %v6835_v55  ;;  %v6843_v62 = vsub.f32 %v6777_v14, %v6835_v55  ;;  %v6847_v22 = vsub.f32 %v6762_v32, %v6835_v55  ;;  %v6851_v50 = vsub.f32 %v6765_v49, %v6835_v55 }
 0x4e1   :  { %v6855_v25 = vsub.f32 %v6801_v61, %v6835_v55  ;;  %v6859_v0 = vsub.f32 %v6804_v2, %v6835_v55  ;;  %v6863_v14 = vsub.f32 %v6787_v37, %v6835_v55  ;;  %v6867_v32 = vsub.f32 %v6790_v45, %v6835_v55 }
 0x4e2   :  { %v2668_v49 = vmul.f32 %v6839_v54, %v6839_v54  ;;  %v2669_v11 = vmul.f32 %v6843_v62, %v6843_v62  ;;  %v2666_v61 = vmul.f32 %v6847_v22, %v6847_v22  ;;  %v2667_v2 = vmul.f32 %v6851_v50, %v6851_v50 }
 0x4e3   :  { %v2672_v37 = vmul.f32 %v6855_v25, %v6855_v25  ;;  %v2673_v39 = vmul.f32 %v6859_v0, %v6859_v0  ;;  %v2670_v45 = vmul.f32 %v6863_v14, %v6863_v14  ;;  %v2671_v36 = vmul.f32 %v6867_v32, %v6867_v32 }
 0x4e4   :  { %v2685_v3 = vadd.f32 %v2669_v11, %v2668_v49  ;;  %v2682_v60 = vadd.f32 %v2667_v2, %v2666_v61  ;;  %v6886_v33 = vsub.f32 %v2611_v31, %v6835_v55  ;;  %v6889_v5 = vsub.f32 %v2612_v51, %v6835_v55 }
 0x4e5   :  { %v6893_v38 = vsub.f32 %v6815_v21, %v6835_v55  ;;  %v6897_v30 = vsub.f32 %v6818_v23, %v6835_v55  ;;  %v2691_v40 = vadd.f32 %v2673_v39, %v2672_v37  ;;  %v2688_v44 = vadd.f32 %v2671_v36, %v2670_v45 }
 0x4e6   :  { %2686 = vadd.xlane.f32.xlu1 %v2685_v3  ;;  %2683 = vadd.xlane.f32.xlu0 %v2682_v60  ;;  %v2676_v1 = vmul.f32 %v6886_v33, %v6886_v33  ;;  %v2677_v31 = vmul.f32 %v6889_v5, %v6889_v5  ;;  %v6906_v21 = vsub.f32 %v2615_v20, %v6835_v55  ;;  %v4300_v20 = vld [vmem:[%s7269_s9 + $0x70] sm:$0xff]   ;;  %v2713_v45 = vmul.f32 1024.0, %v6835_v55 }
 0x4e7   :  { %v2674_v51 = vmul.f32 %v6893_v38, %v6893_v38  ;;  %v2675_v23 = vmul.f32 %v6897_v30, %v6897_v30  ;;  %v6911_v59 = vsub.f32 %v2616_v57, %v6835_v55  ;;  %v6914_v48 = vsub.f32 %v2613_v9, %v6835_v55  ;;  %v4301_v57 = vld [vmem:[%s7269_s9 + $0x28] sm:$0xff]  }
 0x4e8   :  { %v6917_v12 = vsub.f32 %v2614_v63, %v6835_v55  ;;  %v2697_v4 = vadd.f32 %v2677_v31, %v2676_v1  ;;  %v2680_v17 = vmul.f32 %v6906_v21, %v6906_v21  ;;  %v4354_v63 = vmov 0.0  }
 0x4e9   :  { %v2694_v28 = vadd.f32 %v2675_v23, %v2674_v51  ;;  %v2681_v15 = vmul.f32 %v6911_v59, %v6911_v59  ;;  %v2678_v6 = vmul.f32 %v6914_v48, %v6914_v48  ;;  %4027 = vmatprep.subr.bf16.mxu1 %v4354_v63  ;;  %4047 = vmatprep.subr.bf16.mxu0 %v4354_v63 }
 0x4ea   :  { %2692 = vadd.xlane.f32.xlu1 %v2691_v40  ;;  %2689 = vadd.xlane.f32.xlu0 %v2688_v44  ;;  %v2679_v34 = vmul.f32 %v6917_v12, %v6917_v12  ;;  %v2714_v40 = vmul.f32 %v2713_v45, %v6835_v55  ;;  %v2849_v55 = vld [vmem:[%s7271_s8 + $0x2] sm:$0x3] }
 0x4eb   :  { %v2703_v46 = vadd.f32 %v2681_v15, %v2680_v17  ;;  %4043 = vmatprep.mubr.msk.bf16.mxu1 %vm4355_vm2, %v4354_v63  ;;  %4063 = vmatprep.mubr.msk.bf16.mxu0 %vm4355_vm2, %v4354_v63  ;;  %v2737_v17 = vld [vmem:[%s7270_s7 + $0x2] sm:$0x3]  ;;  %v2738_v15 = vld [vmem:[%s7270_s7 + $0x4] sm:$0x3] }
 0x4ec   :  { %v2700_v9 = vadd.f32 %v2679_v34, %v2678_v6  ;;  %4028 = vmatpush3.bf16.msra.mxu1 %v4297_v41  ;;  %4048 = vmatpush3.bf16.msra.mxu0 %v4298_v35  ;;  %v2739_v6 = vld [vmem:[%s7270_s7 + $0x6] sm:$0x3]  ;;  %v2767_v35 = vrot.slane %v2737_v17, %v7686_v26 }
 0x4ed   :  { %4029 = vmatprep.subr.bf16.mxu1 %v4354_v63  ;;  %4049 = vmatprep.subr.bf16.mxu0 %v4354_v63  ;;  %v7694_v34 = vld [vmem:[#allocation2_spill] sm:$0xff] }
 0x4ee   :  { %2698 = vadd.xlane.f32.xlu1 %v2697_v4  ;;  %2695 = vadd.xlane.f32.xlu0 %v2694_v28  ;;  %v2736_v4 = vld [vmem:[%s7270_s7] sm:$0x3]  ;;  %v2763_v41 = vrot.slane %v2737_v17, %v7694_v34 }
 0x4ef   :  { %v2848_v28 = vld [vmem:[%s7271_s8] sm:$0x3] }
 0x4f0   :  { %4030 = vmatpush3.bf16.msra.mxu1 %v4299_v47  ;;  %4050 = vmatpush3.bf16.msra.mxu0 %v4300_v20  ;;  %v2850_v47 = vld [vmem:[%s7271_s8 + $0x4] sm:$0x3]  ;;  %v2851_v20 = vld [vmem:[%s7271_s8 + $0x6] sm:$0x3] }
 0x4f1   :  { %4031 = vmatprep.subr.bf16.mxu1 %v4354_v63  ;;  %4051 = vmatprep.subr.bf16.mxu0 %v4354_v63 }
 0x4f2   :  { %2704 = vadd.xlane.f32.xlu1 %v2703_v46  ;;  %2701 = vadd.xlane.f32.xlu0 %v2700_v9  ;;  %v2755_v46 = vrot.slane %v2736_v4, %v7694_v34  ;;  %v2759_v9 = vrot.slane %v2736_v4, %v7686_v26 }
 0x4f4   :  { %4032 = vmatpush3.bf16.msra.mxu1 %v4301_v57  ;;  %4052 = vmatpush3.bf16.msra.mxu0 %v4302_v43  ;;  %v2867_v57 = vrot.slane %v2848_v28, %v7694_v34  ;;  %v2871_v43 = vrot.slane %v2848_v28, %v7686_v26 }
 0x4f5   :  { %4033 = vmatprep.subr.bf16.mxu1 %v4354_v63  ;;  %4053 = vmatprep.subr.bf16.mxu0 %v4354_v63 }
 0x4f8   :  { %4034 = vmatpush3.bf16.msra.mxu1 %v4303_v52  ;;  %4054 = vmatpush3.bf16.msra.mxu0 %v4304_v10  ;;  %v2875_v52 = vrot.slane %v2849_v55, %v7694_v34  ;;  %v2879_v10 = vrot.slane %v2849_v55, %v7686_v26 }
 0x4f9   :  { %4035 = vmatprep.subr.bf16.mxu1 %v4354_v63  ;;  %4055 = vmatprep.subr.bf16.mxu0 %v4354_v63 }
 0x4fc   :  { %4036 = vmatpush3.bf16.msra.mxu1 %v4305_v7  ;;  %4056 = vmatpush3.bf16.msra.mxu0 %v4306_v27  ;;  %v2771_v7 = vrot.slane %v2738_v15, %v7694_v34  ;;  %v2775_v27 = vrot.slane %v2738_v15, %v7686_v26 }
 0x4fd   :  { %4037 = vmatprep.subr.bf16.mxu1 %v4354_v63  ;;  %4057 = vmatprep.subr.bf16.mxu0 %v4354_v63 }
 0x500   :  { %4038 = vmatpush3.bf16.msra.mxu1 %v4307_v8  ;;  %4058 = vmatpush3.bf16.msra.mxu0 %v4308_v58  ;;  %v2779_v8 = vrot.slane %v2739_v6, %v7694_v34  ;;  %v2783_v58 = vrot.slane %v2739_v6, %v7686_v26 }
 0x501   :  { %4039 = vmatprep.subr.bf16.mxu1 %v4354_v63  ;;  %4059 = vmatprep.subr.bf16.mxu0 %v4354_v63 }
 0x504   :  { %4040 = vmatpush3.bf16.msra.mxu1 %v4309_v24  ;;  %4060 = vmatpush3.bf16.msra.mxu0 %v4310_v18  ;;  %v2883_v18 = vrot.slane %v2850_v47, %v7694_v34 }
 0x505   :  { %4041 = vmatprep.subr.bf16.mxu1 %v4354_v63  ;;  %4061 = vmatprep.subr.bf16.mxu0 %v4354_v63 }
 0x508   :  { %4042 = vmatpush3.bf16.msra.mxu1 %v4311_v53  ;;  %4062 = vmatpush3.bf16.msra.mxu0 %v4312_v13  ;;  %v2887_v53 = vrot.slane %v2850_v47, %v7686_v26  ;;  %v2891_v13 = vrot.slane %v2851_v20, %v7694_v34 }
 0x509   :  { %4067 = vmatprep.subr.bf16.mxu1 %v4354_v63  ;;  %4087 = vmatprep.subr.bf16.mxu0 %v4354_v63 }
 0x56f   :  { %v2687_v56 = vpop.xlane.xlu1 %2686  ;;  %v2684_v19 = vpop.xlane.xlu0 %2683 }
 0x570   :  { %v2706_v42 = vadd.f32 %v2687_v56, %v2684_v19  ;;  %v2895_v56 = vrot.slane %v2851_v20, %v7686_v26 }
 0x573   :  { %v2693_v16 = vpop.xlane.xlu1 %2692  ;;  %v2690_v29 = vpop.xlane.xlu0 %2689 }
 0x574   :  { %v2707_v49 = vadd.f32 %v2706_v42, %v2690_v29 }
 0x576   :  { %v2708_v11 = vadd.f32 %v2707_v49, %v2693_v16 }
 0x577   :  { %v2699_v61 = vpop.xlane.xlu1 %2698  ;;  %v2696_v2 = vpop.xlane.xlu0 %2695 }
 0x578   :  { %v2709_v37 = vadd.f32 %v2708_v11, %v2696_v2 }
 0x57a   :  { %v2710_v39 = vadd.f32 %v2709_v37, %v2699_v61 }
 0x57b   :  { %v2702_v36 = vpop.xlane.xlu0 %2701  ;;  %v2705_v60 = vpop.xlane.xlu1 %2704 }
 0x57c   :  { %v2711_v3 = vadd.f32 %v2710_v39, %v2702_v36 }
 0x57e   :  { %v2712_v44 = vadd.f32 %v2711_v3, %v2705_v60 }
 0x580   :  { %v2715_v1 = vsub.f32 %v2712_v44, %v2714_v40 }
 0x582   :  { %v2716_v31 = vmul.f32 0.0009765625, %v2715_v1 }
 0x584   :  { %v2717_v51 = vmax.f32 %v2716_v31, 0.0 }
 0x586   :  { %v2718_v23 = vadd.f32 1e-05, %v2717_v51 }
 0x588   :  { %4347 = vrsqrt.f32 %v2718_v23 }
 0x595   :  { %v7035_v24 = vpop.eup %4347 }
 0x596   :  { %v2720_v19 = vmul.f32 %v7035_v24, %v6847_v22  ;;  %v2721_v42 = vmul.f32 %v7035_v24, %v6851_v50  ;;  %v2722_v16 = vmul.f32 %v7035_v24, %v6839_v54  ;;  %v2723_v29 = vmul.f32 %v7035_v24, %v6843_v62 }
 0x597   :  { %v2724_v49 = vmul.f32 %v7035_v24, %v6863_v14  ;;  %v2725_v11 = vmul.f32 %v7035_v24, %v6867_v32  ;;  %v2726_v61 = vmul.f32 %v7035_v24, %v6855_v25  ;;  %v2727_v22 = vmul.f32 %v7035_v24, %v6859_v0 }
 0x598   :  { %v2832_v2 = vmul.f32 %v2755_v46, %v2720_v19  ;;  %v2833_v50 = vmul.f32 %v2759_v9, %v2721_v42  ;;  %v2834_v37 = vmul.f32 %v2763_v41, %v2722_v16  ;;  %v2835_v39 = vmul.f32 %v2767_v35, %v2723_v29 }
 0x599   :  { %v2836_v54 = vmul.f32 %v2771_v7, %v2724_v49  ;;  %v2837_v45 = vmul.f32 %v2775_v27, %v2725_v11  ;;  %v2838_v36 = vmul.f32 %v2779_v8, %v2726_v61  ;;  %v2839_v62 = vmul.f32 %v2783_v58, %v2727_v22  ;;  %v4313_v27 = vld [vmem:[%s7269_s9 + $0xb8] sm:$0xff]   ;;  %v2740_v8 = vld [vmem:[%s7270_s7 + $0x8] sm:$0x3]  ;;  %v2743_v11 = vld [vmem:[%s7270_s7 + $0xe] sm:$0x3] }
 0x59a   :  { %v2944_v3 = vadd.f32 %v2867_v57, %v2832_v2  ;;  %v2945_v60 = vadd.f32 %v2871_v43, %v2833_v50  ;;  %v2946_v14 = vadd.f32 %v2875_v52, %v2834_v37  ;;  %v2947_v40 = vadd.f32 %v2879_v10, %v2835_v39  ;;  %v2852_v49 = vld [vmem:[%s7271_s8 + $0x8] sm:$0x3]  ;;  %v2853_v2 = vld [vmem:[%s7271_s8 + $0xa] sm:$0x3] }
 0x59b   :  { %v2948_v44 = vadd.f32 %v2883_v18, %v2836_v54  ;;  %v2949_v32 = vadd.f32 %v2887_v53, %v2837_v45  ;;  %v2950_v1 = vadd.f32 %v2891_v13, %v2838_v36  ;;  %v2951_v31 = vadd.f32 %v2895_v56, %v2839_v62  ;;  %v2741_v18 = vld [vmem:[%s7270_s7 + $0xa] sm:$0x3]  ;;  %v2742_v13 = vld [vmem:[%s7270_s7 + $0xc] sm:$0x3]  ;;  %v4314_v56 = vld [vmem:[%s7269_s9 + $0xf8] sm:$0xff]  }
 0x59c   :  { %vm2960_vm3 = vcmp.gt.f32.partialorder %v2944_v3, 0.0  ;;  %vm2961_vm4 = vcmp.gt.f32.partialorder %v2945_v60, 0.0  ;;  %vm2962_vm5 = vcmp.gt.f32.partialorder %v2946_v14, 0.0  ;;  %vm2963_vm6 = vcmp.gt.f32.partialorder %v2947_v40, 0.0 }
 0x59d   :  { %v2976_v25 = vmul.f32 0.01, %v2944_v3  ;;  %v2977_v0 = vmul.f32 0.01, %v2945_v60  ;;  %v2978_v51 = vmul.f32 0.01, %v2946_v14  ;;  %v2728_v19 = vmul.f32 %v7035_v24, %v6893_v38 }
 0x59e   :  { %v2979_v23 = vmul.f32 0.01, %v2947_v40  ;;  %vm2964_vm7 = vcmp.gt.f32.partialorder %v2948_v44, 0.0  ;;  %vm2965_vm8 = vcmp.gt.f32.partialorder %v2949_v32, 0.0  ;;  %vm2966_vm9 = vcmp.gt.f32.partialorder %v2950_v1, 0.0  ;;  %v4315_v38 = vld [vmem:[%s7269_s9 + $0xb0] sm:$0xff]  }
 0x59f   :  { %v2992_v4 = vsel %vm2960_vm3, %v2944_v3, %v2976_v25  ;;  %v2993_v17 = vsel %vm2961_vm4, %v2945_v60, %v2977_v0  ;;  %v2994_v28 = vsel %vm2962_vm5, %v2946_v14, %v2978_v51  ;;  %vm2967_vm10 = vcmp.gt.f32.partialorder %v2951_v31, 0.0  ;;  %v2855_v25 = vld [vmem:[%s7271_s8 + $0xe] sm:$0x3] }
 0x5a0   :  { %v2995_v55 = vsel %vm2963_vm6, %v2947_v40, %v2979_v23  ;;  %v3008_v15 = vmax.f32 %v2992_v4, %v2994_v28  ;;  %v2980_v6 = vmul.f32 0.01, %v2948_v44  ;;  %v2981_v46 = vmul.f32 0.01, %v2949_v32  ;;  %v2854_v40 = vld [vmem:[%s7271_s8 + $0xc] sm:$0x3] }
 0x5a1   :  { %v3009_v9 = vmax.f32 %v2993_v17, %v2995_v55  ;;  %v2982_v41 = vmul.f32 0.01, %v2950_v1  ;;  %v2983_v35 = vmul.f32 0.01, %v2951_v31  ;;  %v2729_v42 = vmul.f32 %v7035_v24, %v6897_v30 }
 0x5a2   :  { %v2996_v47 = vsel %vm2964_vm7, %v2948_v44, %v2980_v6  ;;  %v2997_v20 = vsel %vm2965_vm8, %v2949_v32, %v2981_v46  ;;  %v2787_v16 = vrot.slane %v2740_v8, %v7694_v34  ;;  %v2791_v29 = vrot.slane %v2740_v8, %v7686_v26  ;;  %v4317_v44 = vld [vmem:[%s7269_s9 + $0xa8] sm:$0xff]   ;;  %v4322_v8 = vld [vmem:[%s7269_s9 + $0xd8] sm:$0xff]  }
 0x5a3   :  { %v3016_v57 = vmax.f32 %v3008_v15, %v3009_v9  ;;  %v2998_v43 = vsel %vm2966_vm9, %v2950_v1, %v2982_v41  ;;  %v2999_v52 = vsel %vm2967_vm10, %v2951_v31, %v2983_v35  ;;  %v2730_v30 = vmul.f32 %v7035_v24, %v6886_v33 }
 0x5a4   :  { %v3010_v10 = vmax.f32 %v2996_v47, %v2998_v43  ;;  %v3011_v7 = vmax.f32 %v2997_v20, %v2999_v52  ;;  %v2795_v22 = vrot.slane %v2741_v18, %v7694_v34  ;;  %v2731_v50 = vmul.f32 %v7035_v24, %v6889_v5  ;;  %v4316_v5 = vld [vmem:[%s7269_s9 + $0xf0] sm:$0xff]  }
 0x5a5   :  { %v3021_v58 = vpack.c.bf16 %v3016_v57, %v3016_v57  ;;  %v2799_v37 = vrot.slane %v2741_v18, %v7686_v26  ;;  %v2803_v39 = vrot.slane %v2742_v13, %v7694_v34  ;;  %v2807_v54 = vrot.slane %v2742_v13, %v7686_v26 }
 0x5a6   :  { %v3017_v53 = vmax.f32 %v3010_v10, %v3011_v7  ;;  %v2899_v33 = vrot.slane %v2852_v49, %v7694_v34  ;;  %v2903_v45 = vrot.slane %v2852_v49, %v7686_v26  ;;  %v2811_v36 = vrot.slane %v2743_v11, %v7694_v34  ;;  %v4324_v49 = vld [vmem:[%s7269_s9 + $0xd0] sm:$0xff]  }
 0x5a7   :  { %4044 = vmatmul.mubr.bf16.vlgmr.msra.gmra.mxu1 %v3021_v58  ;;  %v2815_v62 = vrot.slane %v2743_v11, %v7686_v26  ;;  %v2840_v3 = vmul.f32 %v2787_v16, %v2728_v19  ;;  %v2841_v60 = vmul.f32 %v2791_v29, %v2729_v42  ;;  %v2907_v14 = vrot.slane %v2853_v2, %v7694_v34  ;;  %v4323_v58 = vld [vmem:[%s7269_s9 + $0x90] sm:$0xff]   ;;  %v4325_v11 = vld [vmem:[%s7269_s9 + $0x88] sm:$0xff]  }
 0x5a8   :  { %v3133_v61 = vpack.c.bf16 %v3017_v53, %v3017_v53  ;;  %4068 = vmatpush3.bf16.msra.mxu1 %v4313_v27  ;;  %4083 = vmatprep.mubr.msk.bf16.mxu1 %vm4355_vm2, %v4354_v63  ;;  %v2842_v32 = vmul.f32 %v2795_v22, %v2730_v30  ;;  %v2911_v1 = vrot.slane %v2853_v2, %v7686_v26 }
 0x5a9   :  { %4069 = vmatprep.subr.bf16.mxu1 %v4354_v63  ;;  %v2732_v31 = vmul.f32 %v7035_v24, %v6914_v48  ;;  %v2843_v0 = vmul.f32 %v2799_v37, %v2731_v50  ;;  %v2733_v51 = vmul.f32 %v7035_v24, %v6917_v12  ;;  %v2734_v23 = vmul.f32 %v7035_v24, %v6906_v21  ;;  %v4318_v48 = vld [vmem:[%s7269_s9 + $0xe8] sm:$0xff]   ;;  %v4319_v21 = vld [vmem:[%s7269_s9 + $0xa0] sm:$0xff]  }
 0x5aa   :  { %4064 = vmatmul.mubr.bf16.vlgmr.msra.gmra.mxu0 %v3133_v61  ;;  %v2735_v4 = vmul.f32 %v7035_v24, %v6911_v59  ;;  %v2915_v17 = vrot.slane %v2854_v40, %v7694_v34  ;;  %v2952_v28 = vadd.f32 %v2899_v33, %v2840_v3  ;;  %v2953_v55 = vadd.f32 %v2903_v45, %v2841_v60  ;;  %v4326_v37 = vld [vmem:[%s7269_s9 + $0xc8] sm:$0xff]   ;;  %v4329_v60 = vld [vmem:[%s7272_s11 + $0x38] sm:$0xff]  }
 0x5ab   :  { %4088 = vmatpush3.bf16.msra.mxu0 %v4314_v56  ;;  %4103 = vmatprep.mubr.msk.bf16.mxu0 %vm4355_vm2, %v4354_v63  ;;  %v2919_v15 = vrot.slane %v2854_v40, %v7686_v26  ;;  %v2923_v6 = vrot.slane %v2855_v25, %v7694_v34  ;;  %v2954_v59 = vadd.f32 %v2907_v14, %v2842_v32  ;;  %v4320_v34 = vld [vmem:[%s7269_s9 + $0xe0] sm:$0xff]   ;;  %v4330_v14 = vld [vmem:[%s7272_s11 + $0x30] sm:$0xff]   ;;  %v4331_v40 = vld [vmem:[%s7272_s11 + $0x28] sm:$0xff]  }
 0x5ac   :  { %4089 = vmatprep.subr.bf16.mxu0 %v4354_v63  ;;  %4070 = vmatpush3.bf16.msra.mxu1 %v4315_v38  ;;  %v2844_v12 = vmul.f32 %v2803_v39, %v2732_v31  ;;  %v2927_v24 = vrot.slane %v2855_v25, %v7686_v26  ;;  %v2955_v46 = vadd.f32 %v2911_v1, %v2843_v0  ;;  %vm2968_vm11 = vcmp.gt.f32.partialorder %v2952_v28, 0.0  ;;  %v4321_v26 = vld [vmem:[%s7269_s9 + $0x98] sm:$0xff]   ;;  %v4327_v39 = vld [vmem:[%s7269_s9 + $0x80] sm:$0xff]   ;;  %v4334_v1 = vld [vmem:[%s7272_s11 + $0x10] sm:$0xff]  }
 0x5ad   :  { %4071 = vmatprep.subr.bf16.mxu1 %v4354_v63  ;;  %v2845_v9 = vmul.f32 %v2807_v54, %v2733_v51  ;;  %v2846_v41 = vmul.f32 %v2811_v36, %v2734_v23  ;;  %v2847_v35 = vmul.f32 %v2815_v62, %v2735_v4  ;;  %vm2969_vm12 = vcmp.gt.f32.partialorder %v2953_v55, 0.0  ;;  %v4328_v36 = vld [vmem:[%s7269_s9 + $0xc0] sm:$0xff]   ;;  %v4333_v32 = vld [vmem:[%s7272_s11 + $0x18] sm:$0xff]   ;;  %v4335_v31 = vld [vmem:[%s7272_s11 + $0x8] sm:$0xff]  }
 0x5ae   :  { %v2984_v47 = vmul.f32 0.01, %v2952_v28  ;;  %vm2970_vm13 = vcmp.gt.f32.partialorder %v2954_v59, 0.0  ;;  %v2985_v20 = vmul.f32 0.01, %v2953_v55  ;;  %v2956_v43 = vadd.f32 %v2915_v17, %v2844_v12  ;;  %v4336_v25 = vld [vmem:[%s7272_s11] sm:$0xff]  }
 0x5af   :  { %4090 = vmatpush3.bf16.msra.mxu0 %v4316_v5  ;;  %v2986_v57 = vmul.f32 0.01, %v2954_v59  ;;  %v2987_v52 = vmul.f32 0.01, %v2955_v46  ;;  %v2957_v10 = vadd.f32 %v2919_v15, %v2845_v9  ;;  %v2958_v7 = vadd.f32 %v2923_v6, %v2846_v41  ;;  %v4337_v0 = vld [vmem:[%s7273_s13 + $0x38] sm:$0xff]   ;;  %v4338_v51 = vld [vmem:[%s7273_s13 + $0x30] sm:$0xff]  }
 0x5b0   :  { %4091 = vmatprep.subr.bf16.mxu0 %v4354_v63  ;;  %4072 = vmatpush3.bf16.msra.mxu1 %v4317_v44  ;;  %v2959_v27 = vadd.f32 %v2927_v24, %v2847_v35  ;;  %vm2971_vm14 = vcmp.gt.f32.partialorder %v2955_v46, 0.0  ;;  %v3000_v18 = vsel %vm2968_vm11, %v2952_v28, %v2984_v47  ;;  %v3001_v53 = vsel %vm2969_vm12, %v2953_v55, %v2985_v20  ;;  %v4332_v44 = vld [vmem:[%s7272_s11 + $0x20] sm:$0xff]   ;;  %v4339_v23 = vld [vmem:[%s7273_s13 + $0x28] sm:$0xff]   ;;  %v4341_v17 = vld [vmem:[%s7273_s13 + $0x18] sm:$0xff]  }
 0x5b1   :  { %4073 = vmatprep.subr.bf16.mxu1 %v4354_v63  ;;  %v3002_v13 = vsel %vm2970_vm13, %v2954_v59, %v2986_v57  ;;  %v2988_v56 = vmul.f32 0.01, %v2956_v43  ;;  %v3003_v19 = vsel %vm2971_vm14, %v2955_v46, %v2987_v52  ;;  %v2989_v42 = vmul.f32 0.01, %v2957_v10  ;;  %v4340_v4 = vld [vmem:[%s7273_s13 + $0x20] sm:$0xff]  }
 0x5b2   :  { %v2990_v16 = vmul.f32 0.01, %v2958_v7  ;;  %v2991_v29 = vmul.f32 0.01, %v2959_v27  ;;  %vm2972_vm15 = vcmp.gt.f32.partialorder %v2956_v43, 0.0  ;;  %vm2973_vm0 = vcmp.gt.f32.partialorder %v2957_v10, 0.0 }
 0x5b3   :  { %4092 = vmatpush3.bf16.msra.mxu0 %v4318_v48  ;;  %vm2974_vm1 = vcmp.gt.f32.partialorder %v2958_v7, 0.0  ;;  %vm2975_vm3 = vcmp.gt.f32.partialorder %v2959_v27, 0.0  ;;  %v3012_v61 = vmax.f32 %v3000_v18, %v3002_v13  ;;  %v3013_v38 = vmax.f32 %v3001_v53, %v3003_v19  ;;  %v4342_v48 = vld [vmem:[%s7273_s13 + $0x10] sm:$0xff]   ;;  %v3882_v46 = vld [vmem:[%s7274_s10] ss:$0 sm:$0xff]  ;;  %v4343_v18 = vld [vmem:[%s7273_s13 + $0x8] sm:$0xff]  }
 0x5b4   :  { %4093 = vmatprep.subr.bf16.mxu0 %v4354_v63  ;;  %4074 = vmatpush3.bf16.msra.mxu1 %v4319_v21  ;;  %v3004_v30 = vsel %vm2972_vm15, %v2956_v43, %v2988_v56  ;;  %v3005_v22 = vsel %vm2973_vm0, %v2957_v10, %v2989_v42  ;;  %v3006_v2 = vsel %vm2974_vm1, %v2958_v7, %v2990_v16  ;;  %v4344_v53 = vld [vmem:[%s7273_s13] sm:$0xff]  }
 0x5b5   :  { %4075 = vmatprep.subr.bf16.mxu1 %v4354_v63  ;;  %v3007_v50 = vsel %vm2975_vm3, %v2959_v27, %v2991_v29  ;;  %v3014_v54 = vmax.f32 %v3004_v30, %v3006_v2  ;;  %v3018_v45 = vmax.f32 %v3012_v61, %v3013_v38  ;;  %v3955_v13 = vld [vmem:[%s7275_s12] ss:$0 sm:$0xff] }
 0x5b6   :  { %v3015_v33 = vmax.f32 %v3005_v22, %v3007_v50  ;;  %v3964_v38 = vld [vmem:[%s7276_s14] ss:$0 sm:$0xff] }
 0x5b7   :  { %4094 = vmatpush3.bf16.msra.mxu0 %v4320_v34  ;;  %v3240_v5 = vpack.c.bf16 %v3018_v45, %v3018_v45 }
 0x5b8   :  { %4095 = vmatprep.subr.bf16.mxu0 %v4354_v63  ;;  %4076 = vmatpush3.bf16.msra.mxu1 %v4321_v26  ;;  %v3019_v62 = vmax.f32 %v3014_v54, %v3015_v33 }
 0x5b9   :  { %4077 = vmatprep.subr.bf16.mxu1 %v4354_v63 }
 0x5ba   :  { %v3347_v3 = vpack.c.bf16 %v3019_v62, %v3019_v62 }
 0x5bb   :  { %4096 = vmatpush3.bf16.msra.mxu0 %v4322_v8 }
 0x5bc   :  { %4097 = vmatprep.subr.bf16.mxu0 %v4354_v63  ;;  %4078 = vmatpush3.bf16.msra.mxu1 %v4323_v58 }
 0x5bd   :  { %4079 = vmatprep.subr.bf16.mxu1 %v4354_v63 }
 0x5bf   :  { %4098 = vmatpush3.bf16.msra.mxu0 %v4324_v49 }
 0x5c0   :  { %4099 = vmatprep.subr.bf16.mxu0 %v4354_v63  ;;  %4080 = vmatpush3.bf16.msra.mxu1 %v4325_v11 }
 0x5c1   :  { %4081 = vmatprep.subr.bf16.mxu1 %v4354_v63 }
 0x5c3   :  { %4100 = vmatpush3.bf16.msra.mxu0 %v4326_v37 }
 0x5c4   :  { %4101 = vmatprep.subr.bf16.mxu0 %v4354_v63  ;;  %4082 = vmatpush3.bf16.msra.mxu1 %v4327_v39 }
 0x5c5   :  { %4107 = vmatprep.subr.bf16.mxu1 %v4354_v63 }
 0x5c7   :  { %4102 = vmatpush3.bf16.msra.mxu0 %v4328_v36  ;;  %4084 = vmatmul.mubr.bf16.vlgmr.msra.gmra.mxu1 %v3240_v5 }
 0x5c8   :  { %4123 = vmatprep.mubr.msk.bf16.mxu1 %vm4355_vm2, %v4354_v63  ;;  %4127 = vmatprep.subr.bf16.mxu0 %v4354_v63 }
 0x5c9   :  { %4108 = vmatpush3.bf16.msra.mxu1 %v4329_v60 }
 0x5ca   :  { %4104 = vmatmul.mubr.bf16.vlgmr.msra.gmra.mxu0 %v3347_v3  ;;  %4109 = vmatprep.subr.bf16.mxu1 %v4354_v63 }
 0x5cb   :  { %4143 = vmatprep.mubr.msk.bf16.mxu0 %vm4355_vm2, %v4354_v63  ;;  %4128 = vmatpush3.bf16.msra.mxu0 %v4337_v0 }
 0x5cc   :  { %4129 = vmatprep.subr.bf16.mxu0 %v4354_v63 }
 0x5cd   :  { %4110 = vmatpush3.bf16.msra.mxu1 %v4330_v14 }
 0x5ce   :  { %4111 = vmatprep.subr.bf16.mxu1 %v4354_v63 }
 0x5cf   :  { %4130 = vmatpush3.bf16.msra.mxu0 %v4338_v51 }
 0x5d0   :  { %4131 = vmatprep.subr.bf16.mxu0 %v4354_v63 }
 0x5d1   :  { %4112 = vmatpush3.bf16.msra.mxu1 %v4331_v40 }
 0x5d2   :  { %4113 = vmatprep.subr.bf16.mxu1 %v4354_v63 }
 0x5d3   :  { %4132 = vmatpush3.bf16.msra.mxu0 %v4339_v23 }
 0x5d4   :  { %4133 = vmatprep.subr.bf16.mxu0 %v4354_v63 }
 0x5d5   :  { %4114 = vmatpush3.bf16.msra.mxu1 %v4332_v44 }
 0x5d6   :  { %4115 = vmatprep.subr.bf16.mxu1 %v4354_v63 }
 0x5d7   :  { %4134 = vmatpush3.bf16.msra.mxu0 %v4340_v4 }
 0x5d8   :  { %4135 = vmatprep.subr.bf16.mxu0 %v4354_v63 }
 0x5d9   :  { %4116 = vmatpush3.bf16.msra.mxu1 %v4333_v32 }
 0x5da   :  { %4117 = vmatprep.subr.bf16.mxu1 %v4354_v63 }
 0x5db   :  { %4136 = vmatpush3.bf16.msra.mxu0 %v4341_v17 }
 0x5dc   :  { %4137 = vmatprep.subr.bf16.mxu0 %v4354_v63 }
 0x5dd   :  { %4118 = vmatpush3.bf16.msra.mxu1 %v4334_v1 }
 0x5de   :  { %4119 = vmatprep.subr.bf16.mxu1 %v4354_v63 }
 0x5df   :  { %4138 = vmatpush3.bf16.msra.mxu0 %v4342_v48 }
 0x5e0   :  { %4139 = vmatprep.subr.bf16.mxu0 %v4354_v63 }
 0x5e1   :  { %4120 = vmatpush3.bf16.msra.mxu1 %v4335_v31 }
 0x5e2   :  { %4121 = vmatprep.subr.bf16.mxu1 %v4354_v63 }
 0x5e3   :  { %4140 = vmatpush3.bf16.msra.mxu0 %v4343_v18 }
 0x5e4   :  { %4141 = vmatprep.subr.bf16.mxu0 %v4354_v63 }
 0x5e5   :  { %4122 = vmatpush3.bf16.msra.mxu1 %v4336_v25 }
 0x5e7   :  { %4142 = vmatpush3.bf16.msra.mxu0 %v4344_v53 }
 0x667   :  { %v3120_v28 = vpop.f32.mrf.mxu1 }
 0x668   :  { %v3132_v9 = vadd.f32 %v3882_v46, %v3120_v28 }
 0x669   :  { %v4045_v55 = vpop.f32.mrf.mxu1 }
 0x66a   :  { %v3233_v15 = vpop.f32.mrf.mxu0 }
 0x66b   :  { %v3123_v6 = vpop.f32.mrf.mxu1  ;;  %v3239_v41 = vadd.f32 %v3233_v15, %v3132_v9 }
 0x66c   :  { %v4065_v21 = vpop.f32.mrf.mxu0 }
 0x66d   :  { %v4046_v59 = vpop.f32.mrf.mxu1 }
 0x66e   :  { %v3236_v12 = vpop.f32.mrf.mxu0 }
 0x670   :  { %v4066_v24 = vpop.f32.mrf.mxu0 }
 0x687   :  { %v3340_v35 = vpop.f32.mrf.mxu1 }
 0x688   :  { %v3346_v34 = vadd.f32 %v3340_v35, %v3239_v41 }
 0x689   :  { %v4085_v47 = vpop.f32.mrf.mxu1 }
 0x68a   :  { %v3447_v26 = vpop.f32.mrf.mxu0 }
 0x68b   :  { %v3453_v20 = vadd.f32 %v3447_v26, %v3346_v34  ;;  %v3343_v57 = vpop.f32.mrf.mxu1 }
 0x68c   :  { %v4105_v43 = vpop.f32.mrf.mxu0 }
 0x68d   :  { %vm3454_vm2 = vcmp.gt.f32.partialorder %v3453_v20, 0.0  ;;  %v3455_v52 = vmul.f32 0.01, %v3453_v20  ;;  %v4086_v10 = vpop.f32.mrf.mxu1 }
 0x68e   :  { %v3450_v7 = vpop.f32.mrf.mxu0 }
 0x68f   :  { %v3456_v27 = vsel %vm3454_vm2, %v3453_v20, %v3455_v52 }
 0x690   :  { %v3457_v8 = vpack.c.bf16 %v3456_v27, %v3456_v27  ;;  %v4106_v58 = vpop.f32.mrf.mxu0 }
 0x692   :  { %4124 = vmatmul.mubr.bf16.vlgmr.msra.gmra.mxu1 %v3457_v8 }
 0x752   :  { %v3563_v56 = vpop.f32.mrf.mxu1 }
 0x753   :  { %v3564_v19 = vadd.f32 %v3955_v13, %v3563_v56 }
 0x754   :  { %v4125_v42 = vpop.f32.mrf.mxu1 }
 0x755   :  { %vm3569_vm4 = vcmp.gt.f32.partialorder %v3564_v19, 0.0  ;;  %v3570_v16 = vmul.f32 0.01, %v3564_v19 }
 0x756   :  { %v3566_v29 = vpop.f32.mrf.mxu1 }
 0x757   :  { %v3571_v49 = vsel %vm3569_vm4, %v3564_v19, %v3570_v16 }
 0x758   :  { %v3572_v11 = vpack.c.bf16 %v3571_v49, %v3571_v49  ;;  %v4126_v61 = vpop.f32.mrf.mxu1 }
 0x75a   :  { %4144 = vmatmul.mubr.bf16.vlgmr.msra.gmra.mxu0 %v3572_v11 }
 0x81a   :  { %v3678_v63 = vpop.f32.mrf.mxu0 }
 0x81b   :  { %v3679_v30 = vadd.f32 %v3964_v38, %v3678_v63 }
 0x81c   :  { %v4145_v22 = vpop.f32.mrf.mxu0 }
 0x81d   :  { %3684 = vmax.xlane.f32.xlu0 %v3679_v30 }
 0x81e   :  { %v3681_v2 = vpop.f32.mrf.mxu0 }
 0x820   :  { %v4146_v50 = vpop.f32.mrf.mxu0 }
 0x8a6   :  { %v3685_v37 = vpop.xlane.xlu0 %3684 }
 0x8a7   :  { %v3686_v39 = vsub.f32 %v3679_v30, %v3685_v37 }
 0x8a9   :  { %v3687_v54 = vmul.f32 1.442695, %v3686_v39 }
 0x8ab   :  { %4349 = vpow2.f32 %v3687_v54 }
 0x8b8   :  { %v4350_v33 = vpop.eup %4349 }
 0x8b9   :  { %3689 = vadd.xlane.f32.xlu1 %v4350_v33 }
 0x942   :  { %v3690_v45 = vpop.xlane.xlu1 %3689 }
 0x943   :  { %4351 = vlog2.f32 %v3690_v45 }
 0x950   :  { %v4352_v36 = vpop.eup %4351 }
 0x951   :  { %v3692_v62 = vmul.f32 0.6931472, %v4352_v36 }
 0x953   :  { %v3693_v5 = vsub.f32 %v3686_v39, %v3692_v62 }
 0x955   :  { %3694 = vst [vmem:[%s7277_s15] sm:$0xff] %v3693_v5 }

</bundles_post_ra>
